<compile_context>
chip_gen: v7x
topology: tpu7x:2x2x1
jax: 0.10.0
libtpu: 0.0.40
codegen_flags: <defaults>
</compile_context>

<pallas_src>
import functools

import jax
import jax.numpy as jnp
from jax import lax
from jax.experimental import pallas as pl
from jax.experimental.pallas import tpu as pltpu


def _vmem_spec():
    return pl.BlockSpec(memory_space=pltpu.MemorySpace.VMEM)


def _sigmoid(x):
    # sigmoid via tanh: one EUP transcendental, no divide on the VALU path.
    return 0.5 * jnp.tanh(0.5 * x) + 0.5


# ---------------------------------------------------------------------------
# Fused whole-model kernel.
# ---------------------------------------------------------------------------
def make_fused_kernel(B, T, H, num_layers, num_inputs):
    G = 4 * H  # gate width [i | f | g | o]

    def kernel(*refs):
        in_refs = refs[:num_inputs]
        o_ref = refs[num_inputs]
        gx_f_ref, gx_b_ref, out_f_ref, out_b_ref = refs[num_inputs + 1:]

        it = iter(in_refs)
        x_ref = next(it)       # (T*B, C*H*W)  time-major flattened frames
        w_feat_ref = next(it)  # (C*H*W, F)    spatial mean folded into the weights
        b_feat_ref = next(it)  # (1, F)

        # ---- feature extractor stand-in (see TODO above): one dense matmul ----
        feats = (jnp.dot(x_ref[...], w_feat_ref[...],
                         preferred_element_type=jnp.float32)
                 + b_feat_ref[...])                                   # (T*B, F)

        # masks hoisted out of every loop
        lane = lax.broadcasted_iota(jnp.int32, (2 * B, G), 1)
        is_g_lane = (lane >= 2 * H) & (lane < 3 * H)
        row = lax.broadcasted_iota(jnp.int32, (2 * B, G), 0)
        is_fwd_row = row < B

        prev_f = feats  # layer-0 input for the forward direction
        prev_b = feats  # and for the backward direction (same features)

        for layer in range(num_layers):
            # -- hoisted input projection: big MXU matmuls, off the serial path --
            if layer == 0:
                wx_f = next(it)[...]                     # (F, 4H)
                wx_b = next(it)[...]
                gf = jnp.dot(prev_f, wx_f, preferred_element_type=jnp.float32)
                gb = jnp.dot(prev_b, wx_b, preferred_element_type=jnp.float32)
            else:
                wx_ff = next(it)[...]                    # (4H, 4H), rows [3H,4H) live
                wx_fb = next(it)[...]
                wx_bf = next(it)[...]
                wx_bb = next(it)[...]
                gf = (jnp.dot(prev_f, wx_ff, preferred_element_type=jnp.float32)
                      + jnp.dot(prev_b, wx_fb, preferred_element_type=jnp.float32))
                gb = (jnp.dot(prev_f, wx_bf, preferred_element_type=jnp.float32)
                      + jnp.dot(prev_b, wx_bb, preferred_element_type=jnp.float32))
            whh_cat = next(it)[...]                      # (4H, 8H): [fwd | bwd] W_hh.T
            bias_f = next(it)[...]                       # (1, 4H) = bias_ih + bias_hh
            bias_b = next(it)[...]

            gx_f_ref[...] = gf + bias_f                  # (T*B, 4H), row = t*B + b
            gx_b_ref[...] = gb + bias_b

            # -- sequential recurrence, both directions per step, fully unrolled --
            def step(t, carry):
                hw, cw = carry                           # (2B, 4H) wide state
                rec8 = jnp.dot(hw, whh_cat, preferred_element_type=jnp.float32)
                rec = jnp.where(is_fwd_row, rec8[:, :G], rec8[:, G:])
                gx_t = jnp.concatenate(
                    [gx_f_ref[pl.ds(t * B, B), :],
                     gx_b_ref[pl.ds((T - 1 - t) * B, B), :]], axis=0)
                gates = gx_t + rec                       # (2B, 4H) = [i | f | g | o]
                act = jnp.where(is_g_lane, jnp.tanh(gates), _sigmoid(gates))
                ig = act * pltpu.roll(act, 2 * H, 1)     # i-block: i*g
                fc = act * cw                            # f-block: f*c_{t-1}
                c_new = pltpu.roll(ig, H, 1) + fc        # f-block: c_t
                h_new = act * pltpu.roll(jnp.tanh(c_new), 2 * H, 1)  # o-block: h_t
                out_f_ref[pl.ds(t * B, B), :] = h_new[0:B]
                out_b_ref[pl.ds((T - 1 - t) * B, B), :] = h_new[B:2 * B]
                return h_new, c_new

            zero = jnp.zeros((2 * B, G), jnp.float32)
            lax.fori_loop(0, T, step, (zero, zero), unroll=True)

            prev_f = out_f_ref[...]                      # (T*B, 4H), h in the o-block
            prev_b = out_b_ref[...]

        # ---- center frame -> Linear(2H, 1) + sigmoid (VPU mul + lane reduce) ----
        wfc_f = next(it)[...]                            # (1, 4H), live lanes [3H,4H)
        wfc_b = next(it)[...]
        b_fc = next(it)[...]                             # (1, 1)
        c0 = (T // 2) * B
        center_f = out_f_ref[c0:c0 + B, :]               # (B, 4H)
        center_b = out_b_ref[c0:c0 + B, :]
        logit = (jnp.sum(center_f * wfc_f, axis=1, keepdims=True)
                 + jnp.sum(center_b * wfc_b, axis=1, keepdims=True) + b_fc)
        o_ref[...] = _sigmoid(logit)

    return kernel


def model_forward(x, packed, hidden_dim, num_layers):
    # x: (B, T, C, H, W)  ==  (batch, timesteps, C, H, W) in the PyTorch module.
    B, T, C, Hi, Wi = x.shape
    H = hidden_dim
    # time-major flattening so that kernel row index = t*B + b
    x_flat = jnp.transpose(x, (1, 0, 2, 3, 4)).reshape(T * B, C * Hi * Wi)

    flat_inputs = [x_flat] + list(packed["flat"])
    num_inputs = len(flat_inputs)
    kernel = make_fused_kernel(B, T, H, num_layers, num_inputs)

    return pl.pallas_call(
        kernel,
        out_shape=jax.ShapeDtypeStruct((B, 1), jnp.float32),
        in_specs=[_vmem_spec() for _ in flat_inputs],
        out_specs=_vmem_spec(),
        scratch_shapes=[
            pltpu.VMEM((T * B, 4 * H), jnp.float32),   # gx forward  (x@Wih + b)
            pltpu.VMEM((T * B, 4 * H), jnp.float32),   # gx backward
            pltpu.VMEM((T * B, 4 * H), jnp.float32),   # h outputs forward  (wide)
            pltpu.VMEM((T * B, 4 * H), jnp.float32),   # h outputs backward (wide)
        ],
    )(*flat_inputs)


# ---------------------------------------------------------------------------
# Parameter init (PyTorch-style layouts) + repacking into the kernel layout.
# ---------------------------------------------------------------------------
def init_params(key, C, feature_size, hidden_dim, num_layers):
    def uni(k, shape, scale):
        return jax.random.uniform(k, shape, jnp.float32, -scale, scale)

    keys = iter(jax.random.split(key, 4 + num_layers * 12))
    params = {
        "w_proj": uni(next(keys), (C, feature_size), 1.0 / jnp.sqrt(C)),
        "b_proj": uni(next(keys), (1, feature_size), 1.0 / jnp.sqrt(C)),
    }
    k_lstm = 1.0 / jnp.sqrt(hidden_dim)
    layers = []
    for layer in range(num_layers):
        din = feature_size if layer == 0 else 2 * hidden_dim
        layer_p = []
        for _direction in range(2):
            wih_t = uni(next(keys), (din, 4 * hidden_dim), k_lstm)          # W_ih.T
            whh_t = uni(next(keys), (hidden_dim, 4 * hidden_dim), k_lstm)   # W_hh.T
            b = uni(next(keys), (1, 4 * hidden_dim), k_lstm) + uni(
                next(keys), (1, 4 * hidden_dim), k_lstm)                    # b_ih + b_hh
            layer_p.extend([wih_t, whh_t, b])
        layers.append(tuple(layer_p))
    params["lstm"] = layers
    k_fc = 1.0 / jnp.sqrt(2 * hidden_dim)
    params["w_fc"] = uni(next(keys), (2 * hidden_dim, 1), k_fc)
    params["b_fc"] = uni(next(keys), (1, 1), k_fc)
    return params


def pack_params(params, hidden_dim, spatial):
    """Repack PyTorch-layout weights into the kernel's lane-dense 'wide' layout."""
    H = hidden_dim
    G = 4 * H

    def widen_rows(w):  # (H, 4H) -> (4H, 4H) with the live block at rows [3H, 4H)
        return jnp.zeros((G, G), jnp.float32).at[3 * H:4 * H].set(w)

    flat = []
    # fold the 1/(H*W) spatial mean into the projection: one lane-aligned matmul
    w_feat = jnp.repeat(params["w_proj"], spatial, axis=0) / float(spatial)
    flat += [w_feat, params["b_proj"]]

    for layer, (wih_f, whh_f, b_f, wih_b, whh_b, b_b) in enumerate(params["lstm"]):
        if layer == 0:
            flat += [wih_f, wih_b]                                  # (F, 4H), dense
        else:
            flat += [widen_rows(wih_f[0:H]), widen_rows(wih_f[H:2 * H]),
                     widen_rows(wih_b[0:H]), widen_rows(wih_b[H:2 * H])]
        whh_cat = (jnp.zeros((G, 2 * G), jnp.float32)
                   .at[3 * H:4 * H, 0:G].set(whh_f)
                   .at[3 * H:4 * H, G:2 * G].set(whh_b))
        flat += [whh_cat, b_f, b_b]

    wfc = params["w_fc"]                                            # (2H, 1)
    wfc_f = jnp.zeros((1, G), jnp.float32).at[0, 3 * H:4 * H].set(wfc[0:H, 0])
    wfc_b = jnp.zeros((1, G), jnp.float32).at[0, 3 * H:4 * H].set(wfc[H:2 * H, 0])
    flat += [wfc_f, wfc_b, params["b_fc"]]
    return {"flat": flat}


if __name__ == "__main__":
    B, T, C, Himg, Wimg = 2, 8, 3, 16, 16
    hidden_dim, num_layers = 32, 2
    feature_size = 64  # real ResNet-50 would give 2048; kept small for the demo

    key = jax.random.PRNGKey(0)
    k_params, k_x = jax.random.split(key)
    params = init_params(k_params, C, feature_size, hidden_dim, num_layers)
    packed = pack_params(params, hidden_dim, Himg * Wimg)
    x = jax.random.uniform(k_x, (B, T, C, Himg, Wimg), jnp.float32)

    fwd = jax.jit(functools.partial(model_forward, hidden_dim=hidden_dim,
                                    num_layers=num_layers))
    out = fwd(x, packed)
    jax.block_until_ready(out)
    assert out.shape == (B, 1)
    print("KERNEL_OK")
</pallas_src>

<mosaic_0001>
module attributes {stable_mosaic.version = 11 : i64} {
  func.func @kernel(%arg0: memref<16x768xf32, #tpu.memory_space<vmem>>, %arg1: memref<768x64xf32, #tpu.memory_space<vmem>>, %arg2: memref<1x64xf32, #tpu.memory_space<vmem>>, %arg3: memref<64x128xf32, #tpu.memory_space<vmem>>, %arg4: memref<64x128xf32, #tpu.memory_space<vmem>>, %arg5: memref<128x256xf32, #tpu.memory_space<vmem>>, %arg6: memref<1x128xf32, #tpu.memory_space<vmem>>, %arg7: memref<1x128xf32, #tpu.memory_space<vmem>>, %arg8: memref<128x128xf32, #tpu.memory_space<vmem>>, %arg9: memref<128x128xf32, #tpu.memory_space<vmem>>, %arg10: memref<128x128xf32, #tpu.memory_space<vmem>>, %arg11: memref<128x128xf32, #tpu.memory_space<vmem>>, %arg12: memref<128x256xf32, #tpu.memory_space<vmem>>, %arg13: memref<1x128xf32, #tpu.memory_space<vmem>>, %arg14: memref<1x128xf32, #tpu.memory_space<vmem>>, %arg15: memref<1x128xf32, #tpu.memory_space<vmem>>, %arg16: memref<1x128xf32, #tpu.memory_space<vmem>>, %arg17: memref<1x1xf32, #tpu.memory_space<vmem>>, %arg18: memref<2x1xf32, #tpu.memory_space<vmem>>, %arg19: memref<16x128xf32, #tpu.memory_space<vmem>>, %arg20: memref<16x128xf32, #tpu.memory_space<vmem>>, %arg21: memref<16x128xf32, #tpu.memory_space<vmem>>, %arg22: memref<16x128xf32, #tpu.memory_space<vmem>>) attributes {dimension_semantics = [], scalar_prefetch = 0 : i64, scratch_operands = 4 : i64, tpu.core_type = #tpu.core_type<tc>} {
    %c0 = arith.constant 0 : index
    %c0_0 = arith.constant 0 : index
    %0 = vector.load %arg0[%c0, %c0_0] : memref<16x768xf32, #tpu.memory_space<vmem>>, vector<16x768xf32>
    %c0_1 = arith.constant 0 : index
    %c0_2 = arith.constant 0 : index
    %1 = vector.load %arg1[%c0_1, %c0_2] : memref<768x64xf32, #tpu.memory_space<vmem>>, vector<768x64xf32>
    %cst = arith.constant dense<0.000000e+00> : vector<16x64xf32>
    %2 = tpu.matmul %0, %1, %cst {dimension_numbers = #tpu.dot_dimension_numbers<[1], [0], [0], [1], [0, 0, 1, 1], [], []>} : vector<16x768xf32>, vector<768x64xf32>, vector<16x64xf32> -> vector<16x64xf32>
    %c0_3 = arith.constant 0 : index
    %c0_4 = arith.constant 0 : index
    %3 = vector.load %arg2[%c0_3, %c0_4] : memref<1x64xf32, #tpu.memory_space<vmem>>, vector<1x64xf32>
    %4 = vector.broadcast %3 : vector<1x64xf32> to vector<16x64xf32>
    %5 = arith.addf %2, %4 : vector<16x64xf32>
    %6 = tpu.iota {dimensions = array<i32: 1>} : vector<4x128xi32>
    %c64_i32 = arith.constant 64 : i32
    %7 = vector.broadcast %c64_i32 : i32 to vector<4x128xi32>
    %8 = arith.cmpi sge, %6, %7 : vector<4x128xi32>
    %c96_i32 = arith.constant 96 : i32
    %9 = vector.broadcast %c96_i32 : i32 to vector<4x128xi32>
    %10 = arith.cmpi slt, %6, %9 : vector<4x128xi32>
    %11 = arith.andi %8, %10 : vector<4x128xi1>
    %12 = tpu.iota {dimensions = array<i32: 0>} : vector<4x128xi32>
    %c2_i32 = arith.constant 2 : i32
    %13 = vector.broadcast %c2_i32 : i32 to vector<4x128xi32>
    %14 = arith.cmpi slt, %12, %13 : vector<4x128xi32>
    %c0_5 = arith.constant 0 : index
    %c0_6 = arith.constant 0 : index
    %15 = vector.load %arg3[%c0_5, %c0_6] : memref<64x128xf32, #tpu.memory_space<vmem>>, vector<64x128xf32>
    %c0_7 = arith.constant 0 : index
    %c0_8 = arith.constant 0 : index
    %16 = vector.load %arg4[%c0_7, %c0_8] : memref<64x128xf32, #tpu.memory_space<vmem>>, vector<64x128xf32>
    %cst_9 = arith.constant dense<0.000000e+00> : vector<16x128xf32>
    %17 = tpu.matmul %5, %15, %cst_9 {dimension_numbers = #tpu.dot_dimension_numbers<[1], [0], [0], [1], [0, 0, 1, 1], [], []>} : vector<16x64xf32>, vector<64x128xf32>, vector<16x128xf32> -> vector<16x128xf32>
    %cst_10 = arith.constant dense<0.000000e+00> : vector<16x128xf32>
    %18 = tpu.matmul %5, %16, %cst_10 {dimension_numbers = #tpu.dot_dimension_numbers<[1], [0], [0], [1], [0, 0, 1, 1], [], []>} : vector<16x64xf32>, vector<64x128xf32>, vector<16x128xf32> -> vector<16x128xf32>
    %c0_11 = arith.constant 0 : index
    %c0_12 = arith.constant 0 : index
    %19 = vector.load %arg5[%c0_11, %c0_12] : memref<128x256xf32, #tpu.memory_space<vmem>>, vector<128x256xf32>
    %c0_13 = arith.constant 0 : index
    %c0_14 = arith.constant 0 : index
    %20 = vector.load %arg6[%c0_13, %c0_14] : memref<1x128xf32, #tpu.memory_space<vmem>>, vector<1x128xf32>
    %c0_15 = arith.constant 0 : index
    %c0_16 = arith.constant 0 : index
    %21 = vector.load %arg7[%c0_15, %c0_16] : memref<1x128xf32, #tpu.memory_space<vmem>>, vector<1x128xf32>
    %22 = vector.broadcast %20 : vector<1x128xf32> to vector<16x128xf32>
    %23 = arith.addf %17, %22 : vector<16x128xf32>
    %c0_17 = arith.constant 0 : index
    %c0_18 = arith.constant 0 : index
    %24 = vector.load %arg19[%c0_17, %c0_18] : memref<16x128xf32, #tpu.memory_space<vmem>>, vector<16x128xf32>
    tpu.vector_store %arg19[%c0_17, %c0_18], %23 {strides = array<i32>} : memref<16x128xf32, #tpu.memory_space<vmem>>, vector<16x128xf32>,
    %25 = vector.broadcast %21 : vector<1x128xf32> to vector<16x128xf32>
    %26 = arith.addf %18, %25 : vector<16x128xf32>
    %c0_19 = arith.constant 0 : index
    %c0_20 = arith.constant 0 : index
    %27 = vector.load %arg20[%c0_19, %c0_20] : memref<16x128xf32, #tpu.memory_space<vmem>>, vector<16x128xf32>
    tpu.vector_store %arg20[%c0_19, %c0_20], %26 {strides = array<i32>} : memref<16x128xf32, #tpu.memory_space<vmem>>, vector<16x128xf32>,
    %cst_21 = arith.constant 0.000000e+00 : f32
    %28 = vector.broadcast %cst_21 : f32 to vector<4x128xf32>
    %c0_i32 = arith.constant 0 : i32
    %cst_22 = arith.constant dense<0.000000e+00> : vector<4x256xf32>
    %29 = tpu.matmul %28, %19, %cst_22 {dimension_numbers = #tpu.dot_dimension_numbers<[1], [0], [0], [1], [0, 0, 1, 1], [], []>} : vector<4x128xf32>, vector<128x256xf32>, vector<4x256xf32> -> vector<4x256xf32>
    %30 = vector.extract_strided_slice %29 {offsets = [0, 0], sizes = [4, 128], strides = [1, 1]} : vector<4x256xf32> to vector<4x128xf32>
    %31 = vector.extract_strided_slice %29 {offsets = [0, 128], sizes = [4, 128], strides = [1, 1]} : vector<4x256xf32> to vector<4x128xf32>
    %32 = arith.select %14, %30, %31 : vector<4x128xi1>, vector<4x128xf32>
    %c2_i32_23 = arith.constant 2 : i32
    %33 = arith.muli %c0_i32, %c2_i32_23 : i32
    %34 = arith.index_cast %33 : i32 to index
    %c0_24 = arith.constant 0 : index
    %35 = vector.load %arg19[%34, %c0_24] : memref<16x128xf32, #tpu.memory_space<vmem>>, vector<2x128xf32>
    %c7_i32 = arith.constant 7 : i32
    %36 = arith.subi %c7_i32, %c0_i32 : i32
    %c2_i32_25 = arith.constant 2 : i32
    %37 = arith.muli %36, %c2_i32_25 : i32
    %38 = arith.index_cast %37 : i32 to index
    %c0_26 = arith.constant 0 : index
    %39 = vector.load %arg20[%38, %c0_26] : memref<16x128xf32, #tpu.memory_space<vmem>>, vector<2x128xf32>
    %40 = tpu.concatenate %35, %39 in 0 : vector<2x128xf32>, vector<2x128xf32> -> vector<4x128xf32>
    %41 = arith.addf %40, %32 : vector<4x128xf32>
    %42 = math.tanh %41 : vector<4x128xf32>
    %cst_27 = arith.constant 5.000000e-01 : f32
    %43 = vector.broadcast %cst_27 : f32 to vector<4x128xf32>
    %44 = arith.mulf %43, %41 : vector<4x128xf32>
    %45 = math.tanh %44 : vector<4x128xf32>
    %cst_28 = arith.constant 5.000000e-01 : f32
    %46 = vector.broadcast %cst_28 : f32 to vector<4x128xf32>
    %47 = arith.mulf %46, %45 : vector<4x128xf32>
    %cst_29 = arith.constant 5.000000e-01 : f32
    %48 = vector.broadcast %cst_29 : f32 to vector<4x128xf32>
    %49 = arith.addf %47, %48 : vector<4x128xf32>
    %50 = arith.select %11, %42, %49 : vector<4x128xi1>, vector<4x128xf32>
    %c64_i32_30 = arith.constant 64 : i32
    %51 = tpu.dynamic_rotate %50 by %c64_i32_30 dim 1 : vector<4x128xf32>, i32 -> vector<4x128xf32>
    %52 = arith.mulf %50, %51 : vector<4x128xf32>
    %53 = arith.mulf %50, %28 : vector<4x128xf32>
    %c32_i32 = arith.constant 32 : i32
    %54 = tpu.dynamic_rotate %52 by %c32_i32 dim 1 : vector<4x128xf32>, i32 -> vector<4x128xf32>
    %55 = arith.addf %54, %53 : vector<4x128xf32>
    %56 = math.tanh %55 : vector<4x128xf32>
    %c64_i32_31 = arith.constant 64 : i32
    %57 = tpu.dynamic_rotate %56 by %c64_i32_31 dim 1 : vector<4x128xf32>, i32 -> vector<4x128xf32>
    %58 = arith.mulf %50, %57 : vector<4x128xf32>
    %59 = vector.extract_strided_slice %58 {offsets = [0, 0], sizes = [2, 128], strides = [1, 1]} : vector<4x128xf32> to vector<2x128xf32>
    %c2_i32_32 = arith.constant 2 : i32
    %60 = arith.muli %c0_i32, %c2_i32_32 : i32
    %61 = arith.index_cast %60 : i32 to index
    %c0_33 = arith.constant 0 : index
    %62 = vector.load %arg21[%61, %c0_33] : memref<16x128xf32, #tpu.memory_space<vmem>>, vector<2x128xf32>
    tpu.vector_store %arg21[%61, %c0_33], %59 {strides = array<i32>} : memref<16x128xf32, #tpu.memory_space<vmem>>, vector<2x128xf32>,
    %63 = vector.extract_strided_slice %58 {offsets = [2, 0], sizes = [2, 128], strides = [1, 1]} : vector<4x128xf32> to vector<2x128xf32>
    %c7_i32_34 = arith.constant 7 : i32
    %64 = arith.subi %c7_i32_34, %c0_i32 : i32
    %c2_i32_35 = arith.constant 2 : i32
    %65 = arith.muli %64, %c2_i32_35 : i32
    %66 = arith.index_cast %65 : i32 to index
    %c0_36 = arith.constant 0 : index
    %67 = vector.load %arg22[%66, %c0_36] : memref<16x128xf32, #tpu.memory_space<vmem>>, vector<2x128xf32>
    tpu.vector_store %arg22[%66, %c0_36], %63 {strides = array<i32>} : memref<16x128xf32, #tpu.memory_space<vmem>>, vector<2x128xf32>,
    %c1_i32 = arith.constant 1 : i32
    %cst_37 = arith.constant dense<0.000000e+00> : vector<4x256xf32>
    %68 = tpu.matmul %58, %19, %cst_37 {dimension_numbers = #tpu.dot_dimension_numbers<[1], [0], [0], [1], [0, 0, 1, 1], [], []>} : vector<4x128xf32>, vector<128x256xf32>, vector<4x256xf32> -> vector<4x256xf32>
    %69 = vector.extract_strided_slice %68 {offsets = [0, 0], sizes = [4, 128], strides = [1, 1]} : vector<4x256xf32> to vector<4x128xf32>
    %70 = vector.extract_strided_slice %68 {offsets = [0, 128], sizes = [4, 128], strides = [1, 1]} : vector<4x256xf32> to vector<4x128xf32>
    %71 = arith.select %14, %69, %70 : vector<4x128xi1>, vector<4x128xf32>
    %c2_i32_38 = arith.constant 2 : i32
    %72 = arith.muli %c1_i32, %c2_i32_38 : i32
    %73 = arith.index_cast %72 : i32 to index
    %c0_39 = arith.constant 0 : index
    %74 = vector.load %arg19[%73, %c0_39] : memref<16x128xf32, #tpu.memory_space<vmem>>, vector<2x128xf32>
    %c7_i32_40 = arith.constant 7 : i32
    %75 = arith.subi %c7_i32_40, %c1_i32 : i32
    %c2_i32_41 = arith.constant 2 : i32
    %76 = arith.muli %75, %c2_i32_41 : i32
    %77 = arith.index_cast %76 : i32 to index
    %c0_42 = arith.constant 0 : index
    %78 = vector.load %arg20[%77, %c0_42] : memref<16x128xf32, #tpu.memory_space<vmem>>, vector<2x128xf32>
    %79 = tpu.concatenate %74, %78 in 0 : vector<2x128xf32>, vector<2x128xf32> -> vector<4x128xf32>
    %80 = arith.addf %79, %71 : vector<4x128xf32>
    %81 = math.tanh %80 : vector<4x128xf32>
    %cst_43 = arith.constant 5.000000e-01 : f32
    %82 = vector.broadcast %cst_43 : f32 to vector<4x128xf32>
    %83 = arith.mulf %82, %80 : vector<4x128xf32>
    %84 = math.tanh %83 : vector<4x128xf32>
    %cst_44 = arith.constant 5.000000e-01 : f32
    %85 = vector.broadcast %cst_44 : f32 to vector<4x128xf32>
    %86 = arith.mulf %85, %84 : vector<4x128xf32>
    %cst_45 = arith.constant 5.000000e-01 : f32
    %87 = vector.broadcast %cst_45 : f32 to vector<4x128xf32>
    %88 = arith.addf %86, %87 : vector<4x128xf32>
    %89 = arith.select %11, %81, %88 : vector<4x128xi1>, vector<4x128xf32>
    %c64_i32_46 = arith.constant 64 : i32
    %90 = tpu.dynamic_rotate %89 by %c64_i32_46 dim 1 : vector<4x128xf32>, i32 -> vector<4x128xf32>
    %91 = arith.mulf %89, %90 : vector<4x128xf32>
    %92 = arith.mulf %89, %55 : vector<4x128xf32>
    %c32_i32_47 = arith.constant 32 : i32
    %93 = tpu.dynamic_rotate %91 by %c32_i32_47 dim 1 : vector<4x128xf32>, i32 -> vector<4x128xf32>
    %94 = arith.addf %93, %92 : vector<4x128xf32>
    %95 = math.tanh %94 : vector<4x128xf32>
    %c64_i32_48 = arith.constant 64 : i32
    %96 = tpu.dynamic_rotate %95 by %c64_i32_48 dim 1 : vector<4x128xf32>, i32 -> vector<4x128xf32>
    %97 = arith.mulf %89, %96 : vector<4x128xf32>
    %98 = vector.extract_strided_slice %97 {offsets = [0, 0], sizes = [2, 128], strides = [1, 1]} : vector<4x128xf32> to vector<2x128xf32>
    %c2_i32_49 = arith.constant 2 : i32
    %99 = arith.muli %c1_i32, %c2_i32_49 : i32
    %100 = arith.index_cast %99 : i32 to index
    %c0_50 = arith.constant 0 : index
    %101 = vector.load %arg21[%100, %c0_50] : memref<16x128xf32, #tpu.memory_space<vmem>>, vector<2x128xf32>
    tpu.vector_store %arg21[%100, %c0_50], %98 {strides = array<i32>} : memref<16x128xf32, #tpu.memory_space<vmem>>, vector<2x128xf32>,
    %102 = vector.extract_strided_slice %97 {offsets = [2, 0], sizes = [2, 128], strides = [1, 1]} : vector<4x128xf32> to vector<2x128xf32>
    %c7_i32_51 = arith.constant 7 : i32
    %103 = arith.subi %c7_i32_51, %c1_i32 : i32
    %c2_i32_52 = arith.constant 2 : i32
    %104 = arith.muli %103, %c2_i32_52 : i32
    %105 = arith.index_cast %104 : i32 to index
    %c0_53 = arith.constant 0 : index
    %106 = vector.load %arg22[%105, %c0_53] : memref<16x128xf32, #tpu.memory_space<vmem>>, vector<2x128xf32>
    tpu.vector_store %arg22[%105, %c0_53], %102 {strides = array<i32>} : memref<16x128xf32, #tpu.memory_space<vmem>>, vector<2x128xf32>,
    %c2_i32_54 = arith.constant 2 : i32
    %cst_55 = arith.constant dense<0.000000e+00> : vector<4x256xf32>
    %107 = tpu.matmul %97, %19, %cst_55 {dimension_numbers = #tpu.dot_dimension_numbers<[1], [0], [0], [1], [0, 0, 1, 1], [], []>} : vector<4x128xf32>, vector<128x256xf32>, vector<4x256xf32> -> vector<4x256xf32>
    %108 = vector.extract_strided_slice %107 {offsets = [0, 0], sizes = [4, 128], strides = [1, 1]} : vector<4x256xf32> to vector<4x128xf32>
    %109 = vector.extract_strided_slice %107 {offsets = [0, 128], sizes = [4, 128], strides = [1, 1]} : vector<4x256xf32> to vector<4x128xf32>
    %110 = arith.select %14, %108, %109 : vector<4x128xi1>, vector<4x128xf32>
    %c2_i32_56 = arith.constant 2 : i32
    %111 = arith.muli %c2_i32_54, %c2_i32_56 : i32
    %112 = arith.index_cast %111 : i32 to index
    %c0_57 = arith.constant 0 : index
    %113 = vector.load %arg19[%112, %c0_57] : memref<16x128xf32, #tpu.memory_space<vmem>>, vector<2x128xf32>
    %c7_i32_58 = arith.constant 7 : i32
    %114 = arith.subi %c7_i32_58, %c2_i32_54 : i32
    %c2_i32_59 = arith.constant 2 : i32
    %115 = arith.muli %114, %c2_i32_59 : i32
    %116 = arith.index_cast %115 : i32 to index
    %c0_60 = arith.constant 0 : index
    %117 = vector.load %arg20[%116, %c0_60] : memref<16x128xf32, #tpu.memory_space<vmem>>, vector<2x128xf32>
    %118 = tpu.concatenate %113, %117 in 0 : vector<2x128xf32>, vector<2x128xf32> -> vector<4x128xf32>
    %119 = arith.addf %118, %110 : vector<4x128xf32>
    %120 = math.tanh %119 : vector<4x128xf32>
    %cst_61 = arith.constant 5.000000e-01 : f32
    %121 = vector.broadcast %cst_61 : f32 to vector<4x128xf32>
    %122 = arith.mulf %121, %119 : vector<4x128xf32>
    %123 = math.tanh %122 : vector<4x128xf32>
    %cst_62 = arith.constant 5.000000e-01 : f32
    %124 = vector.broadcast %cst_62 : f32 to vector<4x128xf32>
    %125 = arith.mulf %124, %123 : vector<4x128xf32>
    %cst_63 = arith.constant 5.000000e-01 : f32
    %126 = vector.broadcast %cst_63 : f32 to vector<4x128xf32>
    %127 = arith.addf %125, %126 : vector<4x128xf32>
    %128 = arith.select %11, %120, %127 : vector<4x128xi1>, vector<4x128xf32>
    %c64_i32_64 = arith.constant 64 : i32
    %129 = tpu.dynamic_rotate %128 by %c64_i32_64 dim 1 : vector<4x128xf32>, i32 -> vector<4x128xf32>
    %130 = arith.mulf %128, %129 : vector<4x128xf32>
    %131 = arith.mulf %128, %94 : vector<4x128xf32>
    %c32_i32_65 = arith.constant 32 : i32
    %132 = tpu.dynamic_rotate %130 by %c32_i32_65 dim 1 : vector<4x128xf32>, i32 -> vector<4x128xf32>
    %133 = arith.addf %132, %131 : vector<4x128xf32>
    %134 = math.tanh %133 : vector<4x128xf32>
    %c64_i32_66 = arith.constant 64 : i32
    %135 = tpu.dynamic_rotate %134 by %c64_i32_66 dim 1 : vector<4x128xf32>, i32 -> vector<4x128xf32>
    %136 = arith.mulf %128, %135 : vector<4x128xf32>
    %137 = vector.extract_strided_slice %136 {offsets = [0, 0], sizes = [2, 128], strides = [1, 1]} : vector<4x128xf32> to vector<2x128xf32>
    %c2_i32_67 = arith.constant 2 : i32
    %138 = arith.muli %c2_i32_54, %c2_i32_67 : i32
    %139 = arith.index_cast %138 : i32 to index
    %c0_68 = arith.constant 0 : index
    %140 = vector.load %arg21[%139, %c0_68] : memref<16x128xf32, #tpu.memory_space<vmem>>, vector<2x128xf32>
    tpu.vector_store %arg21[%139, %c0_68], %137 {strides = array<i32>} : memref<16x128xf32, #tpu.memory_space<vmem>>, vector<2x128xf32>,
    %141 = vector.extract_strided_slice %136 {offsets = [2, 0], sizes = [2, 128], strides = [1, 1]} : vector<4x128xf32> to vector<2x128xf32>
    %c7_i32_69 = arith.constant 7 : i32
    %142 = arith.subi %c7_i32_69, %c2_i32_54 : i32
    %c2_i32_70 = arith.constant 2 : i32
    %143 = arith.muli %142, %c2_i32_70 : i32
    %144 = arith.index_cast %143 : i32 to index
    %c0_71 = arith.constant 0 : index
    %145 = vector.load %arg22[%144, %c0_71] : memref<16x128xf32, #tpu.memory_space<vmem>>, vector<2x128xf32>
    tpu.vector_store %arg22[%144, %c0_71], %141 {strides = array<i32>} : memref<16x128xf32, #tpu.memory_space<vmem>>, vector<2x128xf32>,
    %c3_i32 = arith.constant 3 : i32
    %cst_72 = arith.constant dense<0.000000e+00> : vector<4x256xf32>
    %146 = tpu.matmul %136, %19, %cst_72 {dimension_numbers = #tpu.dot_dimension_numbers<[1], [0], [0], [1], [0, 0, 1, 1], [], []>} : vector<4x128xf32>, vector<128x256xf32>, vector<4x256xf32> -> vector<4x256xf32>
    %147 = vector.extract_strided_slice %146 {offsets = [0, 0], sizes = [4, 128], strides = [1, 1]} : vector<4x256xf32> to vector<4x128xf32>
    %148 = vector.extract_strided_slice %146 {offsets = [0, 128], sizes = [4, 128], strides = [1, 1]} : vector<4x256xf32> to vector<4x128xf32>
    %149 = arith.select %14, %147, %148 : vector<4x128xi1>, vector<4x128xf32>
    %c2_i32_73 = arith.constant 2 : i32
    %150 = arith.muli %c3_i32, %c2_i32_73 : i32
    %151 = arith.index_cast %150 : i32 to index
    %c0_74 = arith.constant 0 : index
    %152 = vector.load %arg19[%151, %c0_74] : memref<16x128xf32, #tpu.memory_space<vmem>>, vector<2x128xf32>
    %c7_i32_75 = arith.constant 7 : i32
    %153 = arith.subi %c7_i32_75, %c3_i32 : i32
    %c2_i32_76 = arith.constant 2 : i32
    %154 = arith.muli %153, %c2_i32_76 : i32
    %155 = arith.index_cast %154 : i32 to index
    %c0_77 = arith.constant 0 : index
    %156 = vector.load %arg20[%155, %c0_77] : memref<16x128xf32, #tpu.memory_space<vmem>>, vector<2x128xf32>
    %157 = tpu.concatenate %152, %156 in 0 : vector<2x128xf32>, vector<2x128xf32> -> vector<4x128xf32>
    %158 = arith.addf %157, %149 : vector<4x128xf32>
    %159 = math.tanh %158 : vector<4x128xf32>
    %cst_78 = arith.constant 5.000000e-01 : f32
    %160 = vector.broadcast %cst_78 : f32 to vector<4x128xf32>
    %161 = arith.mulf %160, %158 : vector<4x128xf32>
    %162 = math.tanh %161 : vector<4x128xf32>
    %cst_79 = arith.constant 5.000000e-01 : f32
    %163 = vector.broadcast %cst_79 : f32 to vector<4x128xf32>
    %164 = arith.mulf %163, %162 : vector<4x128xf32>
    %cst_80 = arith.constant 5.000000e-01 : f32
    %165 = vector.broadcast %cst_80 : f32 to vector<4x128xf32>
    %166 = arith.addf %164, %165 : vector<4x128xf32>
    %167 = arith.select %11, %159, %166 : vector<4x128xi1>, vector<4x128xf32>
    %c64_i32_81 = arith.constant 64 : i32
    %168 = tpu.dynamic_rotate %167 by %c64_i32_81 dim 1 : vector<4x128xf32>, i32 -> vector<4x128xf32>
    %169 = arith.mulf %167, %168 : vector<4x128xf32>
    %170 = arith.mulf %167, %133 : vector<4x128xf32>
    %c32_i32_82 = arith.constant 32 : i32
    %171 = tpu.dynamic_rotate %169 by %c32_i32_82 dim 1 : vector<4x128xf32>, i32 -> vector<4x128xf32>
    %172 = arith.addf %171, %170 : vector<4x128xf32>
    %173 = math.tanh %172 : vector<4x128xf32>
    %c64_i32_83 = arith.constant 64 : i32
    %174 = tpu.dynamic_rotate %173 by %c64_i32_83 dim 1 : vector<4x128xf32>, i32 -> vector<4x128xf32>
    %175 = arith.mulf %167, %174 : vector<4x128xf32>
    %176 = vector.extract_strided_slice %175 {offsets = [0, 0], sizes = [2, 128], strides = [1, 1]} : vector<4x128xf32> to vector<2x128xf32>
    %c2_i32_84 = arith.constant 2 : i32
    %177 = arith.muli %c3_i32, %c2_i32_84 : i32
    %178 = arith.index_cast %177 : i32 to index
    %c0_85 = arith.constant 0 : index
    %179 = vector.load %arg21[%178, %c0_85] : memref<16x128xf32, #tpu.memory_space<vmem>>, vector<2x128xf32>
    tpu.vector_store %arg21[%178, %c0_85], %176 {strides = array<i32>} : memref<16x128xf32, #tpu.memory_space<vmem>>, vector<2x128xf32>,
    %180 = vector.extract_strided_slice %175 {offsets = [2, 0], sizes = [2, 128], strides = [1, 1]} : vector<4x128xf32> to vector<2x128xf32>
    %c7_i32_86 = arith.constant 7 : i32
    %181 = arith.subi %c7_i32_86, %c3_i32 : i32
    %c2_i32_87 = arith.constant 2 : i32
    %182 = arith.muli %181, %c2_i32_87 : i32
    %183 = arith.index_cast %182 : i32 to index
    %c0_88 = arith.constant 0 : index
    %184 = vector.load %arg22[%183, %c0_88] : memref<16x128xf32, #tpu.memory_space<vmem>>, vector<2x128xf32>
    tpu.vector_store %arg22[%183, %c0_88], %180 {strides = array<i32>} : memref<16x128xf32, #tpu.memory_space<vmem>>, vector<2x128xf32>,
    %c4_i32 = arith.constant 4 : i32
    %cst_89 = arith.constant dense<0.000000e+00> : vector<4x256xf32>
    %185 = tpu.matmul %175, %19, %cst_89 {dimension_numbers = #tpu.dot_dimension_numbers<[1], [0], [0], [1], [0, 0, 1, 1], [], []>} : vector<4x128xf32>, vector<128x256xf32>, vector<4x256xf32> -> vector<4x256xf32>
    %186 = vector.extract_strided_slice %185 {offsets = [0, 0], sizes = [4, 128], strides = [1, 1]} : vector<4x256xf32> to vector<4x128xf32>
    %187 = vector.extract_strided_slice %185 {offsets = [0, 128], sizes = [4, 128], strides = [1, 1]} : vector<4x256xf32> to vector<4x128xf32>
    %188 = arith.select %14, %186, %187 : vector<4x128xi1>, vector<4x128xf32>
    %c2_i32_90 = arith.constant 2 : i32
    %189 = arith.muli %c4_i32, %c2_i32_90 : i32
    %190 = arith.index_cast %189 : i32 to index
    %c0_91 = arith.constant 0 : index
    %191 = vector.load %arg19[%190, %c0_91] : memref<16x128xf32, #tpu.memory_space<vmem>>, vector<2x128xf32>
    %c7_i32_92 = arith.constant 7 : i32
    %192 = arith.subi %c7_i32_92, %c4_i32 : i32
    %c2_i32_93 = arith.constant 2 : i32
    %193 = arith.muli %192, %c2_i32_93 : i32
    %194 = arith.index_cast %193 : i32 to index
    %c0_94 = arith.constant 0 : index
    %195 = vector.load %arg20[%194, %c0_94] : memref<16x128xf32, #tpu.memory_space<vmem>>, vector<2x128xf32>
    %196 = tpu.concatenate %191, %195 in 0 : vector<2x128xf32>, vector<2x128xf32> -> vector<4x128xf32>
    %197 = arith.addf %196, %188 : vector<4x128xf32>
    %198 = math.tanh %197 : vector<4x128xf32>
    %cst_95 = arith.constant 5.000000e-01 : f32
    %199 = vector.broadcast %cst_95 : f32 to vector<4x128xf32>
    %200 = arith.mulf %199, %197 : vector<4x128xf32>
    %201 = math.tanh %200 : vector<4x128xf32>
    %cst_96 = arith.constant 5.000000e-01 : f32
    %202 = vector.broadcast %cst_96 : f32 to vector<4x128xf32>
    %203 = arith.mulf %202, %201 : vector<4x128xf32>
    %cst_97 = arith.constant 5.000000e-01 : f32
    %204 = vector.broadcast %cst_97 : f32 to vector<4x128xf32>
    %205 = arith.addf %203, %204 : vector<4x128xf32>
    %206 = arith.select %11, %198, %205 : vector<4x128xi1>, vector<4x128xf32>
    %c64_i32_98 = arith.constant 64 : i32
    %207 = tpu.dynamic_rotate %206 by %c64_i32_98 dim 1 : vector<4x128xf32>, i32 -> vector<4x128xf32>
    %208 = arith.mulf %206, %207 : vector<4x128xf32>
    %209 = arith.mulf %206, %172 : vector<4x128xf32>
    %c32_i32_99 = arith.constant 32 : i32
    %210 = tpu.dynamic_rotate %208 by %c32_i32_99 dim 1 : vector<4x128xf32>, i32 -> vector<4x128xf32>
    %211 = arith.addf %210, %209 : vector<4x128xf32>
    %212 = math.tanh %211 : vector<4x128xf32>
    %c64_i32_100 = arith.constant 64 : i32
    %213 = tpu.dynamic_rotate %212 by %c64_i32_100 dim 1 : vector<4x128xf32>, i32 -> vector<4x128xf32>
    %214 = arith.mulf %206, %213 : vector<4x128xf32>
    %215 = vector.extract_strided_slice %214 {offsets = [0, 0], sizes = [2, 128], strides = [1, 1]} : vector<4x128xf32> to vector<2x128xf32>
    %c2_i32_101 = arith.constant 2 : i32
    %216 = arith.muli %c4_i32, %c2_i32_101 : i32
    %217 = arith.index_cast %216 : i32 to index
    %c0_102 = arith.constant 0 : index
    %218 = vector.load %arg21[%217, %c0_102] : memref<16x128xf32, #tpu.memory_space<vmem>>, vector<2x128xf32>
    tpu.vector_store %arg21[%217, %c0_102], %215 {strides = array<i32>} : memref<16x128xf32, #tpu.memory_space<vmem>>, vector<2x128xf32>,
    %219 = vector.extract_strided_slice %214 {offsets = [2, 0], sizes = [2, 128], strides = [1, 1]} : vector<4x128xf32> to vector<2x128xf32>
    %c7_i32_103 = arith.constant 7 : i32
    %220 = arith.subi %c7_i32_103, %c4_i32 : i32
    %c2_i32_104 = arith.constant 2 : i32
    %221 = arith.muli %220, %c2_i32_104 : i32
    %222 = arith.index_cast %221 : i32 to index
    %c0_105 = arith.constant 0 : index
    %223 = vector.load %arg22[%222, %c0_105] : memref<16x128xf32, #tpu.memory_space<vmem>>, vector<2x128xf32>
    tpu.vector_store %arg22[%222, %c0_105], %219 {strides = array<i32>} : memref<16x128xf32, #tpu.memory_space<vmem>>, vector<2x128xf32>,
    %c5_i32 = arith.constant 5 : i32
    %cst_106 = arith.constant dense<0.000000e+00> : vector<4x256xf32>
    %224 = tpu.matmul %214, %19, %cst_106 {dimension_numbers = #tpu.dot_dimension_numbers<[1], [0], [0], [1], [0, 0, 1, 1], [], []>} : vector<4x128xf32>, vector<128x256xf32>, vector<4x256xf32> -> vector<4x256xf32>
    %225 = vector.extract_strided_slice %224 {offsets = [0, 0], sizes = [4, 128], strides = [1, 1]} : vector<4x256xf32> to vector<4x128xf32>
    %226 = vector.extract_strided_slice %224 {offsets = [0, 128], sizes = [4, 128], strides = [1, 1]} : vector<4x256xf32> to vector<4x128xf32>
    %227 = arith.select %14, %225, %226 : vector<4x128xi1>, vector<4x128xf32>
    %c2_i32_107 = arith.constant 2 : i32
    %228 = arith.muli %c5_i32, %c2_i32_107 : i32
    %229 = arith.index_cast %228 : i32 to index
    %c0_108 = arith.constant 0 : index
    %230 = vector.load %arg19[%229, %c0_108] : memref<16x128xf32, #tpu.memory_space<vmem>>, vector<2x128xf32>
    %c7_i32_109 = arith.constant 7 : i32
    %231 = arith.subi %c7_i32_109, %c5_i32 : i32
    %c2_i32_110 = arith.constant 2 : i32
    %232 = arith.muli %231, %c2_i32_110 : i32
    %233 = arith.index_cast %232 : i32 to index
    %c0_111 = arith.constant 0 : index
    %234 = vector.load %arg20[%233, %c0_111] : memref<16x128xf32, #tpu.memory_space<vmem>>, vector<2x128xf32>
    %235 = tpu.concatenate %230, %234 in 0 : vector<2x128xf32>, vector<2x128xf32> -> vector<4x128xf32>
    %236 = arith.addf %235, %227 : vector<4x128xf32>
    %237 = math.tanh %236 : vector<4x128xf32>
    %cst_112 = arith.constant 5.000000e-01 : f32
    %238 = vector.broadcast %cst_112 : f32 to vector<4x128xf32>
    %239 = arith.mulf %238, %236 : vector<4x128xf32>
    %240 = math.tanh %239 : vector<4x128xf32>
    %cst_113 = arith.constant 5.000000e-01 : f32
    %241 = vector.broadcast %cst_113 : f32 to vector<4x128xf32>
    %242 = arith.mulf %241, %240 : vector<4x128xf32>
    %cst_114 = arith.constant 5.000000e-01 : f32
    %243 = vector.broadcast %cst_114 : f32 to vector<4x128xf32>
    %244 = arith.addf %242, %243 : vector<4x128xf32>
    %245 = arith.select %11, %237, %244 : vector<4x128xi1>, vector<4x128xf32>
    %c64_i32_115 = arith.constant 64 : i32
    %246 = tpu.dynamic_rotate %245 by %c64_i32_115 dim 1 : vector<4x128xf32>, i32 -> vector<4x128xf32>
    %247 = arith.mulf %245, %246 : vector<4x128xf32>
    %248 = arith.mulf %245, %211 : vector<4x128xf32>
    %c32_i32_116 = arith.constant 32 : i32
    %249 = tpu.dynamic_rotate %247 by %c32_i32_116 dim 1 : vector<4x128xf32>, i32 -> vector<4x128xf32>
    %250 = arith.addf %249, %248 : vector<4x128xf32>
    %251 = math.tanh %250 : vector<4x128xf32>
    %c64_i32_117 = arith.constant 64 : i32
    %252 = tpu.dynamic_rotate %251 by %c64_i32_117 dim 1 : vector<4x128xf32>, i32 -> vector<4x128xf32>
    %253 = arith.mulf %245, %252 : vector<4x128xf32>
    %254 = vector.extract_strided_slice %253 {offsets = [0, 0], sizes = [2, 128], strides = [1, 1]} : vector<4x128xf32> to vector<2x128xf32>
    %c2_i32_118 = arith.constant 2 : i32
    %255 = arith.muli %c5_i32, %c2_i32_118 : i32
    %256 = arith.index_cast %255 : i32 to index
    %c0_119 = arith.constant 0 : index
    %257 = vector.load %arg21[%256, %c0_119] : memref<16x128xf32, #tpu.memory_space<vmem>>, vector<2x128xf32>
    tpu.vector_store %arg21[%256, %c0_119], %254 {strides = array<i32>} : memref<16x128xf32, #tpu.memory_space<vmem>>, vector<2x128xf32>,
    %258 = vector.extract_strided_slice %253 {offsets = [2, 0], sizes = [2, 128], strides = [1, 1]} : vector<4x128xf32> to vector<2x128xf32>
    %c7_i32_120 = arith.constant 7 : i32
    %259 = arith.subi %c7_i32_120, %c5_i32 : i32
    %c2_i32_121 = arith.constant 2 : i32
    %260 = arith.muli %259, %c2_i32_121 : i32
    %261 = arith.index_cast %260 : i32 to index
    %c0_122 = arith.constant 0 : index
    %262 = vector.load %arg22[%261, %c0_122] : memref<16x128xf32, #tpu.memory_space<vmem>>, vector<2x128xf32>
    tpu.vector_store %arg22[%261, %c0_122], %258 {strides = array<i32>} : memref<16x128xf32, #tpu.memory_space<vmem>>, vector<2x128xf32>,
    %c6_i32 = arith.constant 6 : i32
    %cst_123 = arith.constant dense<0.000000e+00> : vector<4x256xf32>
    %263 = tpu.matmul %253, %19, %cst_123 {dimension_numbers = #tpu.dot_dimension_numbers<[1], [0], [0], [1], [0, 0, 1, 1], [], []>} : vector<4x128xf32>, vector<128x256xf32>, vector<4x256xf32> -> vector<4x256xf32>
    %264 = vector.extract_strided_slice %263 {offsets = [0, 0], sizes = [4, 128], strides = [1, 1]} : vector<4x256xf32> to vector<4x128xf32>
    %265 = vector.extract_strided_slice %263 {offsets = [0, 128], sizes = [4, 128], strides = [1, 1]} : vector<4x256xf32> to vector<4x128xf32>
    %266 = arith.select %14, %264, %265 : vector<4x128xi1>, vector<4x128xf32>
    %c2_i32_124 = arith.constant 2 : i32
    %267 = arith.muli %c6_i32, %c2_i32_124 : i32
    %268 = arith.index_cast %267 : i32 to index
    %c0_125 = arith.constant 0 : index
    %269 = vector.load %arg19[%268, %c0_125] : memref<16x128xf32, #tpu.memory_space<vmem>>, vector<2x128xf32>
    %c7_i32_126 = arith.constant 7 : i32
    %270 = arith.subi %c7_i32_126, %c6_i32 : i32
    %c2_i32_127 = arith.constant 2 : i32
    %271 = arith.muli %270, %c2_i32_127 : i32
    %272 = arith.index_cast %271 : i32 to index
    %c0_128 = arith.constant 0 : index
    %273 = vector.load %arg20[%272, %c0_128] : memref<16x128xf32, #tpu.memory_space<vmem>>, vector<2x128xf32>
    %274 = tpu.concatenate %269, %273 in 0 : vector<2x128xf32>, vector<2x128xf32> -> vector<4x128xf32>
    %275 = arith.addf %274, %266 : vector<4x128xf32>
    %276 = math.tanh %275 : vector<4x128xf32>
    %cst_129 = arith.constant 5.000000e-01 : f32
    %277 = vector.broadcast %cst_129 : f32 to vector<4x128xf32>
    %278 = arith.mulf %277, %275 : vector<4x128xf32>
    %279 = math.tanh %278 : vector<4x128xf32>
    %cst_130 = arith.constant 5.000000e-01 : f32
    %280 = vector.broadcast %cst_130 : f32 to vector<4x128xf32>
    %281 = arith.mulf %280, %279 : vector<4x128xf32>
    %cst_131 = arith.constant 5.000000e-01 : f32
    %282 = vector.broadcast %cst_131 : f32 to vector<4x128xf32>
    %283 = arith.addf %281, %282 : vector<4x128xf32>
    %284 = arith.select %11, %276, %283 : vector<4x128xi1>, vector<4x128xf32>
    %c64_i32_132 = arith.constant 64 : i32
    %285 = tpu.dynamic_rotate %284 by %c64_i32_132 dim 1 : vector<4x128xf32>, i32 -> vector<4x128xf32>
    %286 = arith.mulf %284, %285 : vector<4x128xf32>
    %287 = arith.mulf %284, %250 : vector<4x128xf32>
    %c32_i32_133 = arith.constant 32 : i32
    %288 = tpu.dynamic_rotate %286 by %c32_i32_133 dim 1 : vector<4x128xf32>, i32 -> vector<4x128xf32>
    %289 = arith.addf %288, %287 : vector<4x128xf32>
    %290 = math.tanh %289 : vector<4x128xf32>
    %c64_i32_134 = arith.constant 64 : i32
    %291 = tpu.dynamic_rotate %290 by %c64_i32_134 dim 1 : vector<4x128xf32>, i32 -> vector<4x128xf32>
    %292 = arith.mulf %284, %291 : vector<4x128xf32>
    %293 = vector.extract_strided_slice %292 {offsets = [0, 0], sizes = [2, 128], strides = [1, 1]} : vector<4x128xf32> to vector<2x128xf32>
    %c2_i32_135 = arith.constant 2 : i32
    %294 = arith.muli %c6_i32, %c2_i32_135 : i32
    %295 = arith.index_cast %294 : i32 to index
    %c0_136 = arith.constant 0 : index
    %296 = vector.load %arg21[%295, %c0_136] : memref<16x128xf32, #tpu.memory_space<vmem>>, vector<2x128xf32>
    tpu.vector_store %arg21[%295, %c0_136], %293 {strides = array<i32>} : memref<16x128xf32, #tpu.memory_space<vmem>>, vector<2x128xf32>,
    %297 = vector.extract_strided_slice %292 {offsets = [2, 0], sizes = [2, 128], strides = [1, 1]} : vector<4x128xf32> to vector<2x128xf32>
    %c7_i32_137 = arith.constant 7 : i32
    %298 = arith.subi %c7_i32_137, %c6_i32 : i32
    %c2_i32_138 = arith.constant 2 : i32
    %299 = arith.muli %298, %c2_i32_138 : i32
    %300 = arith.index_cast %299 : i32 to index
    %c0_139 = arith.constant 0 : index
    %301 = vector.load %arg22[%300, %c0_139] : memref<16x128xf32, #tpu.memory_space<vmem>>, vector<2x128xf32>
    tpu.vector_store %arg22[%300, %c0_139], %297 {strides = array<i32>} : memref<16x128xf32, #tpu.memory_space<vmem>>, vector<2x128xf32>,
    %c7_i32_140 = arith.constant 7 : i32
    %cst_141 = arith.constant dense<0.000000e+00> : vector<4x256xf32>
    %302 = tpu.matmul %292, %19, %cst_141 {dimension_numbers = #tpu.dot_dimension_numbers<[1], [0], [0], [1], [0, 0, 1, 1], [], []>} : vector<4x128xf32>, vector<128x256xf32>, vector<4x256xf32> -> vector<4x256xf32>
    %303 = vector.extract_strided_slice %302 {offsets = [0, 0], sizes = [4, 128], strides = [1, 1]} : vector<4x256xf32> to vector<4x128xf32>
    %304 = vector.extract_strided_slice %302 {offsets = [0, 128], sizes = [4, 128], strides = [1, 1]} : vector<4x256xf32> to vector<4x128xf32>
    %305 = arith.select %14, %303, %304 : vector<4x128xi1>, vector<4x128xf32>
    %c2_i32_142 = arith.constant 2 : i32
    %306 = arith.muli %c7_i32_140, %c2_i32_142 : i32
    %307 = arith.index_cast %306 : i32 to index
    %c0_143 = arith.constant 0 : index
    %308 = vector.load %arg19[%307, %c0_143] : memref<16x128xf32, #tpu.memory_space<vmem>>, vector<2x128xf32>
    %c7_i32_144 = arith.constant 7 : i32
    %309 = arith.subi %c7_i32_144, %c7_i32_140 : i32
    %c2_i32_145 = arith.constant 2 : i32
    %310 = arith.muli %309, %c2_i32_145 : i32
    %311 = arith.index_cast %310 : i32 to index
    %c0_146 = arith.constant 0 : index
    %312 = vector.load %arg20[%311, %c0_146] : memref<16x128xf32, #tpu.memory_space<vmem>>, vector<2x128xf32>
    %313 = tpu.concatenate %308, %312 in 0 : vector<2x128xf32>, vector<2x128xf32> -> vector<4x128xf32>
    %314 = arith.addf %313, %305 : vector<4x128xf32>
    %315 = math.tanh %314 : vector<4x128xf32>
    %cst_147 = arith.constant 5.000000e-01 : f32
    %316 = vector.broadcast %cst_147 : f32 to vector<4x128xf32>
    %317 = arith.mulf %316, %314 : vector<4x128xf32>
    %318 = math.tanh %317 : vector<4x128xf32>
    %cst_148 = arith.constant 5.000000e-01 : f32
    %319 = vector.broadcast %cst_148 : f32 to vector<4x128xf32>
    %320 = arith.mulf %319, %318 : vector<4x128xf32>
    %cst_149 = arith.constant 5.000000e-01 : f32
    %321 = vector.broadcast %cst_149 : f32 to vector<4x128xf32>
    %322 = arith.addf %320, %321 : vector<4x128xf32>
    %323 = arith.select %11, %315, %322 : vector<4x128xi1>, vector<4x128xf32>
    %c64_i32_150 = arith.constant 64 : i32
    %324 = tpu.dynamic_rotate %323 by %c64_i32_150 dim 1 : vector<4x128xf32>, i32 -> vector<4x128xf32>
    %325 = arith.mulf %323, %324 : vector<4x128xf32>
    %326 = arith.mulf %323, %289 : vector<4x128xf32>
    %c32_i32_151 = arith.constant 32 : i32
    %327 = tpu.dynamic_rotate %325 by %c32_i32_151 dim 1 : vector<4x128xf32>, i32 -> vector<4x128xf32>
    %328 = arith.addf %327, %326 : vector<4x128xf32>
    %329 = math.tanh %328 : vector<4x128xf32>
    %c64_i32_152 = arith.constant 64 : i32
    %330 = tpu.dynamic_rotate %329 by %c64_i32_152 dim 1 : vector<4x128xf32>, i32 -> vector<4x128xf32>
    %331 = arith.mulf %323, %330 : vector<4x128xf32>
    %332 = vector.extract_strided_slice %331 {offsets = [0, 0], sizes = [2, 128], strides = [1, 1]} : vector<4x128xf32> to vector<2x128xf32>
    %c2_i32_153 = arith.constant 2 : i32
    %333 = arith.muli %c7_i32_140, %c2_i32_153 : i32
    %334 = arith.index_cast %333 : i32 to index
    %c0_154 = arith.constant 0 : index
    %335 = vector.load %arg21[%334, %c0_154] : memref<16x128xf32, #tpu.memory_space<vmem>>, vector<2x128xf32>
    tpu.vector_store %arg21[%334, %c0_154], %332 {strides = array<i32>} : memref<16x128xf32, #tpu.memory_space<vmem>>, vector<2x128xf32>,
    %336 = vector.extract_strided_slice %331 {offsets = [2, 0], sizes = [2, 128], strides = [1, 1]} : vector<4x128xf32> to vector<2x128xf32>
    %c7_i32_155 = arith.constant 7 : i32
    %337 = arith.subi %c7_i32_155, %c7_i32_140 : i32
    %c2_i32_156 = arith.constant 2 : i32
    %338 = arith.muli %337, %c2_i32_156 : i32
    %339 = arith.index_cast %338 : i32 to index
    %c0_157 = arith.constant 0 : index
    %340 = vector.load %arg22[%339, %c0_157] : memref<16x128xf32, #tpu.memory_space<vmem>>, vector<2x128xf32>
    tpu.vector_store %arg22[%339, %c0_157], %336 {strides = array<i32>} : memref<16x128xf32, #tpu.memory_space<vmem>>, vector<2x128xf32>,
    %c8_i32 = arith.constant 8 : i32
    %c0_158 = arith.constant 0 : index
    %c0_159 = arith.constant 0 : index
    %341 = vector.load %arg21[%c0_158, %c0_159] : memref<16x128xf32, #tpu.memory_space<vmem>>, vector<16x128xf32>
    %c0_160 = arith.constant 0 : index
    %c0_161 = arith.constant 0 : index
    %342 = vector.load %arg22[%c0_160, %c0_161] : memref<16x128xf32, #tpu.memory_space<vmem>>, vector<16x128xf32>
    %c0_162 = arith.constant 0 : index
    %c0_163 = arith.constant 0 : index
    %343 = vector.load %arg8[%c0_162, %c0_163] : memref<128x128xf32, #tpu.memory_space<vmem>>, vector<128x128xf32>
    %c0_164 = arith.constant 0 : index
    %c0_165 = arith.constant 0 : index
    %344 = vector.load %arg9[%c0_164, %c0_165] : memref<128x128xf32, #tpu.memory_space<vmem>>, vector<128x128xf32>
    %c0_166 = arith.constant 0 : index
    %c0_167 = arith.constant 0 : index
    %345 = vector.load %arg10[%c0_166, %c0_167] : memref<128x128xf32, #tpu.memory_space<vmem>>, vector<128x128xf32>
    %c0_168 = arith.constant 0 : index
    %c0_169 = arith.constant 0 : index
    %346 = vector.load %arg11[%c0_168, %c0_169] : memref<128x128xf32, #tpu.memory_space<vmem>>, vector<128x128xf32>
    %cst_170 = arith.constant dense<0.000000e+00> : vector<16x128xf32>
    %347 = tpu.matmul %341, %343, %cst_170 {dimension_numbers = #tpu.dot_dimension_numbers<[1], [0], [0], [1], [0, 0, 1, 1], [], []>} : vector<16x128xf32>, vector<128x128xf32>, vector<16x128xf32> -> vector<16x128xf32>
    %cst_171 = arith.constant dense<0.000000e+00> : vector<16x128xf32>
    %348 = tpu.matmul %342, %344, %cst_171 {dimension_numbers = #tpu.dot_dimension_numbers<[1], [0], [0], [1], [0, 0, 1, 1], [], []>} : vector<16x128xf32>, vector<128x128xf32>, vector<16x128xf32> -> vector<16x128xf32>
    %349 = arith.addf %347, %348 : vector<16x128xf32>
    %cst_172 = arith.constant dense<0.000000e+00> : vector<16x128xf32>
    %350 = tpu.matmul %341, %345, %cst_172 {dimension_numbers = #tpu.dot_dimension_numbers<[1], [0], [0], [1], [0, 0, 1, 1], [], []>} : vector<16x128xf32>, vector<128x128xf32>, vector<16x128xf32> -> vector<16x128xf32>
    %cst_173 = arith.constant dense<0.000000e+00> : vector<16x128xf32>
    %351 = tpu.matmul %342, %346, %cst_173 {dimension_numbers = #tpu.dot_dimension_numbers<[1], [0], [0], [1], [0, 0, 1, 1], [], []>} : vector<16x128xf32>, vector<128x128xf32>, vector<16x128xf32> -> vector<16x128xf32>
    %352 = arith.addf %350, %351 : vector<16x128xf32>
    %c0_174 = arith.constant 0 : index
    %c0_175 = arith.constant 0 : index
    %353 = vector.load %arg12[%c0_174, %c0_175] : memref<128x256xf32, #tpu.memory_space<vmem>>, vector<128x256xf32>
    %c0_176 = arith.constant 0 : index
    %c0_177 = arith.constant 0 : index
    %354 = vector.load %arg13[%c0_176, %c0_177] : memref<1x128xf32, #tpu.memory_space<vmem>>, vector<1x128xf32>
    %c0_178 = arith.constant 0 : index
    %c0_179 = arith.constant 0 : index
    %355 = vector.load %arg14[%c0_178, %c0_179] : memref<1x128xf32, #tpu.memory_space<vmem>>, vector<1x128xf32>
    %356 = vector.broadcast %354 : vector<1x128xf32> to vector<16x128xf32>
    %357 = arith.addf %349, %356 : vector<16x128xf32>
    %c0_180 = arith.constant 0 : index
    %c0_181 = arith.constant 0 : index
    %358 = vector.load %arg19[%c0_180, %c0_181] : memref<16x128xf32, #tpu.memory_space<vmem>>, vector<16x128xf32>
    tpu.vector_store %arg19[%c0_180, %c0_181], %357 {strides = array<i32>} : memref<16x128xf32, #tpu.memory_space<vmem>>, vector<16x128xf32>,
    %359 = vector.broadcast %355 : vector<1x128xf32> to vector<16x128xf32>
    %360 = arith.addf %352, %359 : vector<16x128xf32>
    %c0_182 = arith.constant 0 : index
    %c0_183 = arith.constant 0 : index
    %361 = vector.load %arg20[%c0_182, %c0_183] : memref<16x128xf32, #tpu.memory_space<vmem>>, vector<16x128xf32>
    tpu.vector_store %arg20[%c0_182, %c0_183], %360 {strides = array<i32>} : memref<16x128xf32, #tpu.memory_space<vmem>>, vector<16x128xf32>,
    %cst_184 = arith.constant 0.000000e+00 : f32
    %362 = vector.broadcast %cst_184 : f32 to vector<4x128xf32>
    %c0_i32_185 = arith.constant 0 : i32
    %cst_186 = arith.constant dense<0.000000e+00> : vector<4x256xf32>
    %363 = tpu.matmul %362, %353, %cst_186 {dimension_numbers = #tpu.dot_dimension_numbers<[1], [0], [0], [1], [0, 0, 1, 1], [], []>} : vector<4x128xf32>, vector<128x256xf32>, vector<4x256xf32> -> vector<4x256xf32>
    %364 = vector.extract_strided_slice %363 {offsets = [0, 0], sizes = [4, 128], strides = [1, 1]} : vector<4x256xf32> to vector<4x128xf32>
    %365 = vector.extract_strided_slice %363 {offsets = [0, 128], sizes = [4, 128], strides = [1, 1]} : vector<4x256xf32> to vector<4x128xf32>
    %366 = arith.select %14, %364, %365 : vector<4x128xi1>, vector<4x128xf32>
    %c2_i32_187 = arith.constant 2 : i32
    %367 = arith.muli %c0_i32_185, %c2_i32_187 : i32
    %368 = arith.index_cast %367 : i32 to index
    %c0_188 = arith.constant 0 : index
    %369 = vector.load %arg19[%368, %c0_188] : memref<16x128xf32, #tpu.memory_space<vmem>>, vector<2x128xf32>
    %c7_i32_189 = arith.constant 7 : i32
    %370 = arith.subi %c7_i32_189, %c0_i32_185 : i32
    %c2_i32_190 = arith.constant 2 : i32
    %371 = arith.muli %370, %c2_i32_190 : i32
    %372 = arith.index_cast %371 : i32 to index
    %c0_191 = arith.constant 0 : index
    %373 = vector.load %arg20[%372, %c0_191] : memref<16x128xf32, #tpu.memory_space<vmem>>, vector<2x128xf32>
    %374 = tpu.concatenate %369, %373 in 0 : vector<2x128xf32>, vector<2x128xf32> -> vector<4x128xf32>
    %375 = arith.addf %374, %366 : vector<4x128xf32>
    %376 = math.tanh %375 : vector<4x128xf32>
    %cst_192 = arith.constant 5.000000e-01 : f32
    %377 = vector.broadcast %cst_192 : f32 to vector<4x128xf32>
    %378 = arith.mulf %377, %375 : vector<4x128xf32>
    %379 = math.tanh %378 : vector<4x128xf32>
    %cst_193 = arith.constant 5.000000e-01 : f32
    %380 = vector.broadcast %cst_193 : f32 to vector<4x128xf32>
    %381 = arith.mulf %380, %379 : vector<4x128xf32>
    %cst_194 = arith.constant 5.000000e-01 : f32
    %382 = vector.broadcast %cst_194 : f32 to vector<4x128xf32>
    %383 = arith.addf %381, %382 : vector<4x128xf32>
    %384 = arith.select %11, %376, %383 : vector<4x128xi1>, vector<4x128xf32>
    %c64_i32_195 = arith.constant 64 : i32
    %385 = tpu.dynamic_rotate %384 by %c64_i32_195 dim 1 : vector<4x128xf32>, i32 -> vector<4x128xf32>
    %386 = arith.mulf %384, %385 : vector<4x128xf32>
    %387 = arith.mulf %384, %362 : vector<4x128xf32>
    %c32_i32_196 = arith.constant 32 : i32
    %388 = tpu.dynamic_rotate %386 by %c32_i32_196 dim 1 : vector<4x128xf32>, i32 -> vector<4x128xf32>
    %389 = arith.addf %388, %387 : vector<4x128xf32>
    %390 = math.tanh %389 : vector<4x128xf32>
    %c64_i32_197 = arith.constant 64 : i32
    %391 = tpu.dynamic_rotate %390 by %c64_i32_197 dim 1 : vector<4x128xf32>, i32 -> vector<4x128xf32>
    %392 = arith.mulf %384, %391 : vector<4x128xf32>
    %393 = vector.extract_strided_slice %392 {offsets = [0, 0], sizes = [2, 128], strides = [1, 1]} : vector<4x128xf32> to vector<2x128xf32>
    %c2_i32_198 = arith.constant 2 : i32
    %394 = arith.muli %c0_i32_185, %c2_i32_198 : i32
    %395 = arith.index_cast %394 : i32 to index
    %c0_199 = arith.constant 0 : index
    %396 = vector.load %arg21[%395, %c0_199] : memref<16x128xf32, #tpu.memory_space<vmem>>, vector<2x128xf32>
    tpu.vector_store %arg21[%395, %c0_199], %393 {strides = array<i32>} : memref<16x128xf32, #tpu.memory_space<vmem>>, vector<2x128xf32>,
    %397 = vector.extract_strided_slice %392 {offsets = [2, 0], sizes = [2, 128], strides = [1, 1]} : vector<4x128xf32> to vector<2x128xf32>
    %c7_i32_200 = arith.constant 7 : i32
    %398 = arith.subi %c7_i32_200, %c0_i32_185 : i32
    %c2_i32_201 = arith.constant 2 : i32
    %399 = arith.muli %398, %c2_i32_201 : i32
    %400 = arith.index_cast %399 : i32 to index
    %c0_202 = arith.constant 0 : index
    %401 = vector.load %arg22[%400, %c0_202] : memref<16x128xf32, #tpu.memory_space<vmem>>, vector<2x128xf32>
    tpu.vector_store %arg22[%400, %c0_202], %397 {strides = array<i32>} : memref<16x128xf32, #tpu.memory_space<vmem>>, vector<2x128xf32>,
    %c1_i32_203 = arith.constant 1 : i32
    %cst_204 = arith.constant dense<0.000000e+00> : vector<4x256xf32>
    %402 = tpu.matmul %392, %353, %cst_204 {dimension_numbers = #tpu.dot_dimension_numbers<[1], [0], [0], [1], [0, 0, 1, 1], [], []>} : vector<4x128xf32>, vector<128x256xf32>, vector<4x256xf32> -> vector<4x256xf32>
    %403 = vector.extract_strided_slice %402 {offsets = [0, 0], sizes = [4, 128], strides = [1, 1]} : vector<4x256xf32> to vector<4x128xf32>
    %404 = vector.extract_strided_slice %402 {offsets = [0, 128], sizes = [4, 128], strides = [1, 1]} : vector<4x256xf32> to vector<4x128xf32>
    %405 = arith.select %14, %403, %404 : vector<4x128xi1>, vector<4x128xf32>
    %c2_i32_205 = arith.constant 2 : i32
    %406 = arith.muli %c1_i32_203, %c2_i32_205 : i32
    %407 = arith.index_cast %406 : i32 to index
    %c0_206 = arith.constant 0 : index
    %408 = vector.load %arg19[%407, %c0_206] : memref<16x128xf32, #tpu.memory_space<vmem>>, vector<2x128xf32>
    %c7_i32_207 = arith.constant 7 : i32
    %409 = arith.subi %c7_i32_207, %c1_i32_203 : i32
    %c2_i32_208 = arith.constant 2 : i32
    %410 = arith.muli %409, %c2_i32_208 : i32
    %411 = arith.index_cast %410 : i32 to index
    %c0_209 = arith.constant 0 : index
    %412 = vector.load %arg20[%411, %c0_209] : memref<16x128xf32, #tpu.memory_space<vmem>>, vector<2x128xf32>
    %413 = tpu.concatenate %408, %412 in 0 : vector<2x128xf32>, vector<2x128xf32> -> vector<4x128xf32>
    %414 = arith.addf %413, %405 : vector<4x128xf32>
    %415 = math.tanh %414 : vector<4x128xf32>
    %cst_210 = arith.constant 5.000000e-01 : f32
    %416 = vector.broadcast %cst_210 : f32 to vector<4x128xf32>
    %417 = arith.mulf %416, %414 : vector<4x128xf32>
    %418 = math.tanh %417 : vector<4x128xf32>
    %cst_211 = arith.constant 5.000000e-01 : f32
    %419 = vector.broadcast %cst_211 : f32 to vector<4x128xf32>
    %420 = arith.mulf %419, %418 : vector<4x128xf32>
    %cst_212 = arith.constant 5.000000e-01 : f32
    %421 = vector.broadcast %cst_212 : f32 to vector<4x128xf32>
    %422 = arith.addf %420, %421 : vector<4x128xf32>
    %423 = arith.select %11, %415, %422 : vector<4x128xi1>, vector<4x128xf32>
    %c64_i32_213 = arith.constant 64 : i32
    %424 = tpu.dynamic_rotate %423 by %c64_i32_213 dim 1 : vector<4x128xf32>, i32 -> vector<4x128xf32>
    %425 = arith.mulf %423, %424 : vector<4x128xf32>
    %426 = arith.mulf %423, %389 : vector<4x128xf32>
    %c32_i32_214 = arith.constant 32 : i32
    %427 = tpu.dynamic_rotate %425 by %c32_i32_214 dim 1 : vector<4x128xf32>, i32 -> vector<4x128xf32>
    %428 = arith.addf %427, %426 : vector<4x128xf32>
    %429 = math.tanh %428 : vector<4x128xf32>
    %c64_i32_215 = arith.constant 64 : i32
    %430 = tpu.dynamic_rotate %429 by %c64_i32_215 dim 1 : vector<4x128xf32>, i32 -> vector<4x128xf32>
    %431 = arith.mulf %423, %430 : vector<4x128xf32>
    %432 = vector.extract_strided_slice %431 {offsets = [0, 0], sizes = [2, 128], strides = [1, 1]} : vector<4x128xf32> to vector<2x128xf32>
    %c2_i32_216 = arith.constant 2 : i32
    %433 = arith.muli %c1_i32_203, %c2_i32_216 : i32
    %434 = arith.index_cast %433 : i32 to index
    %c0_217 = arith.constant 0 : index
    %435 = vector.load %arg21[%434, %c0_217] : memref<16x128xf32, #tpu.memory_space<vmem>>, vector<2x128xf32>
    tpu.vector_store %arg21[%434, %c0_217], %432 {strides = array<i32>} : memref<16x128xf32, #tpu.memory_space<vmem>>, vector<2x128xf32>,
    %436 = vector.extract_strided_slice %431 {offsets = [2, 0], sizes = [2, 128], strides = [1, 1]} : vector<4x128xf32> to vector<2x128xf32>
    %c7_i32_218 = arith.constant 7 : i32
    %437 = arith.subi %c7_i32_218, %c1_i32_203 : i32
    %c2_i32_219 = arith.constant 2 : i32
    %438 = arith.muli %437, %c2_i32_219 : i32
    %439 = arith.index_cast %438 : i32 to index
    %c0_220 = arith.constant 0 : index
    %440 = vector.load %arg22[%439, %c0_220] : memref<16x128xf32, #tpu.memory_space<vmem>>, vector<2x128xf32>
    tpu.vector_store %arg22[%439, %c0_220], %436 {strides = array<i32>} : memref<16x128xf32, #tpu.memory_space<vmem>>, vector<2x128xf32>,
    %c2_i32_221 = arith.constant 2 : i32
    %cst_222 = arith.constant dense<0.000000e+00> : vector<4x256xf32>
    %441 = tpu.matmul %431, %353, %cst_222 {dimension_numbers = #tpu.dot_dimension_numbers<[1], [0], [0], [1], [0, 0, 1, 1], [], []>} : vector<4x128xf32>, vector<128x256xf32>, vector<4x256xf32> -> vector<4x256xf32>
    %442 = vector.extract_strided_slice %441 {offsets = [0, 0], sizes = [4, 128], strides = [1, 1]} : vector<4x256xf32> to vector<4x128xf32>
    %443 = vector.extract_strided_slice %441 {offsets = [0, 128], sizes = [4, 128], strides = [1, 1]} : vector<4x256xf32> to vector<4x128xf32>
    %444 = arith.select %14, %442, %443 : vector<4x128xi1>, vector<4x128xf32>
    %c2_i32_223 = arith.constant 2 : i32
    %445 = arith.muli %c2_i32_221, %c2_i32_223 : i32
    %446 = arith.index_cast %445 : i32 to index
    %c0_224 = arith.constant 0 : index
    %447 = vector.load %arg19[%446, %c0_224] : memref<16x128xf32, #tpu.memory_space<vmem>>, vector<2x128xf32>
    %c7_i32_225 = arith.constant 7 : i32
    %448 = arith.subi %c7_i32_225, %c2_i32_221 : i32
    %c2_i32_226 = arith.constant 2 : i32
    %449 = arith.muli %448, %c2_i32_226 : i32
    %450 = arith.index_cast %449 : i32 to index
    %c0_227 = arith.constant 0 : index
    %451 = vector.load %arg20[%450, %c0_227] : memref<16x128xf32, #tpu.memory_space<vmem>>, vector<2x128xf32>
    %452 = tpu.concatenate %447, %451 in 0 : vector<2x128xf32>, vector<2x128xf32> -> vector<4x128xf32>
    %453 = arith.addf %452, %444 : vector<4x128xf32>
    %454 = math.tanh %453 : vector<4x128xf32>
    %cst_228 = arith.constant 5.000000e-01 : f32
    %455 = vector.broadcast %cst_228 : f32 to vector<4x128xf32>
    %456 = arith.mulf %455, %453 : vector<4x128xf32>
    %457 = math.tanh %456 : vector<4x128xf32>
    %cst_229 = arith.constant 5.000000e-01 : f32
    %458 = vector.broadcast %cst_229 : f32 to vector<4x128xf32>
    %459 = arith.mulf %458, %457 : vector<4x128xf32>
    %cst_230 = arith.constant 5.000000e-01 : f32
    %460 = vector.broadcast %cst_230 : f32 to vector<4x128xf32>
    %461 = arith.addf %459, %460 : vector<4x128xf32>
    %462 = arith.select %11, %454, %461 : vector<4x128xi1>, vector<4x128xf32>
    %c64_i32_231 = arith.constant 64 : i32
    %463 = tpu.dynamic_rotate %462 by %c64_i32_231 dim 1 : vector<4x128xf32>, i32 -> vector<4x128xf32>
    %464 = arith.mulf %462, %463 : vector<4x128xf32>
    %465 = arith.mulf %462, %428 : vector<4x128xf32>
    %c32_i32_232 = arith.constant 32 : i32
    %466 = tpu.dynamic_rotate %464 by %c32_i32_232 dim 1 : vector<4x128xf32>, i32 -> vector<4x128xf32>
    %467 = arith.addf %466, %465 : vector<4x128xf32>
    %468 = math.tanh %467 : vector<4x128xf32>
    %c64_i32_233 = arith.constant 64 : i32
    %469 = tpu.dynamic_rotate %468 by %c64_i32_233 dim 1 : vector<4x128xf32>, i32 -> vector<4x128xf32>
    %470 = arith.mulf %462, %469 : vector<4x128xf32>
    %471 = vector.extract_strided_slice %470 {offsets = [0, 0], sizes = [2, 128], strides = [1, 1]} : vector<4x128xf32> to vector<2x128xf32>
    %c2_i32_234 = arith.constant 2 : i32
    %472 = arith.muli %c2_i32_221, %c2_i32_234 : i32
    %473 = arith.index_cast %472 : i32 to index
    %c0_235 = arith.constant 0 : index
    %474 = vector.load %arg21[%473, %c0_235] : memref<16x128xf32, #tpu.memory_space<vmem>>, vector<2x128xf32>
    tpu.vector_store %arg21[%473, %c0_235], %471 {strides = array<i32>} : memref<16x128xf32, #tpu.memory_space<vmem>>, vector<2x128xf32>,
    %475 = vector.extract_strided_slice %470 {offsets = [2, 0], sizes = [2, 128], strides = [1, 1]} : vector<4x128xf32> to vector<2x128xf32>
    %c7_i32_236 = arith.constant 7 : i32
    %476 = arith.subi %c7_i32_236, %c2_i32_221 : i32
    %c2_i32_237 = arith.constant 2 : i32
    %477 = arith.muli %476, %c2_i32_237 : i32
    %478 = arith.index_cast %477 : i32 to index
    %c0_238 = arith.constant 0 : index
    %479 = vector.load %arg22[%478, %c0_238] : memref<16x128xf32, #tpu.memory_space<vmem>>, vector<2x128xf32>
    tpu.vector_store %arg22[%478, %c0_238], %475 {strides = array<i32>} : memref<16x128xf32, #tpu.memory_space<vmem>>, vector<2x128xf32>,
    %c3_i32_239 = arith.constant 3 : i32
    %cst_240 = arith.constant dense<0.000000e+00> : vector<4x256xf32>
    %480 = tpu.matmul %470, %353, %cst_240 {dimension_numbers = #tpu.dot_dimension_numbers<[1], [0], [0], [1], [0, 0, 1, 1], [], []>} : vector<4x128xf32>, vector<128x256xf32>, vector<4x256xf32> -> vector<4x256xf32>
    %481 = vector.extract_strided_slice %480 {offsets = [0, 0], sizes = [4, 128], strides = [1, 1]} : vector<4x256xf32> to vector<4x128xf32>
    %482 = vector.extract_strided_slice %480 {offsets = [0, 128], sizes = [4, 128], strides = [1, 1]} : vector<4x256xf32> to vector<4x128xf32>
    %483 = arith.select %14, %481, %482 : vector<4x128xi1>, vector<4x128xf32>
    %c2_i32_241 = arith.constant 2 : i32
    %484 = arith.muli %c3_i32_239, %c2_i32_241 : i32
    %485 = arith.index_cast %484 : i32 to index
    %c0_242 = arith.constant 0 : index
    %486 = vector.load %arg19[%485, %c0_242] : memref<16x128xf32, #tpu.memory_space<vmem>>, vector<2x128xf32>
    %c7_i32_243 = arith.constant 7 : i32
    %487 = arith.subi %c7_i32_243, %c3_i32_239 : i32
    %c2_i32_244 = arith.constant 2 : i32
    %488 = arith.muli %487, %c2_i32_244 : i32
    %489 = arith.index_cast %488 : i32 to index
    %c0_245 = arith.constant 0 : index
    %490 = vector.load %arg20[%489, %c0_245] : memref<16x128xf32, #tpu.memory_space<vmem>>, vector<2x128xf32>
    %491 = tpu.concatenate %486, %490 in 0 : vector<2x128xf32>, vector<2x128xf32> -> vector<4x128xf32>
    %492 = arith.addf %491, %483 : vector<4x128xf32>
    %493 = math.tanh %492 : vector<4x128xf32>
    %cst_246 = arith.constant 5.000000e-01 : f32
    %494 = vector.broadcast %cst_246 : f32 to vector<4x128xf32>
    %495 = arith.mulf %494, %492 : vector<4x128xf32>
    %496 = math.tanh %495 : vector<4x128xf32>
    %cst_247 = arith.constant 5.000000e-01 : f32
    %497 = vector.broadcast %cst_247 : f32 to vector<4x128xf32>
    %498 = arith.mulf %497, %496 : vector<4x128xf32>
    %cst_248 = arith.constant 5.000000e-01 : f32
    %499 = vector.broadcast %cst_248 : f32 to vector<4x128xf32>
    %500 = arith.addf %498, %499 : vector<4x128xf32>
    %501 = arith.select %11, %493, %500 : vector<4x128xi1>, vector<4x128xf32>
    %c64_i32_249 = arith.constant 64 : i32
    %502 = tpu.dynamic_rotate %501 by %c64_i32_249 dim 1 : vector<4x128xf32>, i32 -> vector<4x128xf32>
    %503 = arith.mulf %501, %502 : vector<4x128xf32>
    %504 = arith.mulf %501, %467 : vector<4x128xf32>
    %c32_i32_250 = arith.constant 32 : i32
    %505 = tpu.dynamic_rotate %503 by %c32_i32_250 dim 1 : vector<4x128xf32>, i32 -> vector<4x128xf32>
    %506 = arith.addf %505, %504 : vector<4x128xf32>
    %507 = math.tanh %506 : vector<4x128xf32>
    %c64_i32_251 = arith.constant 64 : i32
    %508 = tpu.dynamic_rotate %507 by %c64_i32_251 dim 1 : vector<4x128xf32>, i32 -> vector<4x128xf32>
    %509 = arith.mulf %501, %508 : vector<4x128xf32>
    %510 = vector.extract_strided_slice %509 {offsets = [0, 0], sizes = [2, 128], strides = [1, 1]} : vector<4x128xf32> to vector<2x128xf32>
    %c2_i32_252 = arith.constant 2 : i32
    %511 = arith.muli %c3_i32_239, %c2_i32_252 : i32
    %512 = arith.index_cast %511 : i32 to index
    %c0_253 = arith.constant 0 : index
    %513 = vector.load %arg21[%512, %c0_253] : memref<16x128xf32, #tpu.memory_space<vmem>>, vector<2x128xf32>
    tpu.vector_store %arg21[%512, %c0_253], %510 {strides = array<i32>} : memref<16x128xf32, #tpu.memory_space<vmem>>, vector<2x128xf32>,
    %514 = vector.extract_strided_slice %509 {offsets = [2, 0], sizes = [2, 128], strides = [1, 1]} : vector<4x128xf32> to vector<2x128xf32>
    %c7_i32_254 = arith.constant 7 : i32
    %515 = arith.subi %c7_i32_254, %c3_i32_239 : i32
    %c2_i32_255 = arith.constant 2 : i32
    %516 = arith.muli %515, %c2_i32_255 : i32
    %517 = arith.index_cast %516 : i32 to index
    %c0_256 = arith.constant 0 : index
    %518 = vector.load %arg22[%517, %c0_256] : memref<16x128xf32, #tpu.memory_space<vmem>>, vector<2x128xf32>
    tpu.vector_store %arg22[%517, %c0_256], %514 {strides = array<i32>} : memref<16x128xf32, #tpu.memory_space<vmem>>, vector<2x128xf32>,
    %c4_i32_257 = arith.constant 4 : i32
    %cst_258 = arith.constant dense<0.000000e+00> : vector<4x256xf32>
    %519 = tpu.matmul %509, %353, %cst_258 {dimension_numbers = #tpu.dot_dimension_numbers<[1], [0], [0], [1], [0, 0, 1, 1], [], []>} : vector<4x128xf32>, vector<128x256xf32>, vector<4x256xf32> -> vector<4x256xf32>
    %520 = vector.extract_strided_slice %519 {offsets = [0, 0], sizes = [4, 128], strides = [1, 1]} : vector<4x256xf32> to vector<4x128xf32>
    %521 = vector.extract_strided_slice %519 {offsets = [0, 128], sizes = [4, 128], strides = [1, 1]} : vector<4x256xf32> to vector<4x128xf32>
    %522 = arith.select %14, %520, %521 : vector<4x128xi1>, vector<4x128xf32>
    %c2_i32_259 = arith.constant 2 : i32
    %523 = arith.muli %c4_i32_257, %c2_i32_259 : i32
    %524 = arith.index_cast %523 : i32 to index
    %c0_260 = arith.constant 0 : index
    %525 = vector.load %arg19[%524, %c0_260] : memref<16x128xf32, #tpu.memory_space<vmem>>, vector<2x128xf32>
    %c7_i32_261 = arith.constant 7 : i32
    %526 = arith.subi %c7_i32_261, %c4_i32_257 : i32
    %c2_i32_262 = arith.constant 2 : i32
    %527 = arith.muli %526, %c2_i32_262 : i32
    %528 = arith.index_cast %527 : i32 to index
    %c0_263 = arith.constant 0 : index
    %529 = vector.load %arg20[%528, %c0_263] : memref<16x128xf32, #tpu.memory_space<vmem>>, vector<2x128xf32>
    %530 = tpu.concatenate %525, %529 in 0 : vector<2x128xf32>, vector<2x128xf32> -> vector<4x128xf32>
    %531 = arith.addf %530, %522 : vector<4x128xf32>
    %532 = math.tanh %531 : vector<4x128xf32>
    %cst_264 = arith.constant 5.000000e-01 : f32
    %533 = vector.broadcast %cst_264 : f32 to vector<4x128xf32>
    %534 = arith.mulf %533, %531 : vector<4x128xf32>
    %535 = math.tanh %534 : vector<4x128xf32>
    %cst_265 = arith.constant 5.000000e-01 : f32
    %536 = vector.broadcast %cst_265 : f32 to vector<4x128xf32>
    %537 = arith.mulf %536, %535 : vector<4x128xf32>
    %cst_266 = arith.constant 5.000000e-01 : f32
    %538 = vector.broadcast %cst_266 : f32 to vector<4x128xf32>
    %539 = arith.addf %537, %538 : vector<4x128xf32>
    %540 = arith.select %11, %532, %539 : vector<4x128xi1>, vector<4x128xf32>
    %c64_i32_267 = arith.constant 64 : i32
    %541 = tpu.dynamic_rotate %540 by %c64_i32_267 dim 1 : vector<4x128xf32>, i32 -> vector<4x128xf32>
    %542 = arith.mulf %540, %541 : vector<4x128xf32>
    %543 = arith.mulf %540, %506 : vector<4x128xf32>
    %c32_i32_268 = arith.constant 32 : i32
    %544 = tpu.dynamic_rotate %542 by %c32_i32_268 dim 1 : vector<4x128xf32>, i32 -> vector<4x128xf32>
    %545 = arith.addf %544, %543 : vector<4x128xf32>
    %546 = math.tanh %545 : vector<4x128xf32>
    %c64_i32_269 = arith.constant 64 : i32
    %547 = tpu.dynamic_rotate %546 by %c64_i32_269 dim 1 : vector<4x128xf32>, i32 -> vector<4x128xf32>
    %548 = arith.mulf %540, %547 : vector<4x128xf32>
    %549 = vector.extract_strided_slice %548 {offsets = [0, 0], sizes = [2, 128], strides = [1, 1]} : vector<4x128xf32> to vector<2x128xf32>
    %c2_i32_270 = arith.constant 2 : i32
    %550 = arith.muli %c4_i32_257, %c2_i32_270 : i32
    %551 = arith.index_cast %550 : i32 to index
    %c0_271 = arith.constant 0 : index
    %552 = vector.load %arg21[%551, %c0_271] : memref<16x128xf32, #tpu.memory_space<vmem>>, vector<2x128xf32>
    tpu.vector_store %arg21[%551, %c0_271], %549 {strides = array<i32>} : memref<16x128xf32, #tpu.memory_space<vmem>>, vector<2x128xf32>,
    %553 = vector.extract_strided_slice %548 {offsets = [2, 0], sizes = [2, 128], strides = [1, 1]} : vector<4x128xf32> to vector<2x128xf32>
    %c7_i32_272 = arith.constant 7 : i32
    %554 = arith.subi %c7_i32_272, %c4_i32_257 : i32
    %c2_i32_273 = arith.constant 2 : i32
    %555 = arith.muli %554, %c2_i32_273 : i32
    %556 = arith.index_cast %555 : i32 to index
    %c0_274 = arith.constant 0 : index
    %557 = vector.load %arg22[%556, %c0_274] : memref<16x128xf32, #tpu.memory_space<vmem>>, vector<2x128xf32>
    tpu.vector_store %arg22[%556, %c0_274], %553 {strides = array<i32>} : memref<16x128xf32, #tpu.memory_space<vmem>>, vector<2x128xf32>,
    %c5_i32_275 = arith.constant 5 : i32
    %cst_276 = arith.constant dense<0.000000e+00> : vector<4x256xf32>
    %558 = tpu.matmul %548, %353, %cst_276 {dimension_numbers = #tpu.dot_dimension_numbers<[1], [0], [0], [1], [0, 0, 1, 1], [], []>} : vector<4x128xf32>, vector<128x256xf32>, vector<4x256xf32> -> vector<4x256xf32>
    %559 = vector.extract_strided_slice %558 {offsets = [0, 0], sizes = [4, 128], strides = [1, 1]} : vector<4x256xf32> to vector<4x128xf32>
    %560 = vector.extract_strided_slice %558 {offsets = [0, 128], sizes = [4, 128], strides = [1, 1]} : vector<4x256xf32> to vector<4x128xf32>
    %561 = arith.select %14, %559, %560 : vector<4x128xi1>, vector<4x128xf32>
    %c2_i32_277 = arith.constant 2 : i32
    %562 = arith.muli %c5_i32_275, %c2_i32_277 : i32
    %563 = arith.index_cast %562 : i32 to index
    %c0_278 = arith.constant 0 : index
    %564 = vector.load %arg19[%563, %c0_278] : memref<16x128xf32, #tpu.memory_space<vmem>>, vector<2x128xf32>
    %c7_i32_279 = arith.constant 7 : i32
    %565 = arith.subi %c7_i32_279, %c5_i32_275 : i32
    %c2_i32_280 = arith.constant 2 : i32
    %566 = arith.muli %565, %c2_i32_280 : i32
    %567 = arith.index_cast %566 : i32 to index
    %c0_281 = arith.constant 0 : index
    %568 = vector.load %arg20[%567, %c0_281] : memref<16x128xf32, #tpu.memory_space<vmem>>, vector<2x128xf32>
    %569 = tpu.concatenate %564, %568 in 0 : vector<2x128xf32>, vector<2x128xf32> -> vector<4x128xf32>
    %570 = arith.addf %569, %561 : vector<4x128xf32>
    %571 = math.tanh %570 : vector<4x128xf32>
    %cst_282 = arith.constant 5.000000e-01 : f32
    %572 = vector.broadcast %cst_282 : f32 to vector<4x128xf32>
    %573 = arith.mulf %572, %570 : vector<4x128xf32>
    %574 = math.tanh %573 : vector<4x128xf32>
    %cst_283 = arith.constant 5.000000e-01 : f32
    %575 = vector.broadcast %cst_283 : f32 to vector<4x128xf32>
    %576 = arith.mulf %575, %574 : vector<4x128xf32>
    %cst_284 = arith.constant 5.000000e-01 : f32
    %577 = vector.broadcast %cst_284 : f32 to vector<4x128xf32>
    %578 = arith.addf %576, %577 : vector<4x128xf32>
    %579 = arith.select %11, %571, %578 : vector<4x128xi1>, vector<4x128xf32>
    %c64_i32_285 = arith.constant 64 : i32
    %580 = tpu.dynamic_rotate %579 by %c64_i32_285 dim 1 : vector<4x128xf32>, i32 -> vector<4x128xf32>
    %581 = arith.mulf %579, %580 : vector<4x128xf32>
    %582 = arith.mulf %579, %545 : vector<4x128xf32>
    %c32_i32_286 = arith.constant 32 : i32
    %583 = tpu.dynamic_rotate %581 by %c32_i32_286 dim 1 : vector<4x128xf32>, i32 -> vector<4x128xf32>
    %584 = arith.addf %583, %582 : vector<4x128xf32>
    %585 = math.tanh %584 : vector<4x128xf32>
    %c64_i32_287 = arith.constant 64 : i32
    %586 = tpu.dynamic_rotate %585 by %c64_i32_287 dim 1 : vector<4x128xf32>, i32 -> vector<4x128xf32>
    %587 = arith.mulf %579, %586 : vector<4x128xf32>
    %588 = vector.extract_strided_slice %587 {offsets = [0, 0], sizes = [2, 128], strides = [1, 1]} : vector<4x128xf32> to vector<2x128xf32>
    %c2_i32_288 = arith.constant 2 : i32
    %589 = arith.muli %c5_i32_275, %c2_i32_288 : i32
    %590 = arith.index_cast %589 : i32 to index
    %c0_289 = arith.constant 0 : index
    %591 = vector.load %arg21[%590, %c0_289] : memref<16x128xf32, #tpu.memory_space<vmem>>, vector<2x128xf32>
    tpu.vector_store %arg21[%590, %c0_289], %588 {strides = array<i32>} : memref<16x128xf32, #tpu.memory_space<vmem>>, vector<2x128xf32>,
    %592 = vector.extract_strided_slice %587 {offsets = [2, 0], sizes = [2, 128], strides = [1, 1]} : vector<4x128xf32> to vector<2x128xf32>
    %c7_i32_290 = arith.constant 7 : i32
    %593 = arith.subi %c7_i32_290, %c5_i32_275 : i32
    %c2_i32_291 = arith.constant 2 : i32
    %594 = arith.muli %593, %c2_i32_291 : i32
    %595 = arith.index_cast %594 : i32 to index
    %c0_292 = arith.constant 0 : index
    %596 = vector.load %arg22[%595, %c0_292] : memref<16x128xf32, #tpu.memory_space<vmem>>, vector<2x128xf32>
    tpu.vector_store %arg22[%595, %c0_292], %592 {strides = array<i32>} : memref<16x128xf32, #tpu.memory_space<vmem>>, vector<2x128xf32>,
    %c6_i32_293 = arith.constant 6 : i32
    %cst_294 = arith.constant dense<0.000000e+00> : vector<4x256xf32>
    %597 = tpu.matmul %587, %353, %cst_294 {dimension_numbers = #tpu.dot_dimension_numbers<[1], [0], [0], [1], [0, 0, 1, 1], [], []>} : vector<4x128xf32>, vector<128x256xf32>, vector<4x256xf32> -> vector<4x256xf32>
    %598 = vector.extract_strided_slice %597 {offsets = [0, 0], sizes = [4, 128], strides = [1, 1]} : vector<4x256xf32> to vector<4x128xf32>
    %599 = vector.extract_strided_slice %597 {offsets = [0, 128], sizes = [4, 128], strides = [1, 1]} : vector<4x256xf32> to vector<4x128xf32>
    %600 = arith.select %14, %598, %599 : vector<4x128xi1>, vector<4x128xf32>
    %c2_i32_295 = arith.constant 2 : i32
    %601 = arith.muli %c6_i32_293, %c2_i32_295 : i32
    %602 = arith.index_cast %601 : i32 to index
    %c0_296 = arith.constant 0 : index
    %603 = vector.load %arg19[%602, %c0_296] : memref<16x128xf32, #tpu.memory_space<vmem>>, vector<2x128xf32>
    %c7_i32_297 = arith.constant 7 : i32
    %604 = arith.subi %c7_i32_297, %c6_i32_293 : i32
    %c2_i32_298 = arith.constant 2 : i32
    %605 = arith.muli %604, %c2_i32_298 : i32
    %606 = arith.index_cast %605 : i32 to index
    %c0_299 = arith.constant 0 : index
    %607 = vector.load %arg20[%606, %c0_299] : memref<16x128xf32, #tpu.memory_space<vmem>>, vector<2x128xf32>
    %608 = tpu.concatenate %603, %607 in 0 : vector<2x128xf32>, vector<2x128xf32> -> vector<4x128xf32>
    %609 = arith.addf %608, %600 : vector<4x128xf32>
    %610 = math.tanh %609 : vector<4x128xf32>
    %cst_300 = arith.constant 5.000000e-01 : f32
    %611 = vector.broadcast %cst_300 : f32 to vector<4x128xf32>
    %612 = arith.mulf %611, %609 : vector<4x128xf32>
    %613 = math.tanh %612 : vector<4x128xf32>
    %cst_301 = arith.constant 5.000000e-01 : f32
    %614 = vector.broadcast %cst_301 : f32 to vector<4x128xf32>
    %615 = arith.mulf %614, %613 : vector<4x128xf32>
    %cst_302 = arith.constant 5.000000e-01 : f32
    %616 = vector.broadcast %cst_302 : f32 to vector<4x128xf32>
    %617 = arith.addf %615, %616 : vector<4x128xf32>
    %618 = arith.select %11, %610, %617 : vector<4x128xi1>, vector<4x128xf32>
    %c64_i32_303 = arith.constant 64 : i32
    %619 = tpu.dynamic_rotate %618 by %c64_i32_303 dim 1 : vector<4x128xf32>, i32 -> vector<4x128xf32>
    %620 = arith.mulf %618, %619 : vector<4x128xf32>
    %621 = arith.mulf %618, %584 : vector<4x128xf32>
    %c32_i32_304 = arith.constant 32 : i32
    %622 = tpu.dynamic_rotate %620 by %c32_i32_304 dim 1 : vector<4x128xf32>, i32 -> vector<4x128xf32>
    %623 = arith.addf %622, %621 : vector<4x128xf32>
    %624 = math.tanh %623 : vector<4x128xf32>
    %c64_i32_305 = arith.constant 64 : i32
    %625 = tpu.dynamic_rotate %624 by %c64_i32_305 dim 1 : vector<4x128xf32>, i32 -> vector<4x128xf32>
    %626 = arith.mulf %618, %625 : vector<4x128xf32>
    %627 = vector.extract_strided_slice %626 {offsets = [0, 0], sizes = [2, 128], strides = [1, 1]} : vector<4x128xf32> to vector<2x128xf32>
    %c2_i32_306 = arith.constant 2 : i32
    %628 = arith.muli %c6_i32_293, %c2_i32_306 : i32
    %629 = arith.index_cast %628 : i32 to index
    %c0_307 = arith.constant 0 : index
    %630 = vector.load %arg21[%629, %c0_307] : memref<16x128xf32, #tpu.memory_space<vmem>>, vector<2x128xf32>
    tpu.vector_store %arg21[%629, %c0_307], %627 {strides = array<i32>} : memref<16x128xf32, #tpu.memory_space<vmem>>, vector<2x128xf32>,
    %631 = vector.extract_strided_slice %626 {offsets = [2, 0], sizes = [2, 128], strides = [1, 1]} : vector<4x128xf32> to vector<2x128xf32>
    %c7_i32_308 = arith.constant 7 : i32
    %632 = arith.subi %c7_i32_308, %c6_i32_293 : i32
    %c2_i32_309 = arith.constant 2 : i32
    %633 = arith.muli %632, %c2_i32_309 : i32
    %634 = arith.index_cast %633 : i32 to index
    %c0_310 = arith.constant 0 : index
    %635 = vector.load %arg22[%634, %c0_310] : memref<16x128xf32, #tpu.memory_space<vmem>>, vector<2x128xf32>
    tpu.vector_store %arg22[%634, %c0_310], %631 {strides = array<i32>} : memref<16x128xf32, #tpu.memory_space<vmem>>, vector<2x128xf32>,
    %c7_i32_311 = arith.constant 7 : i32
    %cst_312 = arith.constant dense<0.000000e+00> : vector<4x256xf32>
    %636 = tpu.matmul %626, %353, %cst_312 {dimension_numbers = #tpu.dot_dimension_numbers<[1], [0], [0], [1], [0, 0, 1, 1], [], []>} : vector<4x128xf32>, vector<128x256xf32>, vector<4x256xf32> -> vector<4x256xf32>
    %637 = vector.extract_strided_slice %636 {offsets = [0, 0], sizes = [4, 128], strides = [1, 1]} : vector<4x256xf32> to vector<4x128xf32>
    %638 = vector.extract_strided_slice %636 {offsets = [0, 128], sizes = [4, 128], strides = [1, 1]} : vector<4x256xf32> to vector<4x128xf32>
    %639 = arith.select %14, %637, %638 : vector<4x128xi1>, vector<4x128xf32>
    %c2_i32_313 = arith.constant 2 : i32
    %640 = arith.muli %c7_i32_311, %c2_i32_313 : i32
    %641 = arith.index_cast %640 : i32 to index
    %c0_314 = arith.constant 0 : index
    %642 = vector.load %arg19[%641, %c0_314] : memref<16x128xf32, #tpu.memory_space<vmem>>, vector<2x128xf32>
    %c7_i32_315 = arith.constant 7 : i32
    %643 = arith.subi %c7_i32_315, %c7_i32_311 : i32
    %c2_i32_316 = arith.constant 2 : i32
    %644 = arith.muli %643, %c2_i32_316 : i32
    %645 = arith.index_cast %644 : i32 to index
    %c0_317 = arith.constant 0 : index
    %646 = vector.load %arg20[%645, %c0_317] : memref<16x128xf32, #tpu.memory_space<vmem>>, vector<2x128xf32>
    %647 = tpu.concatenate %642, %646 in 0 : vector<2x128xf32>, vector<2x128xf32> -> vector<4x128xf32>
    %648 = arith.addf %647, %639 : vector<4x128xf32>
    %649 = math.tanh %648 : vector<4x128xf32>
    %cst_318 = arith.constant 5.000000e-01 : f32
    %650 = vector.broadcast %cst_318 : f32 to vector<4x128xf32>
    %651 = arith.mulf %650, %648 : vector<4x128xf32>
    %652 = math.tanh %651 : vector<4x128xf32>
    %cst_319 = arith.constant 5.000000e-01 : f32
    %653 = vector.broadcast %cst_319 : f32 to vector<4x128xf32>
    %654 = arith.mulf %653, %652 : vector<4x128xf32>
    %cst_320 = arith.constant 5.000000e-01 : f32
    %655 = vector.broadcast %cst_320 : f32 to vector<4x128xf32>
    %656 = arith.addf %654, %655 : vector<4x128xf32>
    %657 = arith.select %11, %649, %656 : vector<4x128xi1>, vector<4x128xf32>
    %c64_i32_321 = arith.constant 64 : i32
    %658 = tpu.dynamic_rotate %657 by %c64_i32_321 dim 1 : vector<4x128xf32>, i32 -> vector<4x128xf32>
    %659 = arith.mulf %657, %658 : vector<4x128xf32>
    %660 = arith.mulf %657, %623 : vector<4x128xf32>
    %c32_i32_322 = arith.constant 32 : i32
    %661 = tpu.dynamic_rotate %659 by %c32_i32_322 dim 1 : vector<4x128xf32>, i32 -> vector<4x128xf32>
    %662 = arith.addf %661, %660 : vector<4x128xf32>
    %663 = math.tanh %662 : vector<4x128xf32>
    %c64_i32_323 = arith.constant 64 : i32
    %664 = tpu.dynamic_rotate %663 by %c64_i32_323 dim 1 : vector<4x128xf32>, i32 -> vector<4x128xf32>
    %665 = arith.mulf %657, %664 : vector<4x128xf32>
    %666 = vector.extract_strided_slice %665 {offsets = [0, 0], sizes = [2, 128], strides = [1, 1]} : vector<4x128xf32> to vector<2x128xf32>
    %c2_i32_324 = arith.constant 2 : i32
    %667 = arith.muli %c7_i32_311, %c2_i32_324 : i32
    %668 = arith.index_cast %667 : i32 to index
    %c0_325 = arith.constant 0 : index
    %669 = vector.load %arg21[%668, %c0_325] : memref<16x128xf32, #tpu.memory_space<vmem>>, vector<2x128xf32>
    tpu.vector_store %arg21[%668, %c0_325], %666 {strides = array<i32>} : memref<16x128xf32, #tpu.memory_space<vmem>>, vector<2x128xf32>,
    %670 = vector.extract_strided_slice %665 {offsets = [2, 0], sizes = [2, 128], strides = [1, 1]} : vector<4x128xf32> to vector<2x128xf32>
    %c7_i32_326 = arith.constant 7 : i32
    %671 = arith.subi %c7_i32_326, %c7_i32_311 : i32
    %c2_i32_327 = arith.constant 2 : i32
    %672 = arith.muli %671, %c2_i32_327 : i32
    %673 = arith.index_cast %672 : i32 to index
    %c0_328 = arith.constant 0 : index
    %674 = vector.load %arg22[%673, %c0_328] : memref<16x128xf32, #tpu.memory_space<vmem>>, vector<2x128xf32>
    tpu.vector_store %arg22[%673, %c0_328], %670 {strides = array<i32>} : memref<16x128xf32, #tpu.memory_space<vmem>>, vector<2x128xf32>,
    %c8_i32_329 = arith.constant 8 : i32
    %c0_330 = arith.constant 0 : index
    %c0_331 = arith.constant 0 : index
    %675 = vector.load %arg15[%c0_330, %c0_331] : memref<1x128xf32, #tpu.memory_space<vmem>>, vector<1x128xf32>
    %c0_332 = arith.constant 0 : index
    %c0_333 = arith.constant 0 : index
    %676 = vector.load %arg16[%c0_332, %c0_333] : memref<1x128xf32, #tpu.memory_space<vmem>>, vector<1x128xf32>
    %c0_334 = arith.constant 0 : index
    %c0_335 = arith.constant 0 : index
    %677 = vector.load %arg17[%c0_334, %c0_335] : memref<1x1xf32, #tpu.memory_space<vmem>>, vector<1x1xf32>
    %c8 = arith.constant 8 : index
    %c0_336 = arith.constant 0 : index
    %678 = vector.load %arg21[%c8, %c0_336] : memref<16x128xf32, #tpu.memory_space<vmem>>, vector<2x128xf32>
    %c8_337 = arith.constant 8 : index
    %c0_338 = arith.constant 0 : index
    %679 = vector.load %arg22[%c8_337, %c0_338] : memref<16x128xf32, #tpu.memory_space<vmem>>, vector<2x128xf32>
    %680 = vector.broadcast %675 : vector<1x128xf32> to vector<2x128xf32>
    %681 = arith.mulf %678, %680 : vector<2x128xf32>
    %cst_339 = arith.constant dense<0.000000e+00> : vector<2xf32>
    %682 = vector.multi_reduction <add>, %681, %cst_339 [1] : vector<2x128xf32> to vector<2xf32>
    %683 = vector.shape_cast %682 : vector<2xf32> to vector<2x1xf32>
    %684 = vector.broadcast %676 : vector<1x128xf32> to vector<2x128xf32>
    %685 = arith.mulf %679, %684 : vector<2x128xf32>
    %cst_340 = arith.constant dense<0.000000e+00> : vector<2xf32>
    %686 = vector.multi_reduction <add>, %685, %cst_340 [1] : vector<2x128xf32> to vector<2xf32>
    %687 = vector.shape_cast %686 : vector<2xf32> to vector<2x1xf32>
    %688 = arith.addf %683, %687 : vector<2x1xf32>
    %689 = vector.broadcast %677 : vector<1x1xf32> to vector<2x1xf32>
    %690 = arith.addf %688, %689 : vector<2x1xf32>
    %cst_341 = arith.constant 5.000000e-01 : f32
    %691 = vector.broadcast %cst_341 : f32 to vector<2x1xf32>
    %692 = arith.mulf %691, %690 : vector<2x1xf32>
    %693 = math.tanh %692 : vector<2x1xf32>
    %cst_342 = arith.constant 5.000000e-01 : f32
    %694 = vector.broadcast %cst_342 : f32 to vector<2x1xf32>
    %695 = arith.mulf %694, %693 : vector<2x1xf32>
    %cst_343 = arith.constant 5.000000e-01 : f32
    %696 = vector.broadcast %cst_343 : f32 to vector<2x1xf32>
    %697 = arith.addf %695, %696 : vector<2x1xf32>
    %c0_344 = arith.constant 0 : index
    %c0_345 = arith.constant 0 : index
    %698 = vector.load %arg18[%c0_344, %c0_345] : memref<2x1xf32, #tpu.memory_space<vmem>>, vector<2x1xf32>
    tpu.vector_store %arg18[%c0_344, %c0_345], %697 {strides = array<i32>} : memref<2x1xf32, #tpu.memory_space<vmem>>, vector<2x1xf32>,
    return
  }
}

</mosaic_0001>

<bundles_post_ra>
// kernel: model_forward.1
= control target key start
LH: loop header
LB: loop body
LE: loop exit
PB: predicated region body
PF: predicated region fallthrough
CT: control target
= control target key end

     0   :  { %vm465_vm0 = vcmask 523264   ;;  %vm709_vm2 = vcmask 1041408   ;;  %vm2660_vm6 = vcmask 1024   ;;  %s5309_s1 = inlined_call_operand.vmem [shape: f32[768,64], index: 1, kind: input, shape index: {}]   ;;  %s5310_s0 = inlined_call_operand.vmem [shape: f32[16,768], index: 0, kind: input, shape index: {}]   ;;  %s5311_s3 = inlined_call_operand.vmem [shape: f32[64,128], index: 3, kind: input, shape index: {}]   ;;  %s5312_s5 = inlined_call_operand.vmem [shape: f32[128,256], index: 5, kind: input, shape index: {}]   ;;  %s5313_s4 = inlined_call_operand.vmem [shape: f32[64,128], index: 4, kind: input, shape index: {}]   ;;  %s5314_s2 = inlined_call_operand.vmem [shape: f32[1,64], index: 2, kind: input, shape index: {}]   ;;  %s5315_s6 = inlined_call_operand.vmem [shape: f32[1,128], index: 6, kind: input, shape index: {}]   ;;  %s5316_s7 = inlined_call_operand.vmem [shape: f32[1,128], index: 7, kind: input, shape index: {}]   ;;  %s5317_s9 = inlined_call_operand.vmem [shape: f32[128,128], index: 9, kind: input, shape index: {}]   ;;  %s5318_s11 = inlined_call_operand.vmem [shape: f32[128,128], index: 11, kind: input, shape index: {}]   ;;  %s5319_s8 = inlined_call_operand.vmem [shape: f32[128,128], index: 8, kind: input, shape index: {}]   ;;  %s5320_s10 = inlined_call_operand.vmem [shape: f32[128,128], index: 10, kind: input, shape index: {}]   ;;  %s5321_s12 = inlined_call_operand.vmem [shape: f32[128,256], index: 12, kind: input, shape index: {}]   ;;  %s5322_s13 = inlined_call_operand.vmem [shape: f32[1,128], index: 13, kind: input, shape index: {}]   ;;  %s5323_s14 = inlined_call_operand.vmem [shape: f32[1,128], index: 14, kind: input, shape index: {}]   ;;  %s5324_s15 = inlined_call_operand.vmem [shape: f32[1,128], index: 15, kind: input, shape index: {}]   ;;  %s5325_s17 = inlined_call_operand.<no memory space> [shape: f32[1,1], index: 17, kind: input, shape index: {}]   ;;  %s5326_s16 = inlined_call_operand.vmem [shape: f32[1,128], index: 16, kind: input, shape index: {}]   ;;  %s5327_s18 = inlined_call_operand.vmem [shape: f32[2,1], index: 18, kind: output, shape index: {}]  }
   0x1   :  { %5331 = sst [smem:[#allocation7_spill]] %s5309_s1 }
   0x2   :  { %5332 = sst [smem:[#allocation8_spill]] %s5310_s0  ;;  %s5334_s29 = sld [smem:[#allocation7_spill]] }
   0x3   :  { %5333 = sst [smem:[#allocation9_spill]] %s5311_s3  ;;  %s5335_s23 = sld [smem:[#allocation8_spill]] }
   0x4   :  { %s5336_s30 = sld [smem:[#allocation9_spill]] }
   0x8   :  { %v89_v0 = vld [vmem:[%s5334_s29 + $0x80] sm:$0xff]  ;;  %v90_v1 = vld [vmem:[%s5334_s29 + $0x88] sm:$0xff]  ;;  %v91_v11 = vld [vmem:[%s5334_s29 + $0x90] sm:$0xff] }
   0x9   :  { %v73_v2 = vld [vmem:[%s5334_s29] sm:$0xff]  ;;  %v3062_v3 = vpack.c.bf16 %v90_v1, %v89_v0  ;;  %v74_v4 = vld [vmem:[%s5334_s29 + $0x8] sm:$0xff]  ;;  %v92_v13 = vld [vmem:[%s5334_s29 + $0x98] sm:$0xff] }
   0xa   :  { %v121_v5 = vld [vmem:[%s5334_s29 + $0x180] sm:$0xff]  ;;  %v122_v6 = vld [vmem:[%s5334_s29 + $0x188] sm:$0xff]  ;;  %v3064_v7 = vpack.c.bf16 %v74_v4, %v73_v2  ;;  %v75_v14 = vld [vmem:[%s5334_s29 + $0x10] sm:$0xff]  ;;  %v3066_v16 = vpack.c.bf16 %v92_v13, %v91_v11 }
   0xb   :  { %v3094_v8 = vpack.c.bf16 %v122_v6, %v121_v5  ;;  %v105_v9 = vld [vmem:[%s5334_s29 + $0x100] sm:$0xff]  ;;  %v106_v10 = vld [vmem:[%s5334_s29 + $0x108] sm:$0xff]  ;;  %3063 = vmatprep.subr.bf16.mxu0 %v3062_v3  ;;  %v76_v15 = vld [vmem:[%s5334_s29 + $0x18] sm:$0xff] }
   0xc   :  { %v3096_v12 = vpack.c.bf16 %v106_v10, %v105_v9  ;;  %3065 = vmatpush3.bf16.msra.mxu0 %v3064_v7  ;;  %v3068_v17 = vpack.c.bf16 %v76_v15, %v75_v14  ;;  %v123_v18 = vld [vmem:[%s5334_s29 + $0x190] sm:$0xff]  ;;  %v124_v19 = vld [vmem:[%s5334_s29 + $0x198] sm:$0xff]  ;;  %v93_v23 = vld [vmem:[%s5334_s29 + $0xa0] sm:$0xff] }
   0xd   :  { %3095 = vmatprep.subr.bf16.mxu1 %v3094_v8  ;;  %v107_v20 = vld [vmem:[%s5334_s29 + $0x110] sm:$0xff]  ;;  %v3098_v21 = vpack.c.bf16 %v124_v19, %v123_v18  ;;  %v108_v22 = vld [vmem:[%s5334_s29 + $0x118] sm:$0xff]  ;;  %v94_v24 = vld [vmem:[%s5334_s29 + $0xa8] sm:$0xff]  ;;  %3067 = vmatprep.subr.bf16.mxu0 %v3066_v16 }
   0xe   :  { %3097 = vmatpush3.bf16.msra.mxu1 %v3096_v12  ;;  %v3100_v25 = vpack.c.bf16 %v108_v22, %v107_v20  ;;  %v3070_v26 = vpack.c.bf16 %v94_v24, %v93_v23  ;;  %v77_v27 = vld [vmem:[%s5334_s29 + $0x20] sm:$0xff]  ;;  %v78_v28 = vld [vmem:[%s5334_s29 + $0x28] sm:$0xff]  ;;  %v95_v35 = vld [vmem:[%s5334_s29 + $0xb0] sm:$0xff] }
   0xf   :  { %v125_v29 = vld [vmem:[%s5334_s29 + $0x1a0] sm:$0xff]  ;;  %3099 = vmatprep.subr.bf16.mxu1 %v3098_v21  ;;  %v126_v30 = vld [vmem:[%s5334_s29 + $0x1a8] sm:$0xff]  ;;  %v3072_v33 = vpack.c.bf16 %v78_v28, %v77_v27  ;;  %v96_v36 = vld [vmem:[%s5334_s29 + $0xb8] sm:$0xff] }
  0x10   :  { %v109_v31 = vld [vmem:[%s5334_s29 + $0x120] sm:$0xff]  ;;  %v110_v32 = vld [vmem:[%s5334_s29 + $0x128] sm:$0xff]  ;;  %3069 = vmatpush3.bf16.msra.mxu0 %v3068_v17  ;;  %v3102_v34 = vpack.c.bf16 %v126_v30, %v125_v29  ;;  %v79_v37 = vld [vmem:[%s5334_s29 + $0x30] sm:$0xff]  ;;  %v3074_v39 = vpack.c.bf16 %v96_v36, %v95_v35 }
  0x11   :  { %3071 = vmatprep.subr.bf16.mxu0 %v3070_v26  ;;  %v3104_v38 = vpack.c.bf16 %v110_v32, %v109_v31  ;;  %v80_v40 = vld [vmem:[%s5334_s29 + $0x38] sm:$0xff]  ;;  %v127_v41 = vld [vmem:[%s5334_s29 + $0x1b0] sm:$0xff]  ;;  %v97_v46 = vld [vmem:[%s5334_s29 + $0xc0] sm:$0xff] }
  0x12   :  { %3101 = vmatpush3.bf16.msra.mxu1 %v3100_v25  ;;  %v128_v42 = vld [vmem:[%s5334_s29 + $0x1b8] sm:$0xff]  ;;  %v111_v44 = vld [vmem:[%s5334_s29 + $0x130] sm:$0xff]  ;;  %v98_v47 = vld [vmem:[%s5334_s29 + $0xc8] sm:$0xff]  ;;  %v3076_v48 = vpack.c.bf16 %v80_v40, %v79_v37 }
  0x13   :  { %3103 = vmatprep.subr.bf16.mxu1 %v3102_v34  ;;  %v3106_v43 = vpack.c.bf16 %v128_v42, %v127_v41  ;;  %v112_v45 = vld [vmem:[%s5334_s29 + $0x138] sm:$0xff]  ;;  %v129_v49 = vld [vmem:[%s5334_s29 + $0x1c0] sm:$0xff]  ;;  %v130_v50 = vld [vmem:[%s5334_s29 + $0x1c8] sm:$0xff]  ;;  %v3078_v52 = vpack.c.bf16 %v98_v47, %v97_v46 }
  0x14   :  { %3073 = vmatpush3.bf16.msra.mxu0 %v3072_v33  ;;  %v3108_v51 = vpack.c.bf16 %v112_v45, %v111_v44  ;;  %v81_v53 = vld [vmem:[%s5334_s29 + $0x40] sm:$0xff]  ;;  %v82_v54 = vld [vmem:[%s5334_s29 + $0x48] sm:$0xff]  ;;  %v3110_v56 = vpack.c.bf16 %v130_v50, %v129_v49  ;;  %v99_v58 = vld [vmem:[%s5334_s29 + $0xd0] sm:$0xff] }
  0x15   :  { %3075 = vmatprep.subr.bf16.mxu0 %v3074_v39  ;;  %v113_v55 = vld [vmem:[%s5334_s29 + $0x140] sm:$0xff]  ;;  %v114_v57 = vld [vmem:[%s5334_s29 + $0x148] sm:$0xff]  ;;  %v100_v59 = vld [vmem:[%s5334_s29 + $0xd8] sm:$0xff]  ;;  %v3080_v62 = vpack.c.bf16 %v82_v54, %v81_v53 }
  0x16   :  { %3105 = vmatpush3.bf16.msra.mxu1 %v3104_v38  ;;  %v131_v60 = vld [vmem:[%s5334_s29 + $0x1d0] sm:$0xff]  ;;  %v132_v61 = vld [vmem:[%s5334_s29 + $0x1d8] sm:$0xff]  ;;  %v3112_v63 = vpack.c.bf16 %v114_v57, %v113_v55  ;;  %v3082_v0 = vpack.c.bf16 %v100_v59, %v99_v58  ;;  %v101_v6 = vld [vmem:[%s5334_s29 + $0xe0] sm:$0xff] }
  0x17   :  { %3107 = vmatprep.subr.bf16.mxu1 %v3106_v43  ;;  %v83_v1 = vld [vmem:[%s5334_s29 + $0x50] sm:$0xff]  ;;  %v84_v2 = vld [vmem:[%s5334_s29 + $0x58] sm:$0xff]  ;;  %v3114_v4 = vpack.c.bf16 %v132_v61, %v131_v60  ;;  %v102_v7 = vld [vmem:[%s5334_s29 + $0xe8] sm:$0xff] }
  0x18   :  { %3077 = vmatpush3.bf16.msra.mxu0 %v3076_v48  ;;  %v115_v3 = vld [vmem:[%s5334_s29 + $0x150] sm:$0xff]  ;;  %v116_v5 = vld [vmem:[%s5334_s29 + $0x158] sm:$0xff]  ;;  %v133_v8 = vld [vmem:[%s5334_s29 + $0x1e0] sm:$0xff]  ;;  %v3084_v10 = vpack.c.bf16 %v84_v2, %v83_v1  ;;  %v3086_v14 = vpack.c.bf16 %v102_v7, %v101_v6 }
  0x19   :  { %3079 = vmatprep.subr.bf16.mxu0 %v3078_v52  ;;  %v134_v9 = vld [vmem:[%s5334_s29 + $0x1e8] sm:$0xff]  ;;  %v85_v11 = vld [vmem:[%s5334_s29 + $0x60] sm:$0xff]  ;;  %v3116_v13 = vpack.c.bf16 %v116_v5, %v115_v3  ;;  %v103_v19 = vld [vmem:[%s5334_s29 + $0xf0] sm:$0xff] }
  0x1a   :  { %3109 = vmatpush3.bf16.msra.mxu1 %v3108_v51  ;;  %v62_v12 = vld [vmem:[%s5335_s23 + $0x8] sm:$0xff]  ;;  %v117_v16 = vld [vmem:[%s5334_s29 + $0x160] sm:$0xff]  ;;  %v3118_v18 = vpack.c.bf16 %v134_v9, %v133_v8  ;;  %v104_v20 = vld [vmem:[%s5334_s29 + $0xf8] sm:$0xff] }
  0x1b   :  { %3111 = vmatprep.subr.bf16.mxu1 %v3110_v56  ;;  %v86_v15 = vld [vmem:[%s5334_s29 + $0x68] sm:$0xff]  ;;  %240 = vmatprep.mubr.f32.mxu0 %v62_v12  ;;  %v64_v21 = vld [vmem:[%s5335_s23 + $0x18] sm:$0xff]  ;;  %v135_v22 = vld [vmem:[%s5334_s29 + $0x1f0] sm:$0xff]  ;;  %v3090_v26 = vpack.c.bf16 %v104_v20, %v103_v19 }
  0x1c   :  { %3081 = vmatpush3.bf16.msra.mxu0 %v3080_v62  ;;  %v118_v17 = vld [vmem:[%s5334_s29 + $0x168] sm:$0xff]  ;;  %v136_v23 = vld [vmem:[%s5334_s29 + $0x1f8] sm:$0xff]  ;;  %315 = vmatprep.mubr.f32.mxu1 %v64_v21  ;;  %v3088_v24 = vpack.c.bf16 %v86_v15, %v85_v11  ;;  %v87_v27 = vld [vmem:[%s5334_s29 + $0x70] sm:$0xff] }
  0x1d   :  { %3083 = vmatprep.subr.bf16.mxu0 %v3082_v0  ;;  %v3120_v25 = vpack.c.bf16 %v118_v17, %v117_v16  ;;  %v88_v28 = vld [vmem:[%s5334_s29 + $0x78] sm:$0xff]  ;;  %v119_v29 = vld [vmem:[%s5334_s29 + $0x170] sm:$0xff]  ;;  %v3122_v30 = vpack.c.bf16 %v136_v23, %v135_v22  ;;  %v153_v32 = vld [vmem:[%s5334_s29 + $0x280] sm:$0xff] }
  0x1e   :  { %3113 = vmatpush3.bf16.msra.mxu1 %v3112_v63  ;;  %v120_v31 = vld [vmem:[%s5334_s29 + $0x178] sm:$0xff]  ;;  %v154_v33 = vld [vmem:[%s5334_s29 + $0x288] sm:$0xff]  ;;  %v3092_v34 = vpack.c.bf16 %v88_v28, %v87_v27  ;;  %v137_v37 = vld [vmem:[%s5334_s29 + $0x200] sm:$0xff] }
  0x1f   :  { %3115 = vmatprep.subr.bf16.mxu1 %v3114_v4  ;;  %v3124_v35 = vpack.c.bf16 %v120_v31, %v119_v29  ;;  %v3126_v36 = vpack.c.bf16 %v154_v33, %v153_v32  ;;  %v138_v38 = vld [vmem:[%s5334_s29 + $0x208] sm:$0xff]  ;;  %v155_v39 = vld [vmem:[%s5334_s29 + $0x290] sm:$0xff]  ;;  %v156_v40 = vld [vmem:[%s5334_s29 + $0x298] sm:$0xff] }
  0x20   :  { %3085 = vmatpush3.bf16.msra.mxu0 %v3084_v10  ;;  %v61_v41 = vld [vmem:[%s5335_s23] sm:$0xff]  ;;  %v3128_v42 = vpack.c.bf16 %v138_v38, %v137_v37  ;;  %v63_v43 = vld [vmem:[%s5335_s23 + $0x10] sm:$0xff]  ;;  %v3130_v44 = vpack.c.bf16 %v156_v40, %v155_v39  ;;  %v140_v46 = vld [vmem:[%s5334_s29 + $0x218] sm:$0xff] }
  0x21   :  { %3087 = vmatprep.subr.bf16.mxu0 %v3086_v14  ;;  %v139_v45 = vld [vmem:[%s5334_s29 + $0x210] sm:$0xff]  ;;  %v157_v47 = vld [vmem:[%s5334_s29 + $0x2a0] sm:$0xff]  ;;  %v158_v48 = vld [vmem:[%s5334_s29 + $0x2a8] sm:$0xff] }
  0x22   :  { %3117 = vmatpush3.bf16.msra.mxu1 %v3116_v13  ;;  %v68_v49 = vld [vmem:[%s5335_s23 + $0x38] sm:$0xff]  ;;  %v70_v50 = vld [vmem:[%s5335_s23 + $0x48] sm:$0xff]  ;;  %v3132_v51 = vpack.c.bf16 %v140_v46, %v139_v45  ;;  %v67_v52 = vld [vmem:[%s5335_s23 + $0x30] sm:$0xff]  ;;  %v3134_v53 = vpack.c.bf16 %v158_v48, %v157_v47 }
  0x23   :  { %3119 = vmatprep.subr.bf16.mxu1 %v3118_v18  ;;  %v141_v54 = vld [vmem:[%s5334_s29 + $0x220] sm:$0xff]  ;;  %v142_v55 = vld [vmem:[%s5334_s29 + $0x228] sm:$0xff]  ;;  %v159_v57 = vld [vmem:[%s5334_s29 + $0x2b0] sm:$0xff] }
  0x24   :  { %3089 = vmatpush3.bf16.msra.mxu0 %v3088_v24  ;;  %v69_v56 = vld [vmem:[%s5335_s23 + $0x40] sm:$0xff]  ;;  %v160_v58 = vld [vmem:[%s5334_s29 + $0x2b8] sm:$0xff]  ;;  %v66_v59 = vld [vmem:[%s5335_s23 + $0x28] sm:$0xff]  ;;  %v3136_v60 = vpack.c.bf16 %v142_v55, %v141_v54 }
  0x25   :  { %3091 = vmatprep.subr.bf16.mxu0 %v3090_v26  ;;  %v3138_v61 = vpack.c.bf16 %v160_v58, %v159_v57  ;;  %v143_v62 = vld [vmem:[%s5334_s29 + $0x230] sm:$0xff]  ;;  %v144_v63 = vld [vmem:[%s5334_s29 + $0x238] sm:$0xff]  ;;  %v161_v0 = vld [vmem:[%s5334_s29 + $0x2c0] sm:$0xff] }
  0x26   :  { %3121 = vmatpush3.bf16.msra.mxu1 %v3120_v25  ;;  %v162_v1 = vld [vmem:[%s5334_s29 + $0x2c8] sm:$0xff]  ;;  %v3140_v2 = vpack.c.bf16 %v144_v63, %v143_v62  ;;  %v145_v4 = vld [vmem:[%s5334_s29 + $0x240] sm:$0xff]  ;;  %v163_v6 = vld [vmem:[%s5334_s29 + $0x2d0] sm:$0xff] }
  0x27   :  { %3123 = vmatprep.subr.bf16.mxu1 %v3122_v30  ;;  %v3142_v3 = vpack.c.bf16 %v162_v1, %v161_v0  ;;  %v146_v5 = vld [vmem:[%s5334_s29 + $0x248] sm:$0xff]  ;;  %v164_v7 = vld [vmem:[%s5334_s29 + $0x2d8] sm:$0xff]  ;;  %v147_v10 = vld [vmem:[%s5334_s29 + $0x250] sm:$0xff] }
  0x28   :  { %3093 = vmatpush3.bf16.msra.mxu0 %v3092_v34  ;;  %v3144_v8 = vpack.c.bf16 %v146_v5, %v145_v4  ;;  %v3146_v9 = vpack.c.bf16 %v164_v7, %v163_v6  ;;  %v148_v11 = vld [vmem:[%s5334_s29 + $0x258] sm:$0xff]  ;;  %v165_v12 = vld [vmem:[%s5334_s29 + $0x2e0] sm:$0xff]  ;;  %v166_v13 = vld [vmem:[%s5334_s29 + $0x2e8] sm:$0xff] }
  0x29   :  { %3127 = vmatprep.subr.bf16.mxu0 %v3126_v36  ;;  %v3148_v14 = vpack.c.bf16 %v148_v11, %v147_v10  ;;  %v3150_v15 = vpack.c.bf16 %v166_v13, %v165_v12  ;;  %v149_v16 = vld [vmem:[%s5334_s29 + $0x260] sm:$0xff]  ;;  %v150_v17 = vld [vmem:[%s5334_s29 + $0x268] sm:$0xff]  ;;  %v167_v18 = vld [vmem:[%s5334_s29 + $0x2f0] sm:$0xff] }
  0x2a   :  { %3125 = vmatpush3.bf16.msra.mxu1 %v3124_v35  ;;  %v168_v19 = vld [vmem:[%s5334_s29 + $0x2f8] sm:$0xff]  ;;  %v3152_v20 = vpack.c.bf16 %v150_v17, %v149_v16  ;;  %v151_v22 = vld [vmem:[%s5334_s29 + $0x270] sm:$0xff]  ;;  %v65_v25 = vld [vmem:[%s5335_s23 + $0x20] sm:$0xff] }
  0x2b   :  { %241 = vmatmul.mubr.f32.vlgmr.msra.gmra.mrb[0].mxu0 %v61_v41  ;;  %v3154_v21 = vpack.c.bf16 %v168_v19, %v167_v18  ;;  %v152_v23 = vld [vmem:[%s5334_s29 + $0x278] sm:$0xff]  ;;  %v71_v27 = vld [vmem:[%s5335_s23 + $0x50] sm:$0xff]  ;;  %v409_v28 = vld [vmem:[%s5336_s30] sm:$0xff] }
  0x2c   :  { %3129 = vmatpush3.bf16.msra.mxu0 %v3128_v42  ;;  %245 = vmatprep.mubr.f32.mxu0 %v68_v49  ;;  %v3156_v24 = vpack.c.bf16 %v152_v23, %v151_v22  ;;  %v72_v26 = vld [vmem:[%s5335_s23 + $0x58] sm:$0xff]  ;;  %v410_v29 = vld [vmem:[%s5336_s30 + $0x8] sm:$0xff]  ;;  %v411_v31 = vld [vmem:[%s5336_s30 + $0x10] sm:$0xff] }
  0x2d   :  { %316 = vmatmul.mubr.f32.vlgmr.msra.gmra.mrb[0].mxu1 %v63_v43  ;;  %3131 = vmatprep.subr.bf16.mxu0 %v3130_v44  ;;  %v3158_v30 = vpack.c.bf16 %v410_v29, %v409_v28  ;;  %v412_v32 = vld [vmem:[%s5336_s30 + $0x18] sm:$0xff]  ;;  %v413_v34 = vld [vmem:[%s5336_s30 + $0x20] sm:$0xff]  ;;  %v414_v35 = vld [vmem:[%s5336_s30 + $0x28] sm:$0xff] }
  0x2e   :  { %320 = vmatprep.mubr.f32.mxu1 %v70_v50  ;;  %v3162_v33 = vpack.c.bf16 %v412_v32, %v411_v31  ;;  %v3166_v36 = vpack.c.bf16 %v414_v35, %v413_v34  ;;  %v426_v37 = vld [vmem:[%s5312_s5 + $0x8] sm:$0xff]  ;;  %v428_v38 = vld [vmem:[%s5312_s5 + $0x18] sm:$0xff]  ;;  %v425_v40 = vld [vmem:[%s5312_s5] sm:$0xff] }
  0x2f   :  { %246 = vmatmul.mubr.f32.gmra.mrb[2].mxu0 %v67_v52  ;;  %3159 = vmatprep.subr.bf16.mxu1 %v3158_v30  ;;  %v4381_v39 = vpack.c.bf16 %v428_v38, %v426_v37  ;;  %v427_v41 = vld [vmem:[%s5312_s5 + $0x10] sm:$0xff]  ;;  %v416_v44 = vld [vmem:[%s5336_s30 + $0x38] sm:$0xff]  ;;  %v430_v46 = vld [vmem:[%s5312_s5 + $0x28] sm:$0xff] }
  0x30   :  { %3133 = vmatpush3.bf16.msra.mxu0 %v3132_v51  ;;  %390 = vmatprep.mubr.f32.mxu0 %v66_v59  ;;  %v4389_v42 = vpack.c.bf16 %v427_v41, %v425_v40  ;;  %v415_v43 = vld [vmem:[%s5336_s30 + $0x30] sm:$0xff]  ;;  %v432_v47 = vld [vmem:[%s5312_s5 + $0x38] sm:$0xff]  ;;  %v429_v49 = vld [vmem:[%s5312_s5 + $0x20] sm:$0xff] }
  0x31   :  { %321 = vmatmul.mubr.f32.gmra.mrb[2].mxu1 %v69_v56  ;;  %3135 = vmatprep.subr.bf16.mxu0 %v3134_v53  ;;  %v3170_v45 = vpack.c.bf16 %v416_v44, %v415_v43  ;;  %v4405_v48 = vpack.c.bf16 %v432_v47, %v430_v46  ;;  %v431_v50 = vld [vmem:[%s5312_s5 + $0x30] sm:$0xff]  ;;  %v417_v52 = vld [vmem:[%s5313_s4] sm:$0xff]  ;;  %v418_v53 = vld [vmem:[%s5313_s4 + $0x8] sm:$0xff] }
  0x32   :  { %3161 = vmatpush3.bf16.msra.mxu1 %v3158_v30  ;;  %v4413_v51 = vpack.c.bf16 %v431_v50, %v429_v49  ;;  %v4422_v54 = vpack.c.bf16 %v418_v53, %v417_v52  ;;  %v434_v55 = vld [vmem:[%s5312_s5 + $0x48] sm:$0xff]  ;;  %v436_v56 = vld [vmem:[%s5312_s5 + $0x58] sm:$0xff]  ;;  %v433_v58 = vld [vmem:[%s5312_s5 + $0x40] sm:$0xff] }
  0x33   :  { %3163 = vmatprep.subr.bf16.mxu1 %v3162_v33  ;;  %v4432_v57 = vpack.c.bf16 %v436_v56, %v434_v55  ;;  %v435_v59 = vld [vmem:[%s5312_s5 + $0x50] sm:$0xff]  ;;  %v440_v62 = vld [vmem:[%s5312_s5 + $0x78] sm:$0xff]  ;;  %v437_v0 = vld [vmem:[%s5312_s5 + $0x60] sm:$0xff] }
  0x34   :  { %3137 = vmatpush3.bf16.msra.mxu0 %v3136_v60  ;;  %v4440_v60 = vpack.c.bf16 %v435_v59, %v433_v58  ;;  %v439_v1 = vld [vmem:[%s5312_s5 + $0x70] sm:$0xff]  ;;  %v444_v4 = vld [vmem:[%s5312_s5 + $0x98] sm:$0xff]  ;;  %v441_v6 = vld [vmem:[%s5312_s5 + $0x80] sm:$0xff] }
  0x35   :  { %3139 = vmatprep.subr.bf16.mxu0 %v3138_v61  ;;  %v438_v61 = vld [vmem:[%s5312_s5 + $0x68] sm:$0xff]  ;;  %v443_v7 = vld [vmem:[%s5312_s5 + $0x90] sm:$0xff]  ;;  %v448_v10 = vld [vmem:[%s5312_s5 + $0xb8] sm:$0xff] }
  0x36   :  { %3165 = vmatpush3.bf16.msra.mxu1 %v3162_v33  ;;  %v4450_v63 = vpack.c.bf16 %v440_v62, %v438_v61  ;;  %v445_v12 = vld [vmem:[%s5312_s5 + $0xa0] sm:$0xff]  ;;  %v447_v13 = vld [vmem:[%s5312_s5 + $0xb0] sm:$0xff]  ;;  %v452_v16 = vld [vmem:[%s5312_s5 + $0xd8] sm:$0xff] }
  0x37   :  { %3167 = vmatprep.subr.bf16.mxu1 %v3166_v36  ;;  %v449_v18 = vld [vmem:[%s5312_s5 + $0xc0] sm:$0xff]  ;;  %v451_v19 = vld [vmem:[%s5312_s5 + $0xd0] sm:$0xff]  ;;  %v456_v22 = vld [vmem:[%s5312_s5 + $0xf8] sm:$0xff] }
  0x38   :  { %3141 = vmatpush3.bf16.msra.mxu0 %v3140_v2  ;;  %v4458_v2 = vpack.c.bf16 %v439_v1, %v437_v0  ;;  %v453_v23 = vld [vmem:[%s5312_s5 + $0xe0] sm:$0xff]  ;;  %v419_v56 = vld [vmem:[%s5313_s4 + $0x10] sm:$0xff]  ;;  %v420_v58 = vld [vmem:[%s5313_s4 + $0x18] sm:$0xff] }
  0x39   :  { %3143 = vmatprep.subr.bf16.mxu0 %v3142_v3  ;;  %v442_v3 = vld [vmem:[%s5312_s5 + $0x88] sm:$0xff]  ;;  %v2666_v29 = vld [vmem:[%s5314_s2] ss:$0 sm:$0xff]  ;;  %v3178_v62 = vpack.c.bf16 %v420_v58, %v419_v56 }
  0x3a   :  { %3169 = vmatpush3.bf16.msra.mxu1 %v3166_v36  ;;  %v4468_v5 = vpack.c.bf16 %v444_v4, %v442_v3  ;;  %v421_v0 = vld [vmem:[%s5313_s4 + $0x20] sm:$0xff]  ;;  %v422_v1 = vld [vmem:[%s5313_s4 + $0x28] sm:$0xff]  ;;  %v423_v4 = vld [vmem:[%s5313_s4 + $0x30] sm:$0xff] }
  0x3b   :  { %3171 = vmatprep.subr.bf16.mxu1 %v3170_v45  ;;  %v3182_v3 = vpack.c.bf16 %v422_v1, %v421_v0 }
  0x3c   :  { %3145 = vmatpush3.bf16.msra.mxu0 %v3144_v8  ;;  %v4476_v8 = vpack.c.bf16 %v443_v7, %v441_v6  ;;  %v424_v6 = vld [vmem:[%s5313_s4 + $0x38] sm:$0xff] }
  0x3d   :  { %3147 = vmatprep.subr.bf16.mxu0 %v3146_v9  ;;  %v446_v9 = vld [vmem:[%s5312_s5 + $0xa8] sm:$0xff]  ;;  %v3186_v7 = vpack.c.bf16 %v424_v6, %v423_v4 }
  0x3e   :  { %3173 = vmatpush3.bf16.msra.mxu1 %v3170_v45  ;;  %v4486_v11 = vpack.c.bf16 %v448_v10, %v446_v9 }
  0x3f   :  { %3175 = vmatprep.subr.bf16.mxu1 %v4422_v54 }
  0x40   :  { %3149 = vmatpush3.bf16.msra.mxu0 %v3148_v14  ;;  %v4494_v14 = vpack.c.bf16 %v447_v13, %v445_v12 }
  0x41   :  { %3151 = vmatprep.subr.bf16.mxu0 %v3150_v15  ;;  %v450_v15 = vld [vmem:[%s5312_s5 + $0xc8] sm:$0xff] }
  0x42   :  { %v4504_v17 = vpack.c.bf16 %v452_v16, %v450_v15  ;;  %v2667_v15 = vld [vmem:[%s5315_s6] ss:$0 sm:$0xff]  ;;  %s3936_s6 = smov 64  }
  0x44   :  { %3153 = vmatpush3.bf16.msra.mxu0 %v3152_v20  ;;  %v454_v20 = vld [vmem:[%s5312_s5 + $0xe8] sm:$0xff] }
  0x45   :  { %3155 = vmatprep.subr.bf16.mxu0 %v3154_v21  ;;  %v4515_v21 = vpack.c.bf16 %v451_v19, %v449_v18 }
  0x48   :  { %3157 = vmatpush3.bf16.msra.mxu0 %v3156_v24  ;;  %v455_v24 = vld [vmem:[%s5312_s5 + $0xf0] sm:$0xff] }
  0x49   :  { %3191 = vmatprep.subr.bf16.mxu0 %v4381_v39 }
  0x4b   :  { %391 = vmatmul.mubr.f32.vlgmr.msra.gmra.mrb[4].mxu0 %v65_v25  ;;  %v3935_v25 = vmov 0.0  }
  0x4c   :  { %395 = vmatprep.mubr.f32.mxu0 %v72_v26  ;;  %3193 = vmatpush1.bf16.msra.mxu0 %v4389_v42  ;;  %v4528_v26 = vpack.c.bf16 %v456_v22, %v454_v20  ;;  %v2670_v22 = vld [vmem:[%s5316_s7] ss:$0 sm:$0xff]  ;;  %s3937_s7 = smov 32  }
  0x4d   :  { %3195 = vmatprep.subr.bf16.mxu0 %v4405_v48 }
  0x4f   :  { %396 = vmatmul.mubr.f32.gmra.mrb[6].mxu0 %v71_v27  ;;  %v4531_v27 = vpack.c.bf16 %v455_v24, %v453_v23 }
  0x50   :  { %3197 = vmatpush1.bf16.msra.mxu0 %v4413_v51  ;;  %696 = vmatprep.mubr.f32.mxu0 %v3935_v25 }
  0x51   :  { %3199 = vmatprep.subr.bf16.mxu0 %v4432_v57 }
  0x54   :  { %3201 = vmatpush1.bf16.msra.mxu0 %v4440_v60 }
  0x55   :  { %3203 = vmatprep.subr.bf16.mxu0 %v4450_v63 }
  0x58   :  { %3205 = vmatpush1.bf16.msra.mxu0 %v4458_v2 }
  0x59   :  { %3207 = vmatprep.subr.bf16.mxu0 %v4468_v5 }
  0x5c   :  { %3209 = vmatpush1.bf16.msra.mxu0 %v4476_v8 }
  0x5d   :  { %3211 = vmatprep.subr.bf16.mxu0 %v4486_v11 }
  0x60   :  { %3213 = vmatpush1.bf16.msra.mxu0 %v4494_v14 }
  0x61   :  { %3215 = vmatprep.subr.bf16.mxu0 %v4504_v17 }
  0x64   :  { %3217 = vmatpush1.bf16.msra.mxu0 %v4515_v21 }
  0x65   :  { %3219 = vmatprep.subr.bf16.mxu0 %v4528_v26 }
  0x68   :  { %3221 = vmatpush1.bf16.msra.mxu0 %v4531_v27 }
  0x69   :  { %3255 = vmatprep.subr.bf16.mxu0 %v4381_v39 }
  0x6b   :  { %697 = vmatmul.mubr.f32.vlgmr.msra.gmra.mrb[8].mxu0 %v3935_v25 }
  0x6c   :  { %3257 = vmatpush1.bf16.msra.mxu0 %v4389_v42  ;;  %893 = vmatprep.mubr.f32.mxu0 %v3935_v25 }
  0x6d   :  { %3259 = vmatprep.subr.bf16.mxu0 %v4405_v48 }
  0x70   :  { %3261 = vmatpush1.bf16.msra.mxu0 %v4413_v51 }
  0x71   :  { %3263 = vmatprep.subr.bf16.mxu0 %v4432_v57 }
  0x74   :  { %3265 = vmatpush1.bf16.msra.mxu0 %v4440_v60 }
  0x75   :  { %3267 = vmatprep.subr.bf16.mxu0 %v4450_v63 }
  0x78   :  { %3269 = vmatpush1.bf16.msra.mxu0 %v4458_v2 }
  0x79   :  { %3271 = vmatprep.subr.bf16.mxu0 %v4468_v5 }
  0x7c   :  { %3273 = vmatpush1.bf16.msra.mxu0 %v4476_v8 }
  0x7d   :  { %3275 = vmatprep.subr.bf16.mxu0 %v4486_v11 }
  0x80   :  { %3277 = vmatpush1.bf16.msra.mxu0 %v4494_v14 }
  0x81   :  { %3279 = vmatprep.subr.bf16.mxu0 %v4504_v17 }
  0x84   :  { %3281 = vmatpush1.bf16.msra.mxu0 %v4515_v21 }
  0x85   :  { %3283 = vmatprep.subr.bf16.mxu0 %v4528_v26 }
  0x88   :  { %3285 = vmatpush1.bf16.msra.mxu0 %v4531_v27 }
  0x89   :  { %3319 = vmatprep.subr.bf16.mxu0 %v4381_v39 }
  0xfe   :  { %v2710_v28 = vpop.f32.mrb[0].mxu0 }
  0xff   :  { %v2711_v30 = vpop.f32.mrb[1].mxu0 }
 0x100   :  { %v2748_v31 = vpop.f32.mrb[0].mxu1  ;;  %v2712_v32 = vadd.f32 %v2711_v30, %v2710_v28 }
 0x101   :  { %v2749_v33 = vpop.f32.mrb[1].mxu1 }
 0x102   :  { %v2750_v34 = vadd.f32 %v2749_v33, %v2748_v31  ;;  %v243_v35 = vadd.f32 %v2712_v32, %v2666_v29  ;;  %v2713_v36 = vpop.f32.mrb[2].mxu0 }
 0x103   :  { %v2714_v37 = vpop.f32.mrb[3].mxu0 }
 0x104   :  { %v2751_v38 = vpop.f32.mrb[2].mxu1  ;;  %v318_v40 = vadd.f32 %v2750_v34, %v243_v35  ;;  %v2715_v41 = vadd.f32 %v2714_v37, %v2713_v36 }
 0x105   :  { %v2752_v43 = vpop.f32.mrb[3].mxu1 }
 0x106   :  { %v2753_v44 = vadd.f32 %v2752_v43, %v2751_v38  ;;  %v248_v45 = vadd.f32 %v2715_v41, %v2666_v29 }
 0x108   :  { %v323_v46 = vadd.f32 %v2753_v44, %v248_v45 }
 0x11e   :  { %v2786_v47 = vpop.f32.mrb[4].mxu0 }
 0x11f   :  { %v2787_v49 = vpop.f32.mrb[5].mxu0 }
 0x120   :  { %v2788_v50 = vadd.f32 %v2787_v49, %v2786_v47 }
 0x122   :  { %v393_v52 = vadd.f32 %v2788_v50, %v318_v40  ;;  %v2789_v53 = vpop.f32.mrb[6].mxu0  ;;  %v23_v40 = vstv %s5325_s17 }
 0x123   :  { %v2790_v55 = vpop.f32.mrb[7].mxu0  ;;  %24 = vst [vmem:[#allocation6] sm:$0x1] %v23_v40 }
 0x124   :  { %v2791_v59 = vadd.f32 %v2790_v55, %v2789_v53  ;;  %2900 = vmatprep.mubr.msk.f32.mxu1 %vm465_vm0, %v393_v52 }
 0x126   :  { %v398_v61 = vadd.f32 %v2791_v59, %v323_v46 }
 0x128   :  { %2901 = vmatmul.mubr.msk.f32.vlgmr.msra.gmra.mrb[4].mxu1 %vm465_vm0, %v398_v61 }
 0x129   :  { %3177 = vmatpush3.bf16.msra.mxu1 %v4422_v54  ;;  %2919 = vmatprep.mubr.msk.f32.mxu1 %vm465_vm0, %v393_v52  ;;  %v401_v54 = vlaneseq }
 0x12a   :  { %3179 = vmatprep.subr.bf16.mxu1 %v3178_v62 }
 0x12b   :  { %v4598_v9 = vshrl.u32 %v401_v54, 7  ;;  %v402_v36 = vand.u32 127, %v401_v54 }
 0x12d   :  { %3181 = vmatpush3.bf16.msra.mxu1 %v3178_v62  ;;  %vm408_vm1 = vcmp.lt.s32.totalorder %v4598_v9, 2  ;;  %vm403_vm3 = vcmp.ge.s32.totalorder %v402_v36, 64  ;;  %vm404_vm4 = vcmp.lt.s32.totalorder %v402_v36, 96  ;;  %v2675_v9 = vld [vmem:[%s5324_s15] ss:$0 sm:$0xff] }
 0x12e   :  { %3183 = vmatprep.subr.bf16.mxu1 %v3182_v3  ;;  %vm4610_vm5 = vmand %vm403_vm3, %vm404_vm4 }
 0x131   :  { %3185 = vmatpush3.bf16.msra.mxu1 %v3182_v3 }
 0x132   :  { %3187 = vmatprep.subr.bf16.mxu1 %v3186_v7 }
 0x135   :  { %3189 = vmatpush3.bf16.msra.mxu1 %v3186_v7 }
 0x136   :  { %3223 = vmatprep.subr.bf16.mxu1 %v4381_v39 }
 0x138   :  { %2920 = vmatmul.mubr.msk.f32.vlgmr.msra.gmra.mrb[6].mxu1 %vm465_vm0, %v398_v61 }
 0x139   :  { %3225 = vmatpush1.bf16.msra.mxu1 %v4389_v42  ;;  %795 = vmatprep.mubr.f32.mxu1 %v3935_v25 }
 0x13a   :  { %3227 = vmatprep.subr.bf16.mxu1 %v4405_v48 }
 0x13d   :  { %3229 = vmatpush1.bf16.msra.mxu1 %v4413_v51 }
 0x13e   :  { %3231 = vmatprep.subr.bf16.mxu1 %v4432_v57  ;;  %v698_v10 = vpop.f32.mrb[8].mxu0 }
 0x13f   :  { %v700_v12 = vpop.f32.mrb[9].mxu0 }
 0x140   :  { %v703_v13 = vsel %vm408_vm1, %v698_v10, %v700_v12 }
 0x141   :  { %3233 = vmatpush1.bf16.msra.mxu1 %v4440_v60 }
 0x142   :  { %3235 = vmatprep.subr.bf16.mxu1 %v4450_v63 }
 0x145   :  { %3237 = vmatpush1.bf16.msra.mxu1 %v4458_v2 }
 0x146   :  { %3239 = vmatprep.subr.bf16.mxu1 %v4468_v5 }
 0x149   :  { %3241 = vmatpush1.bf16.msra.mxu1 %v4476_v8 }
 0x14a   :  { %3243 = vmatprep.subr.bf16.mxu1 %v4486_v11 }
 0x14d   :  { %3245 = vmatpush1.bf16.msra.mxu1 %v4494_v14 }
 0x14e   :  { %3247 = vmatprep.subr.bf16.mxu1 %v4504_v17 }
 0x151   :  { %3249 = vmatpush1.bf16.msra.mxu1 %v4515_v21 }
 0x152   :  { %3251 = vmatprep.subr.bf16.mxu1 %v4528_v26 }
 0x155   :  { %3253 = vmatpush1.bf16.msra.mxu1 %v4531_v27 }
 0x156   :  { %3287 = vmatprep.subr.bf16.mxu1 %v4381_v39 }
 0x1fb   :  { %v2902_v16 = vpop.f32.mrb[4].mxu1 }
 0x1fc   :  { %v544_v18 = vadd.f32 %v2902_v16, %v2667_v15  ;;  %v538_v19 = vpop.f32.mrb[5].mxu1 }
 0x1fd   :  { %v539_v20 = vadd.f32 %v2667_v15, %v538_v19 }
 0x1fe   :  { %548 = vst [vmem:[#allocation2 + $0x8] sm:$0xff] %v544_v18 }
 0x1ff   :  { %547 = vst [vmem:[#allocation2] sm:$0xff] %v539_v20 }
 0x206   :  { %v704_v32 = vld [vmem:[#allocation2] sm:$0x3]  ;;  %v803_v62 = vld [vmem:[#allocation2 + $0x2] sm:$0x3] }
 0x20b   :  { %v2921_v23 = vpop.f32.mrb[6].mxu1 }
 0x20c   :  { %v627_v24 = vadd.f32 %v2921_v23, %v2670_v22  ;;  %v621_v28 = vpop.f32.mrb[7].mxu1 }
 0x20d   :  { %v622_v29 = vadd.f32 %v2670_v22, %v621_v28 }
 0x20e   :  { %631 = vst [vmem:[#allocation3 + $0x8] sm:$0xff] %v627_v24 }
 0x20f   :  { %630 = vst [vmem:[#allocation3] sm:$0xff] %v622_v29 }
 0x215   :  { %v705_v30 = vld [vmem:[#allocation3 + $0xe] sm:$0x3]  ;;  %v804_v56 = vld [vmem:[#allocation3 + $0xc] sm:$0x3]  ;;  %v902_v24 = vld [vmem:[#allocation3 + $0xa] sm:$0x3] }
 0x216   :  { %v707_v31 = vrot.slane %v705_v30, 6  ;;  %v806_v58 = vrot.slane %v804_v56, 6  ;;  %v904_v28 = vrot.slane %v902_v24, 6 }
 0x218   :  { %v710_v33 = vsel %vm709_vm2, %v704_v32, %v707_v31  ;;  %v808_v1 = vsel %vm709_vm2, %v803_v62, %v806_v58  ;;  %v901_v31 = vld [vmem:[#allocation2 + $0x4] sm:$0x3] }
 0x219   :  { %v711_v34 = vadd.f32 %v710_v33, %v703_v13  ;;  %v906_v33 = vsel %vm709_vm2, %v901_v31, %v904_v28 }
 0x21b   :  { %v713_v35 = vmul.f32 0.5, %v711_v34 }
 0x21d   :  { %3837 = vtanh.f32 %v713_v35 }
 0x21e   :  { %3839 = vtanh.f32 %v711_v34 }
 0x227   :  { %v3838_v37 = vpop.eup %3837 }
 0x228   :  { %v715_v38 = vmul.f32 0.5, %v3838_v37  ;;  %v3840_v43 = vpop.eup %3839 }
 0x22a   :  { %v716_v41 = vadd.f32 0.5, %v715_v38 }
 0x22c   :  { %v717_v44 = vsel %vm4610_vm5, %v3840_v43, %v716_v41 }
 0x22d   :  { %718 = vrot.lane.b32.xlu0 %v717_v44, %s3936_s6  ;;  %v721_v47 = vmul.f32 0.0, %v717_v44 }
 0x29f   :  { %v719_v45 = vpop.permute.xlu0 %718 }
 0x2a0   :  { %v720_v46 = vmul.f32 %v719_v45, %v717_v44 }
 0x2a2   :  { %722 = vrot.lane.b32.xlu0 %v720_v46, %s3937_s7 }
 0x314   :  { %v723_v49 = vpop.permute.xlu0 %722 }
 0x315   :  { %v724_v50 = vadd.f32 %v723_v49, %v721_v47 }
 0x317   :  { %3841 = vtanh.f32 %v724_v50 }
 0x321   :  { %v3842_v52 = vpop.eup %3841 }
 0x322   :  { %726 = vrot.lane.b32.xlu1 %v3842_v52, %s3936_s6 }
 0x394   :  { %v727_v53 = vpop.permute.xlu1 %726 }
 0x395   :  { %v728_v55 = vmul.f32 %v727_v53, %v717_v44 }
 0x397   :  { %729 = vst [vmem:[#allocation4] sm:$0x3] %v728_v55  ;;  %730 = vst [vmem:[#allocation5 + $0xc] sm:$0xc] %v728_v55  ;;  %796 = vmatmul.mubr.f32.vlgmr.msra.gmra.mrb[8].mxu1 %v728_v55  ;;  %v1000_v55 = vld [vmem:[#allocation3 + $0x8] sm:$0x3] }
 0x398   :  { %3289 = vmatpush1.bf16.msra.mxu1 %v4389_v42  ;;  %991 = vmatprep.mubr.f32.mxu1 %v3935_v25  ;;  %v1002_v56 = vrot.slane %v1000_v55, 6 }
 0x399   :  { %3291 = vmatprep.subr.bf16.mxu1 %v4405_v48 }
 0x39c   :  { %3293 = vmatpush1.bf16.msra.mxu1 %v4413_v51 }
 0x39d   :  { %3295 = vmatprep.subr.bf16.mxu1 %v4432_v57 }
 0x3a0   :  { %3297 = vmatpush1.bf16.msra.mxu1 %v4440_v60 }
 0x3a1   :  { %3299 = vmatprep.subr.bf16.mxu1 %v4450_v63 }
 0x3a4   :  { %3301 = vmatpush1.bf16.msra.mxu1 %v4458_v2 }
 0x3a5   :  { %3303 = vmatprep.subr.bf16.mxu1 %v4468_v5 }
 0x3a8   :  { %3305 = vmatpush1.bf16.msra.mxu1 %v4476_v8 }
 0x3a9   :  { %3307 = vmatprep.subr.bf16.mxu1 %v4486_v11 }
 0x3ac   :  { %3309 = vmatpush1.bf16.msra.mxu1 %v4494_v14 }
 0x3ad   :  { %3311 = vmatprep.subr.bf16.mxu1 %v4504_v17 }
 0x3b0   :  { %3313 = vmatpush1.bf16.msra.mxu1 %v4515_v21 }
 0x3b1   :  { %3315 = vmatprep.subr.bf16.mxu1 %v4528_v26 }
 0x3b4   :  { %3317 = vmatpush1.bf16.msra.mxu1 %v4531_v27 }
 0x3b5   :  { %3351 = vmatprep.subr.bf16.mxu1 %v4381_v39 }
 0x46a   :  { %v797_v59 = vpop.f32.mrb[8].mxu1 }
 0x46b   :  { %v799_v61 = vpop.f32.mrb[9].mxu1 }
 0x46c   :  { %v802_v0 = vsel %vm408_vm1, %v797_v59, %v799_v61  ;;  %v999_v61 = vld [vmem:[#allocation2 + $0x6] sm:$0x3] }
 0x46d   :  { %v809_v3 = vadd.f32 %v808_v1, %v802_v0  ;;  %v1004_v0 = vsel %vm709_vm2, %v999_v61, %v1002_v56 }
 0x46f   :  { %v811_v4 = vmul.f32 0.5, %v809_v3 }
 0x471   :  { %3843 = vtanh.f32 %v811_v4 }
 0x472   :  { %3845 = vtanh.f32 %v809_v3 }
 0x47b   :  { %v3844_v6 = vpop.eup %3843 }
 0x47c   :  { %v813_v7 = vmul.f32 0.5, %v3844_v6  ;;  %v3846_v10 = vpop.eup %3845 }
 0x47e   :  { %v814_v54 = vadd.f32 0.5, %v813_v7 }
 0x480   :  { %v815_v12 = vsel %vm4610_vm5, %v3846_v10, %v814_v54 }
 0x481   :  { %816 = vrot.lane.b32.xlu1 %v815_v12, %s3936_s6  ;;  %v819_v16 = vmul.f32 %v815_v12, %v724_v50 }
 0x4f3   :  { %v817_v13 = vpop.permute.xlu1 %816 }
 0x4f4   :  { %v818_v15 = vmul.f32 %v817_v13, %v815_v12 }
 0x4f6   :  { %820 = vrot.lane.b32.xlu0 %v818_v15, %s3937_s7 }
 0x568   :  { %v821_v18 = vpop.permute.xlu0 %820 }
 0x569   :  { %v822_v19 = vadd.f32 %v821_v18, %v819_v16 }
 0x56b   :  { %3847 = vtanh.f32 %v822_v19 }
 0x575   :  { %v3848_v20 = vpop.eup %3847 }
 0x576   :  { %824 = vrot.lane.b32.xlu1 %v3848_v20, %s3936_s6 }
 0x5e8   :  { %v825_v22 = vpop.permute.xlu1 %824 }
 0x5e9   :  { %v826_v23 = vmul.f32 %v825_v22, %v815_v12  ;;  %v1098_v22 = vld [vmem:[#allocation3 + $0x6] sm:$0x3] }
 0x5eb   :  { %827 = vst [vmem:[#allocation4 + $0x2] sm:$0x3] %v826_v23  ;;  %828 = vst [vmem:[#allocation5 + $0xa] sm:$0xc] %v826_v23  ;;  %894 = vmatmul.mubr.f32.vlgmr.msra.gmra.mrb[10].mxu0 %v826_v23  ;;  %v1100_v23 = vrot.slane %v1098_v22, 6 }
 0x5ec   :  { %3321 = vmatpush1.bf16.msra.mxu0 %v4389_v42  ;;  %1089 = vmatprep.mubr.f32.mxu0 %v3935_v25 }
 0x5ed   :  { %3323 = vmatprep.subr.bf16.mxu0 %v4405_v48 }
 0x5f0   :  { %3325 = vmatpush1.bf16.msra.mxu0 %v4413_v51 }
 0x5f1   :  { %3327 = vmatprep.subr.bf16.mxu0 %v4432_v57 }
 0x5f4   :  { %3329 = vmatpush1.bf16.msra.mxu0 %v4440_v60 }
 0x5f5   :  { %3331 = vmatprep.subr.bf16.mxu0 %v4450_v63 }
 0x5f8   :  { %3333 = vmatpush1.bf16.msra.mxu0 %v4458_v2 }
 0x5f9   :  { %3335 = vmatprep.subr.bf16.mxu0 %v4468_v5 }
 0x5fc   :  { %3337 = vmatpush1.bf16.msra.mxu0 %v4476_v8 }
 0x5fd   :  { %3339 = vmatprep.subr.bf16.mxu0 %v4486_v11 }
 0x600   :  { %3341 = vmatpush1.bf16.msra.mxu0 %v4494_v14 }
 0x601   :  { %3343 = vmatprep.subr.bf16.mxu0 %v4504_v17 }
 0x604   :  { %3345 = vmatpush1.bf16.msra.mxu0 %v4515_v21 }
 0x605   :  { %3347 = vmatprep.subr.bf16.mxu0 %v4528_v26 }
 0x608   :  { %3349 = vmatpush1.bf16.msra.mxu0 %v4531_v27 }
 0x609   :  { %3383 = vmatprep.subr.bf16.mxu0 %v4381_v39 }
 0x6be   :  { %v895_v29 = vpop.f32.mrb[10].mxu0 }
 0x6bf   :  { %v897_v30 = vpop.f32.mrb[11].mxu0 }
 0x6c0   :  { %v900_v32 = vsel %vm408_vm1, %v895_v29, %v897_v30  ;;  %v1097_v29 = vld [vmem:[#allocation2 + $0x8] sm:$0x3] }
 0x6c1   :  { %v907_v34 = vadd.f32 %v906_v33, %v900_v32  ;;  %v1102_v31 = vsel %vm709_vm2, %v1097_v29, %v1100_v23 }
 0x6c3   :  { %v909_v35 = vmul.f32 0.5, %v907_v34 }
 0x6c5   :  { %3849 = vtanh.f32 %v909_v35 }
 0x6c6   :  { %3851 = vtanh.f32 %v907_v34 }
 0x6cf   :  { %v3850_v36 = vpop.eup %3849 }
 0x6d0   :  { %v911_v37 = vmul.f32 0.5, %v3850_v36  ;;  %v3852_v41 = vpop.eup %3851 }
 0x6d2   :  { %v912_v38 = vadd.f32 0.5, %v911_v37 }
 0x6d4   :  { %v913_v43 = vsel %vm4610_vm5, %v3852_v41, %v912_v38 }
 0x6d5   :  { %914 = vrot.lane.b32.xlu0 %v913_v43, %s3936_s6  ;;  %v917_v46 = vmul.f32 %v913_v43, %v822_v19 }
 0x747   :  { %v915_v44 = vpop.permute.xlu0 %914 }
 0x748   :  { %v916_v45 = vmul.f32 %v915_v44, %v913_v43 }
 0x74a   :  { %918 = vrot.lane.b32.xlu1 %v916_v45, %s3937_s7 }
 0x7bc   :  { %v919_v47 = vpop.permute.xlu1 %918 }
 0x7bd   :  { %v920_v49 = vadd.f32 %v919_v47, %v917_v46 }
 0x7bf   :  { %3853 = vtanh.f32 %v920_v49 }
 0x7c9   :  { %v3854_v50 = vpop.eup %3853 }
 0x7ca   :  { %922 = vrot.lane.b32.xlu0 %v3854_v50, %s3936_s6 }
 0x83c   :  { %v923_v52 = vpop.permute.xlu0 %922 }
 0x83d   :  { %v924_v53 = vmul.f32 %v923_v52, %v913_v43 }
 0x83f   :  { %925 = vst [vmem:[#allocation4 + $0x4] sm:$0x3] %v924_v53  ;;  %926 = vst [vmem:[#allocation5 + $0x8] sm:$0xc] %v924_v53  ;;  %992 = vmatmul.mubr.f32.vlgmr.msra.gmra.mrb[10].mxu1 %v924_v53 }
 0x840   :  { %3353 = vmatpush1.bf16.msra.mxu1 %v4389_v42  ;;  %1187 = vmatprep.mubr.f32.mxu1 %v3935_v25 }
 0x841   :  { %3355 = vmatprep.subr.bf16.mxu1 %v4405_v48 }
 0x844   :  { %3357 = vmatpush1.bf16.msra.mxu1 %v4413_v51 }
 0x845   :  { %3359 = vmatprep.subr.bf16.mxu1 %v4432_v57 }
 0x848   :  { %3361 = vmatpush1.bf16.msra.mxu1 %v4440_v60 }
 0x849   :  { %3363 = vmatprep.subr.bf16.mxu1 %v4450_v63 }
 0x84c   :  { %3365 = vmatpush1.bf16.msra.mxu1 %v4458_v2 }
 0x84d   :  { %3367 = vmatprep.subr.bf16.mxu1 %v4468_v5 }
 0x850   :  { %3369 = vmatpush1.bf16.msra.mxu1 %v4476_v8 }
 0x851   :  { %3371 = vmatprep.subr.bf16.mxu1 %v4486_v11 }
 0x854   :  { %3373 = vmatpush1.bf16.msra.mxu1 %v4494_v14 }
 0x855   :  { %3375 = vmatprep.subr.bf16.mxu1 %v4504_v17 }
 0x858   :  { %3377 = vmatpush1.bf16.msra.mxu1 %v4515_v21 }
 0x859   :  { %3379 = vmatprep.subr.bf16.mxu1 %v4528_v26 }
 0x85c   :  { %3381 = vmatpush1.bf16.msra.mxu1 %v4531_v27 }
 0x85d   :  { %3415 = vmatprep.subr.bf16.mxu1 %v4381_v39 }
 0x912   :  { %v993_v58 = vpop.f32.mrb[10].mxu1 }
 0x913   :  { %v995_v59 = vpop.f32.mrb[11].mxu1 }
 0x914   :  { %v998_v62 = vsel %vm408_vm1, %v993_v58, %v995_v59 }
 0x915   :  { %v1005_v1 = vadd.f32 %v1004_v0, %v998_v62  ;;  %v1294_v62 = vld [vmem:[#allocation3 + $0x2] sm:$0x3] }
 0x916   :  { %v1296_v0 = vrot.slane %v1294_v62, 6 }
 0x917   :  { %v1007_v3 = vmul.f32 0.5, %v1005_v1 }
 0x919   :  { %3855 = vtanh.f32 %v1007_v3 }
 0x91a   :  { %3857 = vtanh.f32 %v1005_v1 }
 0x923   :  { %v3856_v4 = vpop.eup %3855 }
 0x924   :  { %v1009_v6 = vmul.f32 0.5, %v3856_v4  ;;  %v3858_v54 = vpop.eup %3857  ;;  %v1293_v4 = vld [vmem:[#allocation2 + $0xc] sm:$0x3] }
 0x926   :  { %v1010_v7 = vadd.f32 0.5, %v1009_v6 }
 0x928   :  { %v1011_v39 = vsel %vm4610_vm5, %v3858_v54, %v1010_v7  ;;  %v1298_v7 = vsel %vm709_vm2, %v1293_v4, %v1296_v0  ;;  %v1445_v0 = vld [vmem:[%s5317_s9 + $0x40] sm:$0xff]  ;;  %v1478_v4 = vld [vmem:[%s5318_s11 + $0x48] sm:$0xff] }
 0x929   :  { %1012 = vrot.lane.b32.xlu1 %v1011_v39, %s3936_s6  ;;  %v1015_v13 = vmul.f32 %v1011_v39, %v920_v49 }
 0x99b   :  { %v1013_v10 = vpop.permute.xlu1 %1012 }
 0x99c   :  { %v1014_v12 = vmul.f32 %v1013_v10, %v1011_v39 }
 0x99e   :  { %1016 = vrot.lane.b32.xlu0 %v1014_v12, %s3937_s7 }
 0xa10   :  { %v1017_v15 = vpop.permute.xlu0 %1016 }
 0xa11   :  { %v1018_v16 = vadd.f32 %v1017_v15, %v1015_v13 }
 0xa13   :  { %3859 = vtanh.f32 %v1018_v16 }
 0xa1d   :  { %v3860_v18 = vpop.eup %3859 }
 0xa1e   :  { %1020 = vrot.lane.b32.xlu1 %v3860_v18, %s3936_s6 }
 0xa90   :  { %v1021_v19 = vpop.permute.xlu1 %1020 }
 0xa91   :  { %v1022_v20 = vmul.f32 %v1021_v19, %v1011_v39 }
 0xa93   :  { %1023 = vst [vmem:[#allocation4 + $0x6] sm:$0x3] %v1022_v20  ;;  %1024 = vst [vmem:[#allocation5 + $0x6] sm:$0xc] %v1022_v20  ;;  %1090 = vmatmul.mubr.f32.vlgmr.msra.gmra.mrb[12].mxu0 %v1022_v20 }
 0xa94   :  { %3385 = vmatpush1.bf16.msra.mxu0 %v4389_v42  ;;  %1285 = vmatprep.mubr.f32.mxu0 %v3935_v25 }
 0xa95   :  { %3387 = vmatprep.subr.bf16.mxu0 %v4405_v48 }
 0xa98   :  { %3389 = vmatpush1.bf16.msra.mxu0 %v4413_v51 }
 0xa99   :  { %3391 = vmatprep.subr.bf16.mxu0 %v4432_v57 }
 0xa9c   :  { %3393 = vmatpush1.bf16.msra.mxu0 %v4440_v60 }
 0xa9d   :  { %3395 = vmatprep.subr.bf16.mxu0 %v4450_v63 }
 0xaa0   :  { %3397 = vmatpush1.bf16.msra.mxu0 %v4458_v2 }
 0xaa1   :  { %3399 = vmatprep.subr.bf16.mxu0 %v4468_v5 }
 0xaa4   :  { %3401 = vmatpush1.bf16.msra.mxu0 %v4476_v8 }
 0xaa5   :  { %3403 = vmatprep.subr.bf16.mxu0 %v4486_v11 }
 0xaa8   :  { %3405 = vmatpush1.bf16.msra.mxu0 %v4494_v14 }
 0xaa9   :  { %3407 = vmatprep.subr.bf16.mxu0 %v4504_v17 }
 0xaac   :  { %3409 = vmatpush1.bf16.msra.mxu0 %v4515_v21 }
 0xaad   :  { %3411 = vmatprep.subr.bf16.mxu0 %v4528_v26 }
 0xab0   :  { %3413 = vmatpush1.bf16.msra.mxu0 %v4531_v27 }
 0xb66   :  { %v1091_v24 = vpop.f32.mrb[12].mxu0 }
 0xb67   :  { %v1093_v28 = vpop.f32.mrb[13].mxu0 }
 0xb68   :  { %v1096_v30 = vsel %vm408_vm1, %v1091_v24, %v1093_v28 }
 0xb69   :  { %v1103_v32 = vadd.f32 %v1102_v31, %v1096_v30  ;;  %v1392_v30 = vld [vmem:[#allocation3] sm:$0x3] }
 0xb6a   :  { %v1394_v31 = vrot.slane %v1392_v30, 6  ;;  %v1452_v30 = vld [vmem:[%s5317_s9 + $0x78] sm:$0xff] }
 0xb6b   :  { %v1105_v33 = vmul.f32 0.5, %v1103_v32 }
 0xb6d   :  { %3861 = vtanh.f32 %v1105_v33 }
 0xb6e   :  { %3863 = vtanh.f32 %v1103_v32 }
 0xb77   :  { %v3862_v34 = vpop.eup %3861 }
 0xb78   :  { %v1107_v35 = vmul.f32 0.5, %v3862_v34  ;;  %v3864_v37 = vpop.eup %3863  ;;  %v1391_v34 = vld [vmem:[#allocation2 + $0xe] sm:$0x3] }
 0xb7a   :  { %v1108_v36 = vadd.f32 0.5, %v1107_v35 }
 0xb7c   :  { %v1109_v38 = vsel %vm4610_vm5, %v3864_v37, %v1108_v36  ;;  %v1396_v36 = vsel %vm709_vm2, %v1391_v34, %v1394_v31  ;;  %v1484_v34 = vld [vmem:[%s5318_s11 + $0x78] sm:$0xff] }
 0xb7d   :  { %1110 = vrot.lane.b32.xlu0 %v1109_v38, %s3936_s6  ;;  %v1113_v44 = vmul.f32 %v1109_v38, %v1018_v16 }
 0xbef   :  { %v1111_v41 = vpop.permute.xlu0 %1110 }
 0xbf0   :  { %v1112_v43 = vmul.f32 %v1111_v41, %v1109_v38 }
 0xbf2   :  { %1114 = vrot.lane.b32.xlu1 %v1112_v43, %s3937_s7 }
 0xc64   :  { %v1115_v45 = vpop.permute.xlu1 %1114 }
 0xc65   :  { %v1116_v46 = vadd.f32 %v1115_v45, %v1113_v44 }
 0xc67   :  { %3865 = vtanh.f32 %v1116_v46 }
 0xc71   :  { %v3866_v47 = vpop.eup %3865 }
 0xc72   :  { %1118 = vrot.lane.b32.xlu0 %v3866_v47, %s3936_s6 }
 0xce4   :  { %v1119_v49 = vpop.permute.xlu0 %1118 }
 0xce5   :  { %v1120_v50 = vmul.f32 %v1119_v49, %v1109_v38 }
 0xce7   :  { %1121 = vst [vmem:[#allocation4 + $0x8] sm:$0x3] %v1120_v50  ;;  %1122 = vst [vmem:[#allocation5 + $0x4] sm:$0xc] %v1120_v50  ;;  %1188 = vmatmul.mubr.f32.vlgmr.msra.gmra.mrb[12].mxu1 %v1120_v50  ;;  %v1437_v50 = vld [vmem:[%s5317_s9] sm:$0xff] }
 0xce8   :  { %3417 = vmatpush1.bf16.msra.mxu1 %v4389_v42  ;;  %1383 = vmatprep.mubr.f32.mxu1 %v3935_v25  ;;  %v1196_v42 = vld [vmem:[#allocation3 + $0x4] sm:$0x3] }
 0xce9   :  { %3419 = vmatprep.subr.bf16.mxu1 %v4405_v48  ;;  %v1198_v48 = vrot.slane %v1196_v42, 6  ;;  %v1438_v42 = vld [vmem:[%s5317_s9 + $0x8] sm:$0xff] }
 0xcec   :  { %3421 = vmatpush1.bf16.msra.mxu1 %v4413_v51 }
 0xced   :  { %3423 = vmatprep.subr.bf16.mxu1 %v4432_v57 }
 0xcf0   :  { %3425 = vmatpush1.bf16.msra.mxu1 %v4440_v60  ;;  %v1195_v60 = vld [vmem:[#allocation2 + $0xa] sm:$0x3] }
 0xcf1   :  { %3427 = vmatprep.subr.bf16.mxu1 %v4450_v63 }
 0xcf4   :  { %3429 = vmatpush1.bf16.msra.mxu1 %v4458_v2  ;;  %v1200_v2 = vsel %vm709_vm2, %v1195_v60, %v1198_v48  ;;  %v1469_v48 = vld [vmem:[%s5318_s11] sm:$0xff]  ;;  %v1439_v60 = vld [vmem:[%s5317_s9 + $0x10] sm:$0xff] }
 0xcf5   :  { %3431 = vmatprep.subr.bf16.mxu1 %v4468_v5 }
 0xcf8   :  { %3433 = vmatpush1.bf16.msra.mxu1 %v4476_v8 }
 0xcf9   :  { %3435 = vmatprep.subr.bf16.mxu1 %v4486_v11 }
 0xcfc   :  { %3437 = vmatpush1.bf16.msra.mxu1 %v4494_v14 }
 0xcfd   :  { %3439 = vmatprep.subr.bf16.mxu1 %v4504_v17 }
 0xd00   :  { %3441 = vmatpush1.bf16.msra.mxu1 %v4515_v21 }
 0xd01   :  { %3443 = vmatprep.subr.bf16.mxu1 %v4528_v26 }
 0xd04   :  { %3445 = vmatpush1.bf16.msra.mxu1 %v4531_v27 }
 0xdba   :  { %v1189_v51 = vpop.f32.mrb[12].mxu1 }
 0xdbb   :  { %v1191_v57 = vpop.f32.mrb[13].mxu1 }
 0xdbc   :  { %v1194_v63 = vsel %vm408_vm1, %v1189_v51, %v1191_v57  ;;  %v3446_v51 = vpack.c.bf16 %v1438_v42, %v1437_v50  ;;  %v1470_v57 = vld [vmem:[%s5318_s11 + $0x8] sm:$0xff]  ;;  %v1423_v50 = vld [vmem:[%s5319_s8 + $0x10] sm:$0xff]  ;;  %v1424_v42 = vld [vmem:[%s5319_s8 + $0x18] sm:$0xff] }
 0xdbd   :  { %v1201_v5 = vadd.f32 %v1200_v2, %v1194_v63  ;;  %v1440_v63 = vld [vmem:[%s5317_s9 + $0x18] sm:$0xff]  ;;  %v3510_v2 = vpack.c.bf16 %v1470_v57, %v1469_v48  ;;  %v1455_v48 = vld [vmem:[%s5320_s10 + $0x10] sm:$0xff] }
 0xdbe   :  { %3447 = vmatprep.subr.bf16.mxu0 %v3446_v51 }
 0xdbf   :  { %v1203_v8 = vmul.f32 0.5, %v1201_v5  ;;  %3511 = vmatprep.subr.bf16.mxu1 %v3510_v2 }
 0xdc1   :  { %3867 = vtanh.f32 %v1203_v8  ;;  %v1471_v8 = vld [vmem:[%s5318_s11 + $0x10] sm:$0xff] }
 0xdc2   :  { %3869 = vtanh.f32 %v1201_v5  ;;  %v3450_v5 = vpack.c.bf16 %v1440_v63, %v1439_v60  ;;  %v1425_v60 = vld [vmem:[%s5319_s8 + $0x20] sm:$0xff]  ;;  %v3482_v63 = vpack.c.bf16 %v1424_v42, %v1423_v50  ;;  %v1795_v42 = vld [vmem:[%s5321_s12 + $0x50] sm:$0xff] }
 0xdc3   :  { %v1793_v50 = vld [vmem:[%s5321_s12 + $0x40] sm:$0xff] }
 0xdcb   :  { %v3868_v11 = vpop.eup %3867 }
 0xdcc   :  { %v1205_v14 = vmul.f32 0.5, %v3868_v11  ;;  %v3870_v21 = vpop.eup %3869  ;;  %v1472_v11 = vld [vmem:[%s5318_s11 + $0x18] sm:$0xff] }
 0xdce   :  { %v1206_v17 = vadd.f32 0.5, %v1205_v14  ;;  %v1441_v14 = vld [vmem:[%s5317_s9 + $0x20] sm:$0xff] }
 0xdd0   :  { %v1207_v26 = vsel %vm4610_vm5, %v3870_v21, %v1206_v17  ;;  %v3514_v17 = vpack.c.bf16 %v1472_v11, %v1471_v8  ;;  %v1442_v21 = vld [vmem:[%s5317_s9 + $0x28] sm:$0xff]  ;;  %v1457_v8 = vld [vmem:[%s5320_s10 + $0x20] sm:$0xff] }
 0xdd1   :  { %1208 = vrot.lane.b32.xlu1 %v1207_v26, %s3936_s6  ;;  %v1211_v53 = vmul.f32 %v1207_v26, %v1116_v46  ;;  %v1458_v11 = vld [vmem:[%s5320_s10 + $0x28] sm:$0xff] }
 0xe43   :  { %v1209_v27 = vpop.permute.xlu1 %1208 }
 0xe44   :  { %v1210_v52 = vmul.f32 %v1209_v27, %v1207_v26  ;;  %v1474_v27 = vld [vmem:[%s5318_s11 + $0x28] sm:$0xff] }
 0xe46   :  { %1212 = vrot.lane.b32.xlu0 %v1210_v52, %s3937_s7  ;;  %v3454_v52 = vpack.c.bf16 %v1442_v21, %v1441_v14  ;;  %v1417_v14 = vld [vmem:[#allocation4] sm:$0xff]  ;;  %v3550_v21 = vpack.c.bf16 %v1458_v11, %v1457_v8 }
 0xeb8   :  { %v1213_v55 = vpop.permute.xlu0 %1212 }
 0xeb9   :  { %v1214_v56 = vadd.f32 %v1213_v55, %v1211_v53  ;;  %v1443_v55 = vld [vmem:[%s5317_s9 + $0x30] sm:$0xff] }
 0xebb   :  { %3871 = vtanh.f32 %v1214_v56 }
 0xec5   :  { %v3872_v58 = vpop.eup %3871 }
 0xec6   :  { %1216 = vrot.lane.b32.xlu1 %v3872_v58, %s3936_s6  ;;  %v1475_v58 = vld [vmem:[%s5318_s11 + $0x30] sm:$0xff] }
 0xf38   :  { %v1217_v59 = vpop.permute.xlu1 %1216 }
 0xf39   :  { %v1218_v61 = vmul.f32 %v1217_v59, %v1207_v26  ;;  %v1473_v26 = vld [vmem:[%s5318_s11 + $0x20] sm:$0xff]  ;;  %v1476_v59 = vld [vmem:[%s5318_s11 + $0x38] sm:$0xff] }
 0xf3a   :  { %v3518_v53 = vpack.c.bf16 %v1474_v27, %v1473_v26  ;;  %v3522_v62 = vpack.c.bf16 %v1476_v59, %v1475_v58  ;;  %v1427_v26 = vld [vmem:[%s5319_s8 + $0x30] sm:$0xff]  ;;  %v1428_v27 = vld [vmem:[%s5319_s8 + $0x38] sm:$0xff]  ;;  %v1429_v58 = vld [vmem:[%s5319_s8 + $0x40] sm:$0xff] }
 0xf3b   :  { %1219 = vst [vmem:[#allocation4 + $0xa] sm:$0x3] %v1218_v61  ;;  %1220 = vst [vmem:[#allocation5 + $0x2] sm:$0xc] %v1218_v61  ;;  %1286 = vmatmul.mubr.f32.vlgmr.msra.gmra.mrb[14].mxu0 %v1218_v61  ;;  %v1430_v59 = vld [vmem:[%s5319_s8 + $0x48] sm:$0xff] }
 0xf3c   :  { %3449 = vmatpush3.bf16.msra.mxu0 %v3446_v51  ;;  %v1456_v51 = vld [vmem:[%s5320_s10 + $0x18] sm:$0xff] }
 0xf3d   :  { %3451 = vmatprep.subr.bf16.mxu0 %v3450_v5 }
 0xf40   :  { %3453 = vmatpush3.bf16.msra.mxu0 %v3450_v5  ;;  %v1426_v5 = vld [vmem:[%s5319_s8 + $0x28] sm:$0xff] }
 0xf41   :  { %3455 = vmatprep.subr.bf16.mxu0 %v3454_v52 }
 0xf44   :  { %3457 = vmatpush3.bf16.msra.mxu0 %v3454_v52  ;;  %v1459_v52 = vld [vmem:[%s5320_s10 + $0x30] sm:$0xff] }
0x100e   :  { %v1287_v1 = vpop.f32.mrb[14].mxu0 }
0x100f   :  { %v1289_v3 = vpop.f32.mrb[15].mxu0 }
0x1010   :  { %v1292_v6 = vsel %vm408_vm1, %v1287_v1, %v1289_v3  ;;  %v1446_v1 = vld [vmem:[%s5317_s9 + $0x48] sm:$0xff]  ;;  %v1477_v3 = vld [vmem:[%s5318_s11 + $0x40] sm:$0xff] }
0x1011   :  { %v1299_v54 = vadd.f32 %v1298_v7, %v1292_v6  ;;  %v3462_v6 = vpack.c.bf16 %v1446_v1, %v1445_v0  ;;  %v3526_v7 = vpack.c.bf16 %v1478_v4, %v1477_v3  ;;  %v3494_v0 = vpack.c.bf16 %v1430_v59, %v1429_v58  ;;  %v1431_v3 = vld [vmem:[%s5319_s8 + $0x50] sm:$0xff]  ;;  %v1432_v4 = vld [vmem:[%s5319_s8 + $0x58] sm:$0xff] }
0x1012   :  { %v1812_v58 = vld [vmem:[%s5321_s12 + $0xd8] sm:$0xff] }
0x1013   :  { %v1301_v39 = vmul.f32 0.5, %v1299_v54 }
0x1015   :  { %3873 = vtanh.f32 %v1301_v39  ;;  %v1448_v39 = vld [vmem:[%s5317_s9 + $0x58] sm:$0xff] }
0x1016   :  { %3875 = vtanh.f32 %v1299_v54  ;;  %v1447_v54 = vld [vmem:[%s5317_s9 + $0x50] sm:$0xff] }
0x101f   :  { %v3874_v10 = vpop.eup %3873 }
0x1020   :  { %v1303_v12 = vmul.f32 0.5, %v3874_v10  ;;  %v3876_v15 = vpop.eup %3875  ;;  %v1479_v10 = vld [vmem:[%s5318_s11 + $0x50] sm:$0xff] }
0x1022   :  { %v1304_v13 = vadd.f32 0.5, %v1303_v12  ;;  %v1480_v12 = vld [vmem:[%s5318_s11 + $0x58] sm:$0xff] }
0x1024   :  { %v1305_v16 = vsel %vm4610_vm5, %v3876_v15, %v1304_v13  ;;  %v3466_v13 = vpack.c.bf16 %v1448_v39, %v1447_v54  ;;  %v3530_v15 = vpack.c.bf16 %v1480_v12, %v1479_v10  ;;  %v3498_v54 = vpack.c.bf16 %v1432_v4, %v1431_v3  ;;  %v1433_v10 = vld [vmem:[%s5319_s8 + $0x60] sm:$0xff]  ;;  %v1434_v12 = vld [vmem:[%s5319_s8 + $0x68] sm:$0xff]  ;;  %v1816_v3 = vld [vmem:[%s5321_s12 + $0xf8] sm:$0xff] }
0x1025   :  { %1306 = vrot.lane.b32.xlu0 %v1305_v16, %s3936_s6  ;;  %v1309_v20 = vmul.f32 %v1305_v16, %v1214_v56  ;;  %v1444_v56 = vld [vmem:[%s5317_s9 + $0x38] sm:$0xff] }
0x1026   :  { %v3458_v61 = vpack.c.bf16 %v1444_v56, %v1443_v55  ;;  %v3490_v55 = vpack.c.bf16 %v1428_v27, %v1427_v26  ;;  %v1808_v26 = vld [vmem:[%s5321_s12 + $0xb8] sm:$0xff] }
0x1028   :  { %3459 = vmatprep.subr.bf16.mxu0 %v3458_v61 }
0x1029   :  { %3461 = vmatpush3.bf16.msra.mxu0 %v3458_v61  ;;  %v1461_v61 = vld [vmem:[%s5320_s10 + $0x40] sm:$0xff] }
0x102a   :  { %3463 = vmatprep.subr.bf16.mxu0 %v3462_v6 }
0x102d   :  { %3465 = vmatpush3.bf16.msra.mxu0 %v3462_v6  ;;  %v1463_v6 = vld [vmem:[%s5320_s10 + $0x50] sm:$0xff] }
0x102e   :  { %3467 = vmatprep.subr.bf16.mxu0 %v3466_v13 }
0x1031   :  { %3469 = vmatpush3.bf16.msra.mxu0 %v3466_v13  ;;  %v1465_v13 = vld [vmem:[%s5320_s10 + $0x60] sm:$0xff] }
0x1097   :  { %v1307_v18 = vpop.permute.xlu0 %1306 }
0x1098   :  { %v1308_v19 = vmul.f32 %v1307_v18, %v1305_v16 }
0x109a   :  { %1310 = vrot.lane.b32.xlu1 %v1308_v19, %s3937_s7 }
0x110c   :  { %v1311_v22 = vpop.permute.xlu1 %1310 }
0x110d   :  { %v4749_v23 = vadd.f32 %v1311_v22, %v1309_v20  ;;  %v1449_v20 = vld [vmem:[%s5317_s9 + $0x60] sm:$0xff]  ;;  %v1450_v22 = vld [vmem:[%s5317_s9 + $0x68] sm:$0xff] }
0x110f   :  { %3877 = vtanh.f32 %v4749_v23 }
0x1119   :  { %v3878_v24 = vpop.eup %3877 }
0x111a   :  { %1314 = vrot.lane.b32.xlu0 %v3878_v24, %s3936_s6  ;;  %v1481_v24 = vld [vmem:[%s5318_s11 + $0x60] sm:$0xff] }
0x118c   :  { %v1315_v28 = vpop.permute.xlu0 %1314 }
0x118d   :  { %v1316_v29 = vmul.f32 %v1315_v28, %v1305_v16  ;;  %v3470_v28 = vpack.c.bf16 %v1450_v22, %v1449_v20  ;;  %v1436_v20 = vld [vmem:[%s5319_s8 + $0x78] sm:$0xff]  ;;  %v1467_v22 = vld [vmem:[%s5320_s10 + $0x70] sm:$0xff] }
0x118f   :  { %1317 = vst [vmem:[#allocation4 + $0xc] sm:$0x3] %v1316_v29  ;;  %1318 = vst [vmem:[#allocation5] sm:$0xc] %v1316_v29  ;;  %1384 = vmatmul.mubr.f32.vlgmr.msra.gmra.mrb[14].mxu1 %v1316_v29  ;;  %v1451_v29 = vld [vmem:[%s5317_s9 + $0x70] sm:$0xff]  ;;  %3471 = vmatprep.subr.bf16.mxu0 %v3470_v28 }
0x1190   :  { %3513 = vmatpush3.bf16.msra.mxu1 %v3510_v2  ;;  %3473 = vmatpush3.bf16.msra.mxu0 %v3470_v28  ;;  %v3546_v2 = vpack.c.bf16 %v1456_v51, %v1455_v48  ;;  %v1798_v48 = vld [vmem:[%s5321_s12 + $0x68] sm:$0xff]  ;;  %v1800_v51 = vld [vmem:[%s5321_s12 + $0x78] sm:$0xff] }
0x1191   :  { %3515 = vmatprep.subr.bf16.mxu1 %v3514_v17 }
0x1194   :  { %3517 = vmatpush3.bf16.msra.mxu1 %v3514_v17  ;;  %v3486_v17 = vpack.c.bf16 %v1426_v5, %v1425_v60  ;;  %v1797_v60 = vld [vmem:[%s5321_s12 + $0x60] sm:$0xff]  ;;  %v1804_v5 = vld [vmem:[%s5321_s12 + $0x98] sm:$0xff] }
0x1195   :  { %3519 = vmatprep.subr.bf16.mxu1 %v3518_v53 }
0x1198   :  { %3521 = vmatpush3.bf16.msra.mxu1 %v3518_v53  ;;  %v1460_v53 = vld [vmem:[%s5320_s10 + $0x38] sm:$0xff] }
0x1199   :  { %3523 = vmatprep.subr.bf16.mxu1 %v3522_v62  ;;  %v3554_v56 = vpack.c.bf16 %v1460_v53, %v1459_v52  ;;  %v1805_v53 = vld [vmem:[%s5321_s12 + $0xa0] sm:$0xff] }
0x119c   :  { %3525 = vmatpush3.bf16.msra.mxu1 %v3522_v62  ;;  %v1462_v62 = vld [vmem:[%s5320_s10 + $0x48] sm:$0xff] }
0x119d   :  { %3527 = vmatprep.subr.bf16.mxu1 %v3526_v7  ;;  %v3558_v1 = vpack.c.bf16 %v1462_v62, %v1461_v61  ;;  %v1809_v62 = vld [vmem:[%s5321_s12 + $0xc0] sm:$0xff] }
0x11a0   :  { %3529 = vmatpush3.bf16.msra.mxu1 %v3526_v7  ;;  %v1464_v7 = vld [vmem:[%s5320_s10 + $0x58] sm:$0xff] }
0x11a1   :  { %3531 = vmatprep.subr.bf16.mxu1 %v3530_v15  ;;  %v3562_v39 = vpack.c.bf16 %v1464_v7, %v1463_v6  ;;  %v1813_v7 = vld [vmem:[%s5321_s12 + $0xe0] sm:$0xff] }
0x11a4   :  { %3533 = vmatpush3.bf16.msra.mxu1 %v3530_v15  ;;  %v1466_v15 = vld [vmem:[%s5320_s10 + $0x68] sm:$0xff] }
0x1262   :  { %v1385_v32 = vpop.f32.mrb[14].mxu1 }
0x1263   :  { %v1387_v33 = vpop.f32.mrb[15].mxu1 }
0x1264   :  { %v1390_v35 = vsel %vm408_vm1, %v1385_v32, %v1387_v33  ;;  %v3474_v32 = vpack.c.bf16 %v1452_v30, %v1451_v29  ;;  %v1483_v33 = vld [vmem:[%s5318_s11 + $0x70] sm:$0xff]  ;;  %v1786_v29 = vld [vmem:[%s5321_s12 + $0x8] sm:$0xff]  ;;  %v1788_v30 = vld [vmem:[%s5321_s12 + $0x18] sm:$0xff] }
0x1265   :  { %v1397_v37 = vadd.f32 %v1396_v36, %v1390_v35  ;;  %v3538_v35 = vpack.c.bf16 %v1484_v34, %v1483_v33  ;;  %v1421_v36 = vld [vmem:[%s5319_s8] sm:$0xff]  ;;  %v1787_v33 = vld [vmem:[%s5321_s12 + $0x10] sm:$0xff]  ;;  %v1790_v34 = vld [vmem:[%s5321_s12 + $0x28] sm:$0xff] }
0x1266   :  { %3475 = vmatprep.subr.bf16.mxu0 %v3474_v32 }
0x1267   :  { %v1399_v38 = vmul.f32 0.5, %v1397_v37  ;;  %3477 = vmatpush3.bf16.msra.mxu0 %v3474_v32  ;;  %v1785_v32 = vld [vmem:[%s5321_s12] sm:$0xff] }
0x1269   :  { %3879 = vtanh.f32 %v1399_v38  ;;  %v1453_v38 = vld [vmem:[%s5320_s10] sm:$0xff] }
0x126a   :  { %3881 = vtanh.f32 %v1397_v37  ;;  %v1422_v37 = vld [vmem:[%s5319_s8 + $0x8] sm:$0xff] }
0x1273   :  { %v3880_v41 = vpop.eup %3879 }
0x1274   :  { %v1401_v43 = vmul.f32 0.5, %v3880_v41  ;;  %v3882_v45 = vpop.eup %3881  ;;  %v3478_v41 = vpack.c.bf16 %v1422_v37, %v1421_v36  ;;  %v4980_v36 = vpack.c.bf16 %v1787_v33, %v1785_v32 }
0x1276   :  { %v1402_v44 = vadd.f32 0.5, %v1401_v43  ;;  %v1454_v43 = vld [vmem:[%s5320_s10 + $0x8] sm:$0xff]  ;;  %3479 = vmatprep.subr.bf16.mxu0 %v3478_v41 }
0x1278   :  { %v4758_v46 = vsel %vm4610_vm5, %v3882_v45, %v1402_v44  ;;  %v3542_v45 = vpack.c.bf16 %v1454_v43, %v1453_v38  ;;  %v1789_v38 = vld [vmem:[%s5321_s12 + $0x20] sm:$0xff] }
0x1279   :  { %1404 = vrot.lane.b32.xlu1 %v4758_v46, %s3936_s6  ;;  %v1407_v16 = vmul.f32 %v4758_v46, %v4749_v23  ;;  %v1482_v23 = vld [vmem:[%s5318_s11 + $0x68] sm:$0xff] }
0x127a   :  { %v3534_v31 = vpack.c.bf16 %v1482_v23, %v1481_v24  ;;  %v1468_v24 = vld [vmem:[%s5320_s10 + $0x78] sm:$0xff] }
0x127b   :  { %v3570_v23 = vpack.c.bf16 %v1468_v24, %v1467_v22 }
0x127c   :  { %3535 = vmatprep.subr.bf16.mxu1 %v3534_v31 }
0x127d   :  { %3537 = vmatpush3.bf16.msra.mxu1 %v3534_v31  ;;  %v4966_v31 = vpack.c.bf16 %v1788_v30, %v1786_v29 }
0x127e   :  { %3539 = vmatprep.subr.bf16.mxu1 %v3538_v35 }
0x1281   :  { %3541 = vmatpush3.bf16.msra.mxu1 %v3538_v35  ;;  %v1792_v35 = vld [vmem:[%s5321_s12 + $0x38] sm:$0xff] }
0x1282   :  { %3543 = vmatprep.subr.bf16.mxu1 %v3542_v45  ;;  %v4983_v37 = vpack.c.bf16 %v1792_v35, %v1790_v34 }
0x12eb   :  { %v1405_v47 = vpop.permute.xlu1 %1404 }
0x12ec   :  { %v1406_v49 = vmul.f32 %v1405_v47, %v4758_v46 }
0x12ee   :  { %1408 = vrot.lane.b32.xlu0 %v1406_v49, %s3937_s7 }
0x1360   :  { %v1409_v18 = vpop.permute.xlu0 %1408 }
0x1361   :  { %v1410_v19 = vadd.f32 %v1409_v18, %v1407_v16  ;;  %v3502_v16 = vpack.c.bf16 %v1434_v12, %v1433_v10  ;;  %v3566_v18 = vpack.c.bf16 %v1466_v15, %v1465_v13  ;;  %v2673_v10 = vld [vmem:[%s5322_s13] ss:$0 sm:$0xff] }
0x1362   :  { %v2674_v12 = vld [vmem:[%s5323_s14] ss:$0 sm:$0xff] }
0x1363   :  { %3883 = vtanh.f32 %v1410_v19  ;;  %v1435_v19 = vld [vmem:[%s5319_s8 + $0x70] sm:$0xff] }
0x1364   :  { %v3506_v28 = vpack.c.bf16 %v1436_v20, %v1435_v19 }
0x136d   :  { %v3884_v44 = vpop.eup %3883 }
0x136e   :  { %1412 = vrot.lane.b32.xlu1 %v3884_v44, %s3936_s6  ;;  %v1794_v44 = vld [vmem:[%s5321_s12 + $0x48] sm:$0xff] }
0x13e0   :  { %v1413_v47 = vpop.permute.xlu1 %1412 }
0x13e1   :  { %v1414_v49 = vmul.f32 %v1413_v47, %v4758_v46  ;;  %v1420_v46 = vld [vmem:[#allocation5 + $0x8] sm:$0xff] }
0x13e3   :  { %1415 = vst [vmem:[#allocation4 + $0xe] sm:$0x3] %v1414_v49  ;;  %1416 = vst [vmem:[#allocation5 - $0x2] sm:$0xc] %v1414_v49 }
0x13ea   :  { %v1419_v57 = vld [vmem:[#allocation5] sm:$0xff]  ;;  %v1418_v43 = vld [vmem:[#allocation4 + $0x8] sm:$0xff] }
0x13eb   :  { %2954 = vmatprep.mubr.f32.mxu0 %v1419_v57  ;;  %3024 = vmatprep.mubr.f32.mxu1 %v1419_v57  ;;  %v5021_v57 = vpack.c.bf16 %v1795_v42, %v1793_v50 }
0x13ec   :  { %2955 = vmatmul.mubr.f32.vlgmr.msra.gmra.mrb[16].mxu0 %v1420_v46  ;;  %3025 = vmatmul.mubr.f32.vlgmr.msra.gmra.mrb[16].mxu1 %v1420_v46  ;;  %v5024_v46 = vpack.c.bf16 %v1800_v51, %v1798_v48 }
0x13ed   :  { %3481 = vmatpush3.bf16.msra.mxu0 %v3478_v41  ;;  %3545 = vmatpush3.bf16.msra.mxu1 %v3542_v45  ;;  %v1791_v41 = vld [vmem:[%s5321_s12 + $0x30] sm:$0xff]  ;;  %v1796_v45 = vld [vmem:[%s5321_s12 + $0x58] sm:$0xff] }
0x13ee   :  { %2989 = vmatprep.mubr.f32.mxu0 %v1417_v14  ;;  %3059 = vmatprep.mubr.f32.mxu1 %v1417_v14  ;;  %v4999_v47 = vpack.c.bf16 %v1791_v41, %v1789_v38  ;;  %v5003_v49 = vpack.c.bf16 %v1796_v45, %v1794_v44  ;;  %v1801_v14 = vld [vmem:[%s5321_s12 + $0x80] sm:$0xff] }
0x13ef   :  { %3483 = vmatprep.subr.bf16.mxu0 %v3482_v63  ;;  %3547 = vmatprep.subr.bf16.mxu1 %v3546_v2 }
0x13f1   :  { %3485 = vmatpush3.bf16.msra.mxu0 %v3482_v63  ;;  %3549 = vmatpush3.bf16.msra.mxu1 %v3546_v2  ;;  %v1799_v63 = vld [vmem:[%s5321_s12 + $0x70] sm:$0xff]  ;;  %v1802_v2 = vld [vmem:[%s5321_s12 + $0x88] sm:$0xff] }
0x13f2   :  { %3487 = vmatprep.subr.bf16.mxu0 %v3486_v17  ;;  %3551 = vmatprep.subr.bf16.mxu1 %v3550_v21  ;;  %v5041_v8 = vpack.c.bf16 %v1799_v63, %v1797_v60  ;;  %v5044_v11 = vpack.c.bf16 %v1804_v5, %v1802_v2 }
0x13f5   :  { %3489 = vmatpush3.bf16.msra.mxu0 %v3486_v17  ;;  %3553 = vmatpush3.bf16.msra.mxu1 %v3550_v21  ;;  %v1803_v17 = vld [vmem:[%s5321_s12 + $0x90] sm:$0xff]  ;;  %v1806_v21 = vld [vmem:[%s5321_s12 + $0xa8] sm:$0xff] }
0x13f6   :  { %3491 = vmatprep.subr.bf16.mxu0 %v3490_v55  ;;  %3555 = vmatprep.subr.bf16.mxu1 %v3554_v56  ;;  %v5061_v27 = vpack.c.bf16 %v1803_v17, %v1801_v14  ;;  %v5064_v52 = vpack.c.bf16 %v1808_v26, %v1806_v21 }
0x13f9   :  { %3493 = vmatpush3.bf16.msra.mxu0 %v3490_v55  ;;  %3557 = vmatpush3.bf16.msra.mxu1 %v3554_v56  ;;  %v1807_v55 = vld [vmem:[%s5321_s12 + $0xb0] sm:$0xff]  ;;  %v1810_v56 = vld [vmem:[%s5321_s12 + $0xc8] sm:$0xff] }
0x13fa   :  { %3495 = vmatprep.subr.bf16.mxu0 %v3494_v0  ;;  %3559 = vmatprep.subr.bf16.mxu1 %v3558_v1  ;;  %v5081_v59 = vpack.c.bf16 %v1807_v55, %v1805_v53  ;;  %v5084_v61 = vpack.c.bf16 %v1812_v58, %v1810_v56 }
0x13fd   :  { %3497 = vmatpush3.bf16.msra.mxu0 %v3494_v0  ;;  %3561 = vmatpush3.bf16.msra.mxu1 %v3558_v1  ;;  %v1811_v0 = vld [vmem:[%s5321_s12 + $0xd0] sm:$0xff]  ;;  %v1814_v1 = vld [vmem:[%s5321_s12 + $0xe8] sm:$0xff] }
0x13fe   :  { %3499 = vmatprep.subr.bf16.mxu0 %v3498_v54  ;;  %3563 = vmatprep.subr.bf16.mxu1 %v3562_v39  ;;  %v5101_v4 = vpack.c.bf16 %v1811_v0, %v1809_v62  ;;  %v5104_v6 = vpack.c.bf16 %v1816_v3, %v1814_v1 }
0x1401   :  { %3501 = vmatpush3.bf16.msra.mxu0 %v3498_v54  ;;  %3565 = vmatpush3.bf16.msra.mxu1 %v3562_v39  ;;  %v1815_v54 = vld [vmem:[%s5321_s12 + $0xf0] sm:$0xff] }
0x1402   :  { %3503 = vmatprep.subr.bf16.mxu0 %v3502_v16  ;;  %3567 = vmatprep.subr.bf16.mxu1 %v3566_v18  ;;  %v5115_v39 = vpack.c.bf16 %v1815_v54, %v1813_v7 }
0x1405   :  { %3505 = vmatpush3.bf16.msra.mxu0 %v3502_v16  ;;  %3569 = vmatpush3.bf16.msra.mxu1 %v3566_v18 }
0x1406   :  { %3507 = vmatprep.subr.bf16.mxu0 %v3506_v28  ;;  %3571 = vmatprep.subr.bf16.mxu1 %v3570_v23 }
0x1409   :  { %3509 = vmatpush3.bf16.msra.mxu0 %v3506_v28  ;;  %3573 = vmatpush3.bf16.msra.mxu1 %v3570_v23 }
0x140a   :  { %3575 = vmatprep.subr.bf16.mxu0 %v4966_v31  ;;  %3607 = vmatprep.subr.bf16.mxu1 %v4966_v31 }
0x140c   :  { %2990 = vmatmul.mubr.f32.vlgmr.msra.gmra.mrb[16].mxu0 %v1418_v43  ;;  %3060 = vmatmul.mubr.f32.vlgmr.msra.gmra.mrb[16].mxu1 %v1418_v43 }
0x140d   :  { %3577 = vmatpush1.bf16.msra.mxu0 %v4980_v36  ;;  %1903 = vmatprep.mubr.f32.mxu0 %v3935_v25 }
0x140e   :  { %3579 = vmatprep.subr.bf16.mxu0 %v4983_v37  ;;  %3609 = vmatpush1.bf16.msra.mxu1 %v4980_v36 }
0x140f   :  { %3611 = vmatprep.subr.bf16.mxu1 %v4983_v37  ;;  %2001 = vmatprep.mubr.f32.mxu1 %v3935_v25 }
0x1411   :  { %3581 = vmatpush1.bf16.msra.mxu0 %v4999_v47 }
0x1412   :  { %3583 = vmatprep.subr.bf16.mxu0 %v5003_v49  ;;  %3613 = vmatpush1.bf16.msra.mxu1 %v4999_v47 }
0x1413   :  { %3615 = vmatprep.subr.bf16.mxu1 %v5003_v49 }
0x1415   :  { %3585 = vmatpush1.bf16.msra.mxu0 %v5021_v57 }
0x1416   :  { %3587 = vmatprep.subr.bf16.mxu0 %v5024_v46  ;;  %3617 = vmatpush1.bf16.msra.mxu1 %v5021_v57 }
0x1417   :  { %3619 = vmatprep.subr.bf16.mxu1 %v5024_v46 }
0x1419   :  { %3589 = vmatpush1.bf16.msra.mxu0 %v5041_v8 }
0x141a   :  { %3591 = vmatprep.subr.bf16.mxu0 %v5044_v11  ;;  %3621 = vmatpush1.bf16.msra.mxu1 %v5041_v8 }
0x141b   :  { %3623 = vmatprep.subr.bf16.mxu1 %v5044_v11 }
0x141d   :  { %3593 = vmatpush1.bf16.msra.mxu0 %v5061_v27 }
0x141e   :  { %3595 = vmatprep.subr.bf16.mxu0 %v5064_v52  ;;  %3625 = vmatpush1.bf16.msra.mxu1 %v5061_v27 }
0x141f   :  { %3627 = vmatprep.subr.bf16.mxu1 %v5064_v52 }
0x1421   :  { %3597 = vmatpush1.bf16.msra.mxu0 %v5081_v59 }
0x1422   :  { %3599 = vmatprep.subr.bf16.mxu0 %v5084_v61  ;;  %3629 = vmatpush1.bf16.msra.mxu1 %v5081_v59 }
0x1423   :  { %3631 = vmatprep.subr.bf16.mxu1 %v5084_v61 }
0x1425   :  { %3601 = vmatpush1.bf16.msra.mxu0 %v5101_v4 }
0x1426   :  { %3603 = vmatprep.subr.bf16.mxu0 %v5104_v6  ;;  %3633 = vmatpush1.bf16.msra.mxu1 %v5101_v4 }
0x1427   :  { %3635 = vmatprep.subr.bf16.mxu1 %v5104_v6 }
0x1429   :  { %3605 = vmatpush1.bf16.msra.mxu0 %v5115_v39 }
0x142a   :  { %3637 = vmatpush1.bf16.msra.mxu1 %v5115_v39  ;;  %3639 = vmatprep.subr.bf16.mxu0 %v4966_v31 }
0x142b   :  { %3671 = vmatprep.subr.bf16.mxu1 %v4966_v31 }
0x142c   :  { %1904 = vmatmul.mubr.f32.vlgmr.msra.gmra.mrb[18].mxu0 %v3935_v25 }
0x142d   :  { %3641 = vmatpush1.bf16.msra.mxu0 %v4980_v36  ;;  %2099 = vmatprep.mubr.f32.mxu0 %v3935_v25 }
0x142e   :  { %3643 = vmatprep.subr.bf16.mxu0 %v4983_v37 }
0x1431   :  { %3645 = vmatpush1.bf16.msra.mxu0 %v4999_v47 }
0x1432   :  { %3647 = vmatprep.subr.bf16.mxu0 %v5003_v49 }
0x1435   :  { %3649 = vmatpush1.bf16.msra.mxu0 %v5021_v57 }
0x1436   :  { %3651 = vmatprep.subr.bf16.mxu0 %v5024_v46 }
0x1439   :  { %3653 = vmatpush1.bf16.msra.mxu0 %v5041_v8 }
0x143a   :  { %3655 = vmatprep.subr.bf16.mxu0 %v5044_v11 }
0x143d   :  { %3657 = vmatpush1.bf16.msra.mxu0 %v5061_v27 }
0x143e   :  { %3659 = vmatprep.subr.bf16.mxu0 %v5064_v52 }
0x1441   :  { %3661 = vmatpush1.bf16.msra.mxu0 %v5081_v59 }
0x1442   :  { %3663 = vmatprep.subr.bf16.mxu0 %v5084_v61 }
0x1445   :  { %3665 = vmatpush1.bf16.msra.mxu0 %v5101_v4 }
0x1446   :  { %3667 = vmatprep.subr.bf16.mxu0 %v5104_v6 }
0x1449   :  { %3669 = vmatpush1.bf16.msra.mxu0 %v5115_v39 }
0x144a   :  { %3703 = vmatprep.subr.bf16.mxu0 %v4966_v31 }
0x14df   :  { %v2991_v13 = vpop.f32.mrb[16].mxu0  ;;  %v3061_v15 = vpop.f32.mrb[16].mxu1 }
0x14e0   :  { %v1826_v16 = vadd.f32 %v2991_v13, %v2673_v10  ;;  %v1836_v18 = vadd.f32 %v3061_v15, %v2674_v12  ;;  %v1626_v19 = vpop.f32.mrb[17].mxu0  ;;  %v1776_v20 = vpop.f32.mrb[17].mxu1 }
0x14e1   :  { %v1825_v22 = vadd.f32 %v2673_v10, %v1626_v19  ;;  %v1835_v24 = vadd.f32 %v2674_v12, %v1776_v20 }
0x14e2   :  { %1828 = vst [vmem:[#allocation2 + $0x8] sm:$0xff] %v1826_v16  ;;  %1838 = vst [vmem:[#allocation3 + $0x8] sm:$0xff] %v1836_v18 }
0x14e3   :  { %1827 = vst [vmem:[#allocation2] sm:$0xff] %v1825_v22  ;;  %1837 = vst [vmem:[#allocation3] sm:$0xff] %v1835_v24 }
0x14e9   :  { %v1912_v28 = vld [vmem:[#allocation3 + $0xe] sm:$0x3]  ;;  %v2010_v17 = vld [vmem:[#allocation3 + $0xc] sm:$0x3]  ;;  %v2108_v24 = vld [vmem:[#allocation3 + $0xa] sm:$0x3] }
0x14ea   :  { %v1914_v23 = vrot.slane %v1912_v28, 6  ;;  %v1911_v29 = vld [vmem:[#allocation2] sm:$0x3]  ;;  %v2012_v21 = vrot.slane %v2010_v17, 6  ;;  %v2009_v26 = vld [vmem:[#allocation2 + $0x2] sm:$0x3] }
0x14eb   :  { %v2110_v28 = vrot.slane %v2108_v24, 6 }
0x14ec   :  { %v1916_v34 = vsel %vm709_vm2, %v1911_v29, %v1914_v23  ;;  %v2014_v58 = vsel %vm709_vm2, %v2009_v26, %v2012_v21  ;;  %v2107_v23 = vld [vmem:[#allocation2 + $0x4] sm:$0x3]  ;;  %v2205_v21 = vld [vmem:[#allocation2 + $0x6] sm:$0x3] }
0x14ff   :  { %v1905_v30 = vpop.f32.mrb[18].mxu0 }
0x1500   :  { %v1907_v32 = vpop.f32.mrb[19].mxu0 }
0x1501   :  { %v1910_v33 = vsel %vm408_vm1, %v1905_v30, %v1907_v32 }
0x1502   :  { %v1917_v35 = vadd.f32 %v1916_v34, %v1910_v33  ;;  %v2112_v33 = vsel %vm709_vm2, %v2107_v23, %v2110_v28  ;;  %v2303_v23 = vld [vmem:[#allocation2 + $0x8] sm:$0x3] }
0x1504   :  { %v1919_v38 = vmul.f32 0.5, %v1917_v35 }
0x1506   :  { %3885 = vtanh.f32 %v1919_v38 }
0x1507   :  { %3887 = vtanh.f32 %v1917_v35 }
0x1510   :  { %v3886_v41 = vpop.eup %3885 }
0x1511   :  { %v1921_v43 = vmul.f32 0.5, %v3886_v41  ;;  %v3888_v45 = vpop.eup %3887 }
0x1513   :  { %v1922_v44 = vadd.f32 0.5, %v1921_v43 }
0x1515   :  { %v1923_v50 = vsel %vm4610_vm5, %v3888_v45, %v1922_v44 }
0x1516   :  { %1924 = vrot.lane.b32.xlu0 %v1923_v50, %s3936_s6  ;;  %v1927_v51 = vmul.f32 0.0, %v1923_v50 }
0x1588   :  { %v1925_v42 = vpop.permute.xlu0 %1924 }
0x1589   :  { %v1926_v48 = vmul.f32 %v1925_v42, %v1923_v50 }
0x158b   :  { %1928 = vrot.lane.b32.xlu1 %v1926_v48, %s3937_s7 }
0x15fd   :  { %v1929_v60 = vpop.permute.xlu1 %1928 }
0x15fe   :  { %v1930_v63 = vadd.f32 %v1929_v60, %v1927_v51 }
0x1600   :  { %3889 = vtanh.f32 %v1930_v63 }
0x160a   :  { %v3890_v2 = vpop.eup %3889 }
0x160b   :  { %1932 = vrot.lane.b32.xlu0 %v3890_v2, %s3936_s6 }
0x167d   :  { %v1933_v5 = vpop.permute.xlu0 %1932 }
0x167e   :  { %v1934_v14 = vmul.f32 %v1933_v5, %v1923_v50 }
0x1680   :  { %1935 = vst [vmem:[#allocation4] sm:$0x3] %v1934_v14  ;;  %1936 = vst [vmem:[#allocation5 + $0xc] sm:$0xc] %v1934_v14  ;;  %2002 = vmatmul.mubr.f32.vlgmr.msra.gmra.mrb[18].mxu1 %v1934_v14  ;;  %v2206_v14 = vld [vmem:[#allocation3 + $0x8] sm:$0x3] }
0x1681   :  { %3673 = vmatpush1.bf16.msra.mxu1 %v4980_v36  ;;  %2197 = vmatprep.mubr.f32.mxu1 %v3935_v25  ;;  %v2208_v17 = vrot.slane %v2206_v14, 6 }
0x1682   :  { %3675 = vmatprep.subr.bf16.mxu1 %v4983_v37 }
0x1685   :  { %3677 = vmatpush1.bf16.msra.mxu1 %v4999_v47 }
0x1686   :  { %3679 = vmatprep.subr.bf16.mxu1 %v5003_v49 }
0x1689   :  { %3681 = vmatpush1.bf16.msra.mxu1 %v5021_v57 }
0x168a   :  { %3683 = vmatprep.subr.bf16.mxu1 %v5024_v46 }
0x168d   :  { %3685 = vmatpush1.bf16.msra.mxu1 %v5041_v8 }
0x168e   :  { %3687 = vmatprep.subr.bf16.mxu1 %v5044_v11 }
0x1691   :  { %3689 = vmatpush1.bf16.msra.mxu1 %v5061_v27 }
0x1692   :  { %3691 = vmatprep.subr.bf16.mxu1 %v5064_v52 }
0x1695   :  { %3693 = vmatpush1.bf16.msra.mxu1 %v5081_v59 }
0x1696   :  { %3695 = vmatprep.subr.bf16.mxu1 %v5084_v61 }
0x1699   :  { %3697 = vmatpush1.bf16.msra.mxu1 %v5101_v4 }
0x169a   :  { %3699 = vmatprep.subr.bf16.mxu1 %v5104_v6 }
0x169d   :  { %3701 = vmatpush1.bf16.msra.mxu1 %v5115_v39 }
0x169e   :  { %3735 = vmatprep.subr.bf16.mxu1 %v4966_v31 }
0x1753   :  { %v2003_v53 = vpop.f32.mrb[18].mxu1 }
0x1754   :  { %v2005_v55 = vpop.f32.mrb[19].mxu1 }
0x1755   :  { %v2008_v56 = vsel %vm408_vm1, %v2003_v53, %v2005_v55 }
0x1756   :  { %v2015_v62 = vadd.f32 %v2014_v58, %v2008_v56  ;;  %v2210_v56 = vsel %vm709_vm2, %v2205_v21, %v2208_v17 }
0x1758   :  { %v2017_v0 = vmul.f32 0.5, %v2015_v62 }
0x175a   :  { %3891 = vtanh.f32 %v2017_v0 }
0x175b   :  { %3893 = vtanh.f32 %v2015_v62 }
0x1764   :  { %v3892_v1 = vpop.eup %3891 }
0x1765   :  { %v2019_v3 = vmul.f32 0.5, %v3892_v1  ;;  %v3894_v54 = vpop.eup %3893 }
0x1767   :  { %v2020_v7 = vadd.f32 0.5, %v2019_v3 }
0x1769   :  { %v2021_v10 = vsel %vm4610_vm5, %v3894_v54, %v2020_v7 }
0x176a   :  { %2022 = vrot.lane.b32.xlu1 %v2021_v10, %s3936_s6  ;;  %v2025_v15 = vmul.f32 %v2021_v10, %v1930_v63 }
0x17dc   :  { %v2023_v12 = vpop.permute.xlu1 %2022 }
0x17dd   :  { %v2024_v13 = vmul.f32 %v2023_v12, %v2021_v10 }
0x17df   :  { %2026 = vrot.lane.b32.xlu0 %v2024_v13, %s3937_s7 }
0x1851   :  { %v2027_v16 = vpop.permute.xlu0 %2026 }
0x1852   :  { %v2028_v18 = vadd.f32 %v2027_v16, %v2025_v15 }
0x1854   :  { %3895 = vtanh.f32 %v2028_v18 }
0x185e   :  { %v3896_v19 = vpop.eup %3895 }
0x185f   :  { %2030 = vrot.lane.b32.xlu1 %v3896_v19, %s3936_s6 }
0x18d1   :  { %v2031_v20 = vpop.permute.xlu1 %2030 }
0x18d2   :  { %v2032_v22 = vmul.f32 %v2031_v20, %v2021_v10  ;;  %v2304_v20 = vld [vmem:[#allocation3 + $0x6] sm:$0x3] }
0x18d4   :  { %2033 = vst [vmem:[#allocation4 + $0x2] sm:$0x3] %v2032_v22  ;;  %2034 = vst [vmem:[#allocation5 + $0xa] sm:$0xc] %v2032_v22  ;;  %2100 = vmatmul.mubr.f32.vlgmr.msra.gmra.mrb[20].mxu0 %v2032_v22  ;;  %v2306_v22 = vrot.slane %v2304_v20, 6 }
0x18d5   :  { %3705 = vmatpush1.bf16.msra.mxu0 %v4980_v36  ;;  %2295 = vmatprep.mubr.f32.mxu0 %v3935_v25 }
0x18d6   :  { %3707 = vmatprep.subr.bf16.mxu0 %v4983_v37 }
0x18d9   :  { %3709 = vmatpush1.bf16.msra.mxu0 %v4999_v47 }
0x18da   :  { %3711 = vmatprep.subr.bf16.mxu0 %v5003_v49 }
0x18dd   :  { %3713 = vmatpush1.bf16.msra.mxu0 %v5021_v57 }
0x18de   :  { %3715 = vmatprep.subr.bf16.mxu0 %v5024_v46 }
0x18e1   :  { %3717 = vmatpush1.bf16.msra.mxu0 %v5041_v8 }
0x18e2   :  { %3719 = vmatprep.subr.bf16.mxu0 %v5044_v11 }
0x18e5   :  { %3721 = vmatpush1.bf16.msra.mxu0 %v5061_v27 }
0x18e6   :  { %3723 = vmatprep.subr.bf16.mxu0 %v5064_v52 }
0x18e9   :  { %3725 = vmatpush1.bf16.msra.mxu0 %v5081_v59 }
0x18ea   :  { %3727 = vmatprep.subr.bf16.mxu0 %v5084_v61 }
0x18ed   :  { %3729 = vmatpush1.bf16.msra.mxu0 %v5101_v4 }
0x18ee   :  { %3731 = vmatprep.subr.bf16.mxu0 %v5104_v6 }
0x18f1   :  { %3733 = vmatpush1.bf16.msra.mxu0 %v5115_v39 }
0x18f2   :  { %3767 = vmatprep.subr.bf16.mxu0 %v4966_v31 }
0x19a7   :  { %v2101_v29 = vpop.f32.mrb[20].mxu0 }
0x19a8   :  { %v2103_v30 = vpop.f32.mrb[21].mxu0 }
0x19a9   :  { %v2106_v32 = vsel %vm408_vm1, %v2101_v29, %v2103_v30  ;;  %v2308_v30 = vsel %vm709_vm2, %v2303_v23, %v2306_v22  ;;  %v2598_v23 = vld [vmem:[#allocation3] sm:$0x3] }
0x19aa   :  { %v2113_v34 = vadd.f32 %v2112_v33, %v2106_v32 }
0x19ac   :  { %v2115_v35 = vmul.f32 0.5, %v2113_v34 }
0x19ae   :  { %3897 = vtanh.f32 %v2115_v35 }
0x19af   :  { %3899 = vtanh.f32 %v2113_v34 }
0x19b8   :  { %v3898_v38 = vpop.eup %3897 }
0x19b9   :  { %v2117_v41 = vmul.f32 0.5, %v3898_v38  ;;  %v3900_v44 = vpop.eup %3899 }
0x19bb   :  { %v2118_v43 = vadd.f32 0.5, %v2117_v41 }
0x19bd   :  { %v2119_v45 = vsel %vm4610_vm5, %v3900_v44, %v2118_v43 }
0x19be   :  { %2120 = vrot.lane.b32.xlu0 %v2119_v45, %s3936_s6  ;;  %v2123_v48 = vmul.f32 %v2119_v45, %v2028_v18 }
0x1a30   :  { %v2121_v50 = vpop.permute.xlu0 %2120 }
0x1a31   :  { %v2122_v42 = vmul.f32 %v2121_v50, %v2119_v45 }
0x1a33   :  { %2124 = vrot.lane.b32.xlu1 %v2122_v42, %s3937_s7 }
0x1aa5   :  { %v2125_v51 = vpop.permute.xlu1 %2124 }
0x1aa6   :  { %v2126_v60 = vadd.f32 %v2125_v51, %v2123_v48 }
0x1aa8   :  { %3901 = vtanh.f32 %v2126_v60 }
0x1ab2   :  { %v3902_v63 = vpop.eup %3901 }
0x1ab3   :  { %2128 = vrot.lane.b32.xlu0 %v3902_v63, %s3936_s6 }
0x1b25   :  { %v2129_v2 = vpop.permute.xlu0 %2128 }
0x1b26   :  { %v2130_v5 = vmul.f32 %v2129_v2, %v2119_v45 }
0x1b28   :  { %2131 = vst [vmem:[#allocation4 + $0x4] sm:$0x3] %v2130_v5  ;;  %2132 = vst [vmem:[#allocation5 + $0x8] sm:$0xc] %v2130_v5  ;;  %2198 = vmatmul.mubr.f32.vlgmr.msra.gmra.mrb[20].mxu1 %v2130_v5 }
0x1b29   :  { %3737 = vmatpush1.bf16.msra.mxu1 %v4980_v36  ;;  %2393 = vmatprep.mubr.f32.mxu1 %v3935_v25 }
0x1b2a   :  { %3739 = vmatprep.subr.bf16.mxu1 %v4983_v37 }
0x1b2d   :  { %3741 = vmatpush1.bf16.msra.mxu1 %v4999_v47 }
0x1b2e   :  { %3743 = vmatprep.subr.bf16.mxu1 %v5003_v49 }
0x1b31   :  { %3745 = vmatpush1.bf16.msra.mxu1 %v5021_v57 }
0x1b32   :  { %3747 = vmatprep.subr.bf16.mxu1 %v5024_v46 }
0x1b35   :  { %3749 = vmatpush1.bf16.msra.mxu1 %v5041_v8 }
0x1b36   :  { %3751 = vmatprep.subr.bf16.mxu1 %v5044_v11 }
0x1b39   :  { %3753 = vmatpush1.bf16.msra.mxu1 %v5061_v27 }
0x1b3a   :  { %3755 = vmatprep.subr.bf16.mxu1 %v5064_v52 }
0x1b3d   :  { %3757 = vmatpush1.bf16.msra.mxu1 %v5081_v59 }
0x1b3e   :  { %3759 = vmatprep.subr.bf16.mxu1 %v5084_v61 }
0x1b41   :  { %3761 = vmatpush1.bf16.msra.mxu1 %v5101_v4 }
0x1b42   :  { %3763 = vmatprep.subr.bf16.mxu1 %v5104_v6 }
0x1b45   :  { %3765 = vmatpush1.bf16.msra.mxu1 %v5115_v39 }
0x1b46   :  { %3799 = vmatprep.subr.bf16.mxu1 %v4966_v31 }
0x1bfb   :  { %v2199_v26 = vpop.f32.mrb[20].mxu1 }
0x1bfc   :  { %v2201_v53 = vpop.f32.mrb[21].mxu1 }
0x1bfd   :  { %v2204_v55 = vsel %vm408_vm1, %v2199_v26, %v2201_v53  ;;  %v2500_v53 = vld [vmem:[#allocation3 + $0x2] sm:$0x3] }
0x1bfe   :  { %v2211_v58 = vadd.f32 %v2210_v56, %v2204_v55  ;;  %v2502_v55 = vrot.slane %v2500_v53, 6 }
0x1c00   :  { %v2213_v62 = vmul.f32 0.5, %v2211_v58 }
0x1c02   :  { %3903 = vtanh.f32 %v2213_v62  ;;  %v2499_v62 = vld [vmem:[#allocation2 + $0xc] sm:$0x3] }
0x1c03   :  { %3905 = vtanh.f32 %v2211_v58 }
0x1c0c   :  { %v3904_v0 = vpop.eup %3903 }
0x1c0d   :  { %v2215_v1 = vmul.f32 0.5, %v3904_v0  ;;  %v3906_v7 = vpop.eup %3905 }
0x1c0f   :  { %v2216_v3 = vadd.f32 0.5, %v2215_v1  ;;  %v2504_v1 = vsel %vm709_vm2, %v2499_v62, %v2502_v55 }
0x1c11   :  { %v2217_v31 = vsel %vm4610_vm5, %v3906_v7, %v2216_v3 }
0x1c12   :  { %2218 = vrot.lane.b32.xlu1 %v2217_v31, %s3936_s6  ;;  %v2221_v12 = vmul.f32 %v2217_v31, %v2126_v60 }
0x1c84   :  { %v2219_v54 = vpop.permute.xlu1 %2218 }
0x1c85   :  { %v2220_v10 = vmul.f32 %v2219_v54, %v2217_v31 }
0x1c87   :  { %2222 = vrot.lane.b32.xlu0 %v2220_v10, %s3937_s7 }
0x1cf9   :  { %v2223_v13 = vpop.permute.xlu0 %2222 }
0x1cfa   :  { %v2224_v15 = vadd.f32 %v2223_v13, %v2221_v12 }
0x1cfc   :  { %3907 = vtanh.f32 %v2224_v15 }
0x1d06   :  { %v3908_v16 = vpop.eup %3907 }
0x1d07   :  { %2226 = vrot.lane.b32.xlu1 %v3908_v16, %s3936_s6 }
0x1d79   :  { %v2227_v18 = vpop.permute.xlu1 %2226 }
0x1d7a   :  { %v2228_v19 = vmul.f32 %v2227_v18, %v2217_v31 }
0x1d7c   :  { %2229 = vst [vmem:[#allocation4 + $0x6] sm:$0x3] %v2228_v19  ;;  %2230 = vst [vmem:[#allocation5 + $0x6] sm:$0xc] %v2228_v19  ;;  %2296 = vmatmul.mubr.f32.vlgmr.msra.gmra.mrb[22].mxu0 %v2228_v19 }
0x1d7d   :  { %3769 = vmatpush1.bf16.msra.mxu0 %v4980_v36  ;;  %2491 = vmatprep.mubr.f32.mxu0 %v3935_v25 }
0x1d7e   :  { %3771 = vmatprep.subr.bf16.mxu0 %v4983_v37 }
0x1d81   :  { %3773 = vmatpush1.bf16.msra.mxu0 %v4999_v47 }
0x1d82   :  { %3775 = vmatprep.subr.bf16.mxu0 %v5003_v49 }
0x1d85   :  { %3777 = vmatpush1.bf16.msra.mxu0 %v5021_v57 }
0x1d86   :  { %3779 = vmatprep.subr.bf16.mxu0 %v5024_v46 }
0x1d89   :  { %3781 = vmatpush1.bf16.msra.mxu0 %v5041_v8 }
0x1d8a   :  { %3783 = vmatprep.subr.bf16.mxu0 %v5044_v11 }
0x1d8d   :  { %3785 = vmatpush1.bf16.msra.mxu0 %v5061_v27 }
0x1d8e   :  { %3787 = vmatprep.subr.bf16.mxu0 %v5064_v52 }
0x1d91   :  { %3789 = vmatpush1.bf16.msra.mxu0 %v5081_v59 }
0x1d92   :  { %3791 = vmatprep.subr.bf16.mxu0 %v5084_v61 }
0x1d95   :  { %3793 = vmatpush1.bf16.msra.mxu0 %v5101_v4 }
0x1d96   :  { %3795 = vmatprep.subr.bf16.mxu0 %v5104_v6 }
0x1d99   :  { %3797 = vmatpush1.bf16.msra.mxu0 %v5115_v39 }
0x1e4f   :  { %v2297_v24 = vpop.f32.mrb[22].mxu0 }
0x1e50   :  { %v2299_v28 = vpop.f32.mrb[23].mxu0 }
0x1e51   :  { %v2302_v29 = vsel %vm408_vm1, %v2297_v24, %v2299_v28 }
0x1e52   :  { %v2309_v32 = vadd.f32 %v2308_v30, %v2302_v29  ;;  %v2600_v29 = vrot.slane %v2598_v23, 6 }
0x1e54   :  { %v2311_v33 = vmul.f32 0.5, %v2309_v32 }
0x1e56   :  { %3909 = vtanh.f32 %v2311_v33  ;;  %v2597_v33 = vld [vmem:[#allocation2 + $0xe] sm:$0x3] }
0x1e57   :  { %3911 = vtanh.f32 %v2309_v32 }
0x1e60   :  { %v3910_v34 = vpop.eup %3909 }
0x1e61   :  { %v2313_v35 = vmul.f32 0.5, %v3910_v34  ;;  %v3912_v41 = vpop.eup %3911 }
0x1e63   :  { %v2314_v38 = vadd.f32 0.5, %v2313_v35  ;;  %v2602_v35 = vsel %vm709_vm2, %v2597_v33, %v2600_v29 }
0x1e65   :  { %v2315_v43 = vsel %vm4610_vm5, %v3912_v41, %v2314_v38 }
0x1e66   :  { %2316 = vrot.lane.b32.xlu0 %v2315_v43, %s3936_s6  ;;  %v2319_v50 = vmul.f32 %v2315_v43, %v2224_v15 }
0x1ed8   :  { %v2317_v44 = vpop.permute.xlu0 %2316 }
0x1ed9   :  { %v2318_v45 = vmul.f32 %v2317_v44, %v2315_v43 }
0x1edb   :  { %2320 = vrot.lane.b32.xlu1 %v2318_v45, %s3937_s7 }
0x1f4d   :  { %v2321_v42 = vpop.permute.xlu1 %2320 }
0x1f4e   :  { %v2322_v48 = vadd.f32 %v2321_v42, %v2319_v50 }
0x1f50   :  { %3913 = vtanh.f32 %v2322_v48 }
0x1f5a   :  { %v3914_v51 = vpop.eup %3913 }
0x1f5b   :  { %2324 = vrot.lane.b32.xlu0 %v3914_v51, %s3936_s6 }
0x1fcd   :  { %v2325_v60 = vpop.permute.xlu0 %2324 }
0x1fce   :  { %v2326_v63 = vmul.f32 %v2325_v60, %v2315_v43 }
0x1fd0   :  { %2327 = vst [vmem:[#allocation4 + $0x8] sm:$0x3] %v2326_v63  ;;  %2328 = vst [vmem:[#allocation5 + $0x4] sm:$0xc] %v2326_v63  ;;  %2394 = vmatmul.mubr.f32.vlgmr.msra.gmra.mrb[22].mxu1 %v2326_v63 }
0x1fd1   :  { %3801 = vmatpush1.bf16.msra.mxu1 %v4980_v36  ;;  %2589 = vmatprep.mubr.f32.mxu1 %v3935_v25  ;;  %v2402_v25 = vld [vmem:[#allocation3 + $0x4] sm:$0x3] }
0x1fd2   :  { %3803 = vmatprep.subr.bf16.mxu1 %v4983_v37  ;;  %v2404_v36 = vrot.slane %v2402_v25, 6 }
0x1fd5   :  { %3805 = vmatpush1.bf16.msra.mxu1 %v4999_v47 }
0x1fd6   :  { %3807 = vmatprep.subr.bf16.mxu1 %v5003_v49  ;;  %v2401_v49 = vld [vmem:[#allocation2 + $0xa] sm:$0x3] }
0x1fd9   :  { %3809 = vmatpush1.bf16.msra.mxu1 %v5021_v57 }
0x1fda   :  { %3811 = vmatprep.subr.bf16.mxu1 %v5024_v46  ;;  %v2406_v46 = vsel %vm709_vm2, %v2401_v49, %v2404_v36  ;;  %v2676_v36 = vld [vmem:[%s5326_s16] ss:$0 sm:$0xff] }
0x1fdd   :  { %3813 = vmatpush1.bf16.msra.mxu1 %v5041_v8 }
0x1fde   :  { %3815 = vmatprep.subr.bf16.mxu1 %v5044_v11 }
0x1fe1   :  { %3817 = vmatpush1.bf16.msra.mxu1 %v5061_v27 }
0x1fe2   :  { %3819 = vmatprep.subr.bf16.mxu1 %v5064_v52 }
0x1fe5   :  { %3821 = vmatpush1.bf16.msra.mxu1 %v5081_v59 }
0x1fe6   :  { %3823 = vmatprep.subr.bf16.mxu1 %v5084_v61 }
0x1fe9   :  { %3825 = vmatpush1.bf16.msra.mxu1 %v5101_v4 }
0x1fea   :  { %3827 = vmatprep.subr.bf16.mxu1 %v5104_v6 }
0x1fed   :  { %3829 = vmatpush1.bf16.msra.mxu1 %v5115_v39 }
0x20a3   :  { %v2395_v37 = vpop.f32.mrb[22].mxu1 }
0x20a4   :  { %v2397_v47 = vpop.f32.mrb[23].mxu1 }
0x20a5   :  { %v2400_v57 = vsel %vm408_vm1, %v2395_v37, %v2397_v47  ;;  %v2627_v37 = vld [vmem:[#allocation5 + $0x8] sm:$0x3] }
0x20a6   :  { %v2407_v8 = vadd.f32 %v2406_v46, %v2400_v57  ;;  %v2644_v47 = vmul.f32 %v2676_v36, %v2627_v37 }
0x20a8   :  { %v2409_v11 = vmul.f32 0.5, %v2407_v8  ;;  %v2645_v49 = vsel %vm709_vm2, %v2644_v47, 0.0 }
0x20aa   :  { %3915 = vtanh.f32 %v2409_v11 }
0x20ab   :  { %3917 = vtanh.f32 %v2407_v8 }
0x20b4   :  { %v3916_v27 = vpop.eup %3915 }
0x20b5   :  { %v2411_v52 = vmul.f32 0.5, %v3916_v27  ;;  %v3918_v61 = vpop.eup %3917 }
0x20b7   :  { %v2412_v59 = vadd.f32 0.5, %v2411_v52  ;;  %v2677_v52 = vld [vmem:[#allocation6] ss:$0 sm:$0xff] }
0x20b9   :  { %v2413_v4 = vsel %vm4610_vm5, %v3918_v61, %v2412_v59 }
0x20ba   :  { %2414 = vrot.lane.b32.xlu1 %v2413_v4, %s3936_s6  ;;  %v2417_v2 = vmul.f32 %v2413_v4, %v2322_v48  ;;  %v2626_v48 = vld [vmem:[#allocation4 + $0x8] sm:$0x3] }
0x20bb   :  { %v2634_v51 = vmul.f32 %v2675_v9, %v2626_v48 }
0x20bd   :  { %v2635_v60 = vsel %vm709_vm2, %v2634_v51, 0.0 }
0x212c   :  { %v2415_v6 = vpop.permute.xlu1 %2414 }
0x212d   :  { %v2416_v39 = vmul.f32 %v2415_v6, %v2413_v4 }
0x212f   :  { %2418 = vrot.lane.b32.xlu0 %v2416_v39, %s3937_s7 }
0x21a1   :  { %v2419_v5 = vpop.permute.xlu0 %2418 }
0x21a2   :  { %v2420_v14 = vadd.f32 %v2419_v5, %v2417_v2 }
0x21a4   :  { %3919 = vtanh.f32 %v2420_v14 }
0x21ae   :  { %v3920_v17 = vpop.eup %3919 }
0x21af   :  { %2422 = vrot.lane.b32.xlu1 %v3920_v17, %s3936_s6 }
0x2221   :  { %v2423_v21 = vpop.permute.xlu1 %2422 }
0x2222   :  { %v2424_v26 = vmul.f32 %v2423_v21, %v2413_v4 }
0x2224   :  { %2425 = vst [vmem:[#allocation4 + $0xa] sm:$0x3] %v2424_v26  ;;  %2426 = vst [vmem:[#allocation5 + $0x2] sm:$0xc] %v2424_v26  ;;  %2492 = vmatmul.mubr.f32.vlgmr.msra.gmra.mrb[24].mxu0 %v2424_v26 }
0x22f7   :  { %v2493_v56 = vpop.f32.mrb[24].mxu0 }
0x22f8   :  { %v2495_v58 = vpop.f32.mrb[25].mxu0 }
0x22f9   :  { %v2498_v0 = vsel %vm408_vm1, %v2493_v56, %v2495_v58 }
0x22fa   :  { %v2505_v3 = vadd.f32 %v2504_v1, %v2498_v0 }
0x22fc   :  { %v2507_v7 = vmul.f32 0.5, %v2505_v3 }
0x22fe   :  { %3921 = vtanh.f32 %v2507_v7 }
0x22ff   :  { %3923 = vtanh.f32 %v2505_v3 }
0x2308   :  { %v3922_v31 = vpop.eup %3921 }
0x2309   :  { %v2509_v54 = vmul.f32 0.5, %v3922_v31  ;;  %v3924_v12 = vpop.eup %3923 }
0x230b   :  { %v2510_v10 = vadd.f32 0.5, %v2509_v54 }
0x230d   :  { %v2511_v13 = vsel %vm4610_vm5, %v3924_v12, %v2510_v10 }
0x230e   :  { %2512 = vrot.lane.b32.xlu0 %v2511_v13, %s3936_s6  ;;  %v2515_v18 = vmul.f32 %v2511_v13, %v2420_v14 }
0x2380   :  { %v2513_v15 = vpop.permute.xlu0 %2512 }
0x2381   :  { %v2514_v16 = vmul.f32 %v2513_v15, %v2511_v13 }
0x2383   :  { %2516 = vrot.lane.b32.xlu1 %v2514_v16, %s3937_s7 }
0x23f5   :  { %v2517_v19 = vpop.permute.xlu1 %2516 }
0x23f6   :  { %v2518_v20 = vadd.f32 %v2517_v19, %v2515_v18 }
0x23f8   :  { %3925 = vtanh.f32 %v2518_v20 }
0x2402   :  { %v3926_v22 = vpop.eup %3925 }
0x2403   :  { %2520 = vrot.lane.b32.xlu0 %v3926_v22, %s3936_s6 }
0x2475   :  { %v2521_v24 = vpop.permute.xlu0 %2520 }
0x2476   :  { %v2522_v28 = vmul.f32 %v2521_v24, %v2511_v13 }
0x2478   :  { %2523 = vst [vmem:[#allocation4 + $0xc] sm:$0x3] %v2522_v28  ;;  %2524 = vst [vmem:[#allocation5] sm:$0xc] %v2522_v28  ;;  %2590 = vmatmul.mubr.f32.vlgmr.msra.gmra.mrb[24].mxu1 %v2522_v28 }
0x254b   :  { %v2591_v30 = vpop.f32.mrb[24].mxu1 }
0x254c   :  { %v2593_v32 = vpop.f32.mrb[25].mxu1 }
0x254d   :  { %v2596_v34 = vsel %vm408_vm1, %v2591_v30, %v2593_v32 }
0x254e   :  { %v2603_v38 = vadd.f32 %v2602_v35, %v2596_v34 }
0x2550   :  { %v2605_v41 = vmul.f32 0.5, %v2603_v38 }
0x2552   :  { %3927 = vtanh.f32 %v2605_v41 }
0x2553   :  { %3929 = vtanh.f32 %v2603_v38 }
0x255c   :  { %v3928_v43 = vpop.eup %3927 }
0x255d   :  { %v2607_v44 = vmul.f32 0.5, %v3928_v43  ;;  %v3930_v50 = vpop.eup %3929 }
0x255f   :  { %v2608_v45 = vadd.f32 0.5, %v2607_v44 }
0x2561   :  { %v2609_v42 = vsel %vm4610_vm5, %v3930_v50, %v2608_v45 }
0x2562   :  { %2610 = vrot.lane.b32.xlu1 %v2609_v42, %s3936_s6  ;;  %v2613_v57 = vmul.f32 %v2609_v42, %v2518_v20 }
0x2586   :  { %2636 = vadd.xlane.f32.xlu1 %v2635_v60 }
0x25d4   :  { %v2611_v63 = vpop.permute.xlu1 %2610 }
0x25d5   :  { %v2612_v25 = vmul.f32 %v2611_v63, %v2609_v42 }
0x25d7   :  { %2614 = vrot.lane.b32.xlu0 %v2612_v25, %s3937_s7 }
0x25f6   :  { %2646 = vadd.xlane.f32.xlu0 %v2645_v49 }
0x2613   :  { %v2637_v27 = vpop.xlane.xlu1 %2636 }
0x2649   :  { %v2615_v46 = vpop.permute.xlu0 %2614 }
0x264a   :  { %v2616_v8 = vadd.f32 %v2615_v46, %v2613_v57 }
0x264c   :  { %3931 = vtanh.f32 %v2616_v8 }
0x2656   :  { %v3932_v11 = vpop.eup %3931 }
0x2657   :  { %2618 = vrot.lane.b32.xlu0 %v3932_v11, %s3936_s6 }
0x2683   :  { %v2647_v59 = vpop.xlane.xlu0 %2646 }
0x2684   :  { %v2648_v61 = vadd.f32 %v2647_v59, %v2637_v27 }
0x2686   :  { %v2655_v4 = vadd.f32 %v2677_v52, %v2648_v61 }
0x2688   :  { %v2656_v6 = vmul.f32 0.5, %v2655_v4 }
0x268a   :  { %3933 = vtanh.f32 %v2656_v6 }
0x2694   :  { %v3934_v39 = vpop.eup %3933 }
0x2695   :  { %v2658_v2 = vmul.f32 0.5, %v3934_v39 }
0x2697   :  { %v2659_v5 = vadd.f32 0.5, %v2658_v2 }
0x2699   :  { %2661 = vst.msk [vmem:[%s5327_s18] sm:$0x3] %vm2660_vm6, %v2659_v5 }
0x26c9   :  { %v2619_v14 = vpop.permute.xlu0 %2618 }
0x26ca   :  { %v2620_v17 = vmul.f32 %v2619_v14, %v2609_v42 }
0x26cc   :  { %2621 = vst [vmem:[#allocation4 + $0xe] sm:$0x3] %v2620_v17  ;;  %2622 = vst [vmem:[#allocation5 - $0x2] sm:$0xc] %v2620_v17 }

</bundles_post_ra>
